<compile_context>
chip_gen: v7x
topology: tpu7x:2x2x1
jax: 0.10.0
libtpu: 0.0.40
codegen_flags: <defaults>
</compile_context>

<pallas_src>
import functools

import jax
import jax.numpy as jnp
import numpy as np
from jax.experimental import pallas as pl
from jax.experimental.pallas import tpu as pltpu

EPS = 1e-5
LANES = 128       # lane-dense padded width for the logits output
CIN0_PAD = 8      # pad conv0's Cin=1 up to one f32 sublane tile
BATCH_TILE = 8    # samples per grid step (raises matmul M dim, amortizes step cost)


# ----------------------------- fused kernel --------------------------------- #

def _make_kernel(B, L0, layers_num, blocks_num, conv_meta):
    """Whole-network kernel; one grid step = BATCH_TILE samples end-to-end.

    conv_meta[j] = dict(off=row offset in weight blob, kc=K*Cin, cout=Cout), in
    forward order: conv0, (layer_i c0, c1)*, (block_i c0, c1, conv11_i)*.
    Activations are a flat (B*L, C) slab, row = b*L + l.
    """

    def kernel(x_ref, w_ref, s_ref, b_ref, *rest):
        sub_refs = rest[:blocks_num]                      # per-block even-row selectors
        pool_ref, lw_ref, lb_ref, out_ref = rest[blocks_num:]

        # Per-length boundary masks, built ONCE per distinct length (3 iotas total).
        mask_cache = {}

        def masks(M, L):
            key = (M, L)
            if key not in mask_cache:
                ridx = jax.lax.broadcasted_iota(jnp.int32, (M, 1), 0)
                lpos = (ridx & (L - 1)) if (L & (L - 1)) == 0 else (ridx % L)
                mask_cache[key] = (lpos != 0, lpos != (L - 1))
            return mask_cache[key]

        def load_w(j):
            m = conv_meta[j]
            return w_ref[m["off"]:m["off"] + m["kc"], :m["cout"]]

        def affine(j, h, relu, residual=None):
            cout = conv_meta[j]["cout"]
            y = h * s_ref[j:j + 1, :cout] + b_ref[j:j + 1, :cout]
            if residual is not None:
                y = y + residual
            return jnp.maximum(y, 0.0) if relu else y

        def patch3(y, L):
            """(M, C) -> (M, 3C): [x[l-1] | x[l] | x[l+1]] per sample, zero padded."""
            M, C = y.shape
            mf, ml = masks(M, L)
            z = jnp.zeros((1, C), jnp.float32)
            prev = jnp.where(mf, jnp.concatenate([z, y[:-1, :]], axis=0), 0.0)
            nxt = jnp.where(ml, jnp.concatenate([y[1:, :], z], axis=0), 0.0)
            return jnp.concatenate([prev, y, nxt], axis=-1)

        def conv3(j, y, L, relu, residual=None):
            h = jnp.dot(patch3(y, L), load_w(j), preferred_element_type=jnp.float32)
            return affine(j, h, relu, residual)

        # ---- stage 0: conv0 + bn0 + ReLU, then residual layers (stride 1) ----
        jc, L = 0, L0
        y = conv3(jc, x_ref[...], L, relu=True)
        jc += 1
        for _ in range(layers_num):
            h = conv3(jc, y, L, relu=True)
            y = conv3(jc + 1, h, L, relu=True, residual=y)   # ReLU after residual add
            jc += 2

        # ---- downsample blocks: Y = ReLU(block(Y) + conv11(Y)) ----
        for bi in range(blocks_num):
            j0, j1, j11 = jc, jc + 1, jc + 2
            jc += 3
            cin = conv_meta[j11]["kc"]                       # conv11 is 1x1 -> kc == Cin
            S = sub_refs[bi][...]                            # (B*L/2, B*L) even-row selector
            p_sub = jnp.dot(S, patch3(y, L), preferred_element_type=jnp.float32)
            y_sub = p_sub[:, cin:2 * cin]                    # middle taps == subsampled Y
            sc = affine(j11, jnp.dot(y_sub, load_w(j11),
                                     preferred_element_type=jnp.float32), relu=False)
            h = affine(j0, jnp.dot(p_sub, load_w(j0),
                                   preferred_element_type=jnp.float32), relu=True)
            L = (L + 1) // 2
            y = conv3(j1, h, L, relu=True, residual=sc)

        # ---- AdaptiveAvgPool1d(1) + Flatten + Linear (lane-padded to 128) ----
        pooled = jnp.dot(pool_ref[...], y, preferred_element_type=jnp.float32)   # (B, Cf)
        logits = jnp.dot(pooled, lw_ref[...], preferred_element_type=jnp.float32) + lb_ref[...]
        out_ref[...] = logits.astype(out_ref.dtype)

    return kernel


# --------------------------------- wrapper ----------------------------------- #

def _full_spec(shape):
    zeros = (0,) * len(shape)
    return pl.BlockSpec(shape, lambda g, _z=zeros: _z)      # grid-invariant whole block


def _fold_conv_bn(p, cin_pad=0):
    """Fold BN (inference) into an affine; repack W (Cout,Cin,K) -> (K*Cin, Cout)."""
    W, bconv, gamma, beta, mean, var = p
    Cout, Cin, K = W.shape
    scale = (gamma / jnp.sqrt(var + EPS)).astype(jnp.float32)
    bias = ((bconv - mean) * scale + beta).astype(jnp.float32)
    w = jnp.transpose(W, (2, 1, 0)).astype(jnp.float32)     # (K, Cin, Cout)
    if Cin < cin_pad:
        w = jnp.pad(w, ((0, 0), (0, cin_pad - Cin), (0, 0)))
        Cin = cin_pad
    return w.reshape(K * Cin, Cout), scale, bias


def resnet_forward(x_ncl, params, layers_num, blocks_num, batch_tile=BATCH_TILE):
    N, cin0, L0 = x_ncl.shape
    assert cin0 <= CIN0_PAD
    B = batch_tile
    G = -(-N // B)                     # grid steps; batch zero-padded to G*B samples
    N_pad = G * B

    # Input NCL -> NLC, channels padded to 8, batch padded, flattened to (N_pad*L0, 8).
    x = jnp.transpose(x_ncl, (0, 2, 1)).astype(jnp.float32)
    x = jnp.pad(x, ((0, N_pad - N), (0, 0), (0, CIN0_PAD - cin0)))
    x_flat = x.reshape(N_pad * L0, CIN0_PAD)

    # ---- fold + pack all conv params into 3 blobs (weights / BN scale / BN bias) ----
    folded = [_fold_conv_bn(params["conv0"], cin_pad=CIN0_PAD)]
    for i in range(layers_num):
        p0, p1 = params[f"layer{i}"]
        folded += [_fold_conv_bn(p0), _fold_conv_bn(p1)]
    for i in range(blocks_num):
        pb0, pb1 = params[f"block{i}"]
        folded += [_fold_conv_bn(pb0), _fold_conv_bn(pb1),
                   _fold_conv_bn(params[f"conv11{i}"])]

    n_conv = len(folded)
    cout_max = max(w.shape[1] for w, _, _ in folded)
    conv_meta, total = [], 0
    for w, _, _ in folded:
        kc, cout = w.shape
        conv_meta.append(dict(off=total, kc=kc, cout=cout))
        total += ((kc + 7) // 8) * 8                         # keep every slice 8-row aligned

    w_blob = jnp.zeros((total, cout_max), jnp.float32)
    s_blob = jnp.zeros((n_conv, cout_max), jnp.float32)
    b_blob = jnp.zeros((n_conv, cout_max), jnp.float32)
    for j, (w, s, b) in enumerate(folded):
        kc, cout = w.shape
        off = conv_meta[j]["off"]
        w_blob = w_blob.at[off:off + kc, :cout].set(w)
        s_blob = s_blob.at[j, :cout].set(s)
        b_blob = b_blob.at[j, :cout].set(b)

    # ---- host-side constant matrices: per-block even-row selectors + avg pool ----
    subs, Lc = [], L0
    for _ in range(blocks_num):
        Lh = (Lc + 1) // 2
        S = np.zeros((B * Lh, B * Lc), np.float32)
        for bb in range(B):
            for j in range(Lh):
                S[bb * Lh + j, bb * Lc + 2 * j] = 1.0
        subs.append(jnp.asarray(S))
        Lc = Lh
    P = np.zeros((B, B * Lc), np.float32)
    for bb in range(B):
        P[bb, bb * Lc:(bb + 1) * Lc] = 1.0 / Lc
    pool = jnp.asarray(P)

    Wl, bl = params["linear"]                                # (nc, Cf), (nc,)
    nc, Cf = Wl.shape
    lw = jnp.zeros((Cf, LANES), jnp.float32).at[:, :nc].set(Wl.T.astype(jnp.float32))
    lb = jnp.zeros((1, LANES), jnp.float32).at[:, :nc].set(bl.astype(jnp.float32)[None, :])

    inputs = [x_flat, w_blob, s_blob, b_blob, *subs, pool, lw, lb]
    in_specs = [pl.BlockSpec((B * L0, CIN0_PAD), lambda g: (g, 0))]
    in_specs += [_full_spec(a.shape) for a in inputs[1:]]

    out = pl.pallas_call(
        _make_kernel(B, L0, layers_num, blocks_num, conv_meta),
        grid=(G,),
        in_specs=in_specs,
        out_specs=pl.BlockSpec((B, LANES), lambda g: (g, 0)),
        out_shape=jax.ShapeDtypeStruct((N_pad, LANES), jnp.float32),
        compiler_params=pltpu.CompilerParams(dimension_semantics=("parallel",)),
    )(*inputs)
    return out[:N, :nc]


# ------------------------------- parameters ---------------------------------- #

def _init_conv_bn(key, Cout, Cin, K):
    k1, k2, k3, k4, k5, k6 = jax.random.split(key, 6)
    fan_in = Cin * K
    W = jax.random.normal(k1, (Cout, Cin, K), jnp.float32) / np.sqrt(fan_in)
    b = 0.1 * jax.random.normal(k2, (Cout,), jnp.float32)
    gamma = 1.0 + 0.1 * jax.random.normal(k3, (Cout,), jnp.float32)
    beta = 0.1 * jax.random.normal(k4, (Cout,), jnp.float32)
    mean = 0.1 * jax.random.normal(k5, (Cout,), jnp.float32)
    var = 1.0 + 0.5 * jax.random.uniform(k6, (Cout,), jnp.float32)
    return (W, b, gamma, beta, mean, var)


def init_params(key, C, layers_num, blocks_num, num_classes):
    params = {}
    key, k = jax.random.split(key)
    params["conv0"] = _init_conv_bn(k, C, 1, 3)
    for i in range(layers_num):
        key, k1, k2 = jax.random.split(key, 3)
        params[f"layer{i}"] = (_init_conv_bn(k1, C, C, 3),
                               _init_conv_bn(k2, C, C, 3))
    for i in range(blocks_num):
        cin, cout = C * 2 ** i, C * 2 ** (i + 1)
        key, k1, k2, k3 = jax.random.split(key, 4)
        params[f"block{i}"] = (_init_conv_bn(k1, cout, cin, 3),
                               _init_conv_bn(k2, cout, cout, 3))
        params[f"conv11{i}"] = _init_conv_bn(k3, cout, cin, 1)
    key, k1, k2 = jax.random.split(key, 3)
    Cf = C * 2 ** blocks_num
    Wl = jax.random.normal(k1, (num_classes, Cf), jnp.float32) / np.sqrt(Cf)
    bl = 0.1 * jax.random.normal(k2, (num_classes,), jnp.float32)
    params["linear"] = (Wl, bl)
    return params


# ------------------------- pure-JAX reference (check) ------------------------ #

def _ref_forward(x_ncl, params, layers_num, blocks_num):
    def cb(x, p, s, pad, relu):
        W, b, g, bt, m, v = p
        y = jax.lax.conv_general_dilated(
            x, W, (s,), [(pad, pad)], dimension_numbers=("NCH", "OIH", "NCH"))
        y = y + b[None, :, None]
        sc = g / jnp.sqrt(v + EPS)
        y = (y - m[None, :, None]) * sc[None, :, None] + bt[None, :, None]
        return jnp.maximum(y, 0.0) if relu else y

    y = cb(x_ncl, params["conv0"], 1, 1, True)
    for i in range(layers_num):
        h = cb(y, params[f"layer{i}"][0], 1, 1, True)
        h = cb(h, params[f"layer{i}"][1], 1, 1, False)
        y = jnp.maximum(h + y, 0.0)
    for i in range(blocks_num):
        sc = cb(y, params[f"conv11{i}"], 2, 0, False)
        h = cb(y, params[f"block{i}"][0], 2, 1, True)
        h = cb(h, params[f"block{i}"][1], 1, 1, False)
        y = jnp.maximum(h + sc, 0.0)
    pooled = jnp.mean(y, axis=2)
    Wl, bl = params["linear"]
    return pooled @ Wl.T + bl


if __name__ == "__main__":
    C, LAYERS, BLOCKS, NUM_CLASSES = 8, 2, 2, 3
    N, L = 2, 16

    key = jax.random.PRNGKey(0)
    kx, kp = jax.random.split(key)
    x = jax.random.normal(kx, (N, 1, L), jnp.float32)       # (batch, 1, length)
    params = init_params(kp, C, LAYERS, BLOCKS, NUM_CLASSES)

    fwd = jax.jit(functools.partial(resnet_forward,
                                    layers_num=LAYERS, blocks_num=BLOCKS))
    out = jax.block_until_ready(fwd(x, params))
    ref = jax.block_until_ready(_ref_forward(x, params, LAYERS, BLOCKS))

    assert out.shape == (N, NUM_CLASSES), out.shape
    np.testing.assert_allclose(np.asarray(out), np.asarray(ref),
                               rtol=1e-4, atol=1e-4)
    print("KERNEL_OK")
</pallas_src>

<mosaic_0001>
module attributes {stable_mosaic.version = 11 : i64} {
  func.func @kernel(%arg0: i32, %arg1: memref<128x8xf32, #tpu.memory_space<vmem>>, %arg2: memref<360x32xf32, #tpu.memory_space<vmem>>, %arg3: memref<11x32xf32, #tpu.memory_space<vmem>>, %arg4: memref<11x32xf32, #tpu.memory_space<vmem>>, %arg5: memref<64x128xf32, #tpu.memory_space<vmem>>, %arg6: memref<32x64xf32, #tpu.memory_space<vmem>>, %arg7: memref<8x32xf32, #tpu.memory_space<vmem>>, %arg8: memref<32x128xf32, #tpu.memory_space<vmem>>, %arg9: memref<1x128xf32, #tpu.memory_space<vmem>>, %arg10: memref<8x128xf32, #tpu.memory_space<vmem>>) attributes {dimension_semantics = [#tpu.dimension_semantics<parallel>], iteration_bounds = array<i64: 1>, scalar_prefetch = 0 : i64, scratch_operands = 0 : i64, tpu.core_type = #tpu.core_type<tc>, window_params = [{transform_indices = @transform_0, window_bounds = array<i64: 128, 8>}, {pipeline_mode = #tpu.pipeline_mode<synchronous>, transform_indices = @transform_1, window_bounds = array<i64: 360, 32>}, {pipeline_mode = #tpu.pipeline_mode<synchronous>, transform_indices = @transform_2, window_bounds = array<i64: 11, 32>}, {pipeline_mode = #tpu.pipeline_mode<synchronous>, transform_indices = @transform_3, window_bounds = array<i64: 11, 32>}, {pipeline_mode = #tpu.pipeline_mode<synchronous>, transform_indices = @transform_4, window_bounds = array<i64: 64, 128>}, {pipeline_mode = #tpu.pipeline_mode<synchronous>, transform_indices = @transform_5, window_bounds = array<i64: 32, 64>}, {pipeline_mode = #tpu.pipeline_mode<synchronous>, transform_indices = @transform_6, window_bounds = array<i64: 8, 32>}, {pipeline_mode = #tpu.pipeline_mode<synchronous>, transform_indices = @transform_7, window_bounds = array<i64: 32, 128>}, {pipeline_mode = #tpu.pipeline_mode<synchronous>, transform_indices = @transform_8, window_bounds = array<i64: 1, 128>}, {transform_indices = @transform_9, window_bounds = array<i64: 8, 128>}]} {
    %c0 = arith.constant 0 : index
    %c0_0 = arith.constant 0 : index
    %0 = vector.load %arg1[%c0, %c0_0] : memref<128x8xf32, #tpu.memory_space<vmem>>, vector<128x8xf32>
    %1 = tpu.iota {dimensions = array<i32: 0>} : vector<128x1xi32>
    %c15_i32 = arith.constant 15 : i32
    %2 = vector.broadcast %c15_i32 : i32 to vector<128x1xi32>
    %3 = arith.andi %1, %2 : vector<128x1xi32>
    %c0_i32 = arith.constant 0 : i32
    %4 = vector.broadcast %c0_i32 : i32 to vector<128x1xi32>
    %5 = arith.cmpi ne, %3, %4 : vector<128x1xi32>
    %c15_i32_1 = arith.constant 15 : i32
    %6 = vector.broadcast %c15_i32_1 : i32 to vector<128x1xi32>
    %7 = arith.cmpi ne, %3, %6 : vector<128x1xi32>
    %cst = arith.constant 0.000000e+00 : f32
    %8 = vector.broadcast %cst : f32 to vector<1x8xf32>
    %9 = vector.extract_strided_slice %0 {offsets = [0, 0], sizes = [127, 8], strides = [1, 1]} : vector<128x8xf32> to vector<127x8xf32>
    %10 = tpu.concatenate %8, %9 in 0 : vector<1x8xf32>, vector<127x8xf32> -> vector<128x8xf32>
    %cst_2 = arith.constant 0.000000e+00 : f32
    %11 = vector.shape_cast %5 : vector<128x1xi1> to vector<128x1xi1>
    %12 = vector.broadcast %11 : vector<128x1xi1> to vector<128x8xi1>
    %13 = vector.broadcast %cst_2 : f32 to vector<128x8xf32>
    %14 = arith.select %12, %10, %13 : vector<128x8xi1>, vector<128x8xf32>
    %15 = vector.extract_strided_slice %0 {offsets = [1, 0], sizes = [127, 8], strides = [1, 1]} : vector<128x8xf32> to vector<127x8xf32>
    %16 = tpu.concatenate %15, %8 in 0 : vector<127x8xf32>, vector<1x8xf32> -> vector<128x8xf32>
    %cst_3 = arith.constant 0.000000e+00 : f32
    %17 = vector.shape_cast %7 : vector<128x1xi1> to vector<128x1xi1>
    %18 = vector.broadcast %17 : vector<128x1xi1> to vector<128x8xi1>
    %19 = vector.broadcast %cst_3 : f32 to vector<128x8xf32>
    %20 = arith.select %18, %16, %19 : vector<128x8xi1>, vector<128x8xf32>
    %21 = tpu.concatenate %14, %0, %20 in 1 : vector<128x8xf32>, vector<128x8xf32>, vector<128x8xf32> -> vector<128x24xf32>
    %c0_4 = arith.constant 0 : index
    %c0_5 = arith.constant 0 : index
    %22 = vector.load %arg2[%c0_4, %c0_5] : memref<360x32xf32, #tpu.memory_space<vmem>>, vector<24x8xf32>
    %cst_6 = arith.constant dense<0.000000e+00> : vector<128x8xf32>
    %23 = tpu.matmul %21, %22, %cst_6 {dimension_numbers = #tpu.dot_dimension_numbers<[1], [0], [0], [1], [0, 0, 1, 1], [], []>} : vector<128x24xf32>, vector<24x8xf32>, vector<128x8xf32> -> vector<128x8xf32>
    %c0_7 = arith.constant 0 : index
    %c0_8 = arith.constant 0 : index
    %24 = vector.load %arg3[%c0_7, %c0_8] : memref<11x32xf32, #tpu.memory_space<vmem>>, vector<1x8xf32>
    %25 = vector.broadcast %24 : vector<1x8xf32> to vector<128x8xf32>
    %26 = arith.mulf %23, %25 : vector<128x8xf32>
    %c0_9 = arith.constant 0 : index
    %c0_10 = arith.constant 0 : index
    %27 = vector.load %arg4[%c0_9, %c0_10] : memref<11x32xf32, #tpu.memory_space<vmem>>, vector<1x8xf32>
    %28 = vector.broadcast %27 : vector<1x8xf32> to vector<128x8xf32>
    %29 = arith.addf %26, %28 : vector<128x8xf32>
    %cst_11 = arith.constant 0.000000e+00 : f32
    %30 = vector.broadcast %cst_11 : f32 to vector<128x8xf32>
    %31 = arith.maximumf %29, %30 : vector<128x8xf32>
    %cst_12 = arith.constant 0.000000e+00 : f32
    %32 = vector.broadcast %cst_12 : f32 to vector<1x8xf32>
    %33 = vector.extract_strided_slice %31 {offsets = [0, 0], sizes = [127, 8], strides = [1, 1]} : vector<128x8xf32> to vector<127x8xf32>
    %34 = tpu.concatenate %32, %33 in 0 : vector<1x8xf32>, vector<127x8xf32> -> vector<128x8xf32>
    %cst_13 = arith.constant 0.000000e+00 : f32
    %35 = vector.shape_cast %5 : vector<128x1xi1> to vector<128x1xi1>
    %36 = vector.broadcast %35 : vector<128x1xi1> to vector<128x8xi1>
    %37 = vector.broadcast %cst_13 : f32 to vector<128x8xf32>
    %38 = arith.select %36, %34, %37 : vector<128x8xi1>, vector<128x8xf32>
    %39 = vector.extract_strided_slice %31 {offsets = [1, 0], sizes = [127, 8], strides = [1, 1]} : vector<128x8xf32> to vector<127x8xf32>
    %40 = tpu.concatenate %39, %32 in 0 : vector<127x8xf32>, vector<1x8xf32> -> vector<128x8xf32>
    %cst_14 = arith.constant 0.000000e+00 : f32
    %41 = vector.shape_cast %7 : vector<128x1xi1> to vector<128x1xi1>
    %42 = vector.broadcast %41 : vector<128x1xi1> to vector<128x8xi1>
    %43 = vector.broadcast %cst_14 : f32 to vector<128x8xf32>
    %44 = arith.select %42, %40, %43 : vector<128x8xi1>, vector<128x8xf32>
    %45 = tpu.concatenate %38, %31, %44 in 1 : vector<128x8xf32>, vector<128x8xf32>, vector<128x8xf32> -> vector<128x24xf32>
    %c24 = arith.constant 24 : index
    %c0_15 = arith.constant 0 : index
    %46 = vector.load %arg2[%c24, %c0_15] : memref<360x32xf32, #tpu.memory_space<vmem>>, vector<24x8xf32>
    %cst_16 = arith.constant dense<0.000000e+00> : vector<128x8xf32>
    %47 = tpu.matmul %45, %46, %cst_16 {dimension_numbers = #tpu.dot_dimension_numbers<[1], [0], [0], [1], [0, 0, 1, 1], [], []>} : vector<128x24xf32>, vector<24x8xf32>, vector<128x8xf32> -> vector<128x8xf32>
    %c1 = arith.constant 1 : index
    %c0_17 = arith.constant 0 : index
    %48 = vector.load %arg3[%c1, %c0_17] : memref<11x32xf32, #tpu.memory_space<vmem>>, vector<1x8xf32>
    %49 = vector.broadcast %48 : vector<1x8xf32> to vector<128x8xf32>
    %50 = arith.mulf %47, %49 : vector<128x8xf32>
    %c1_18 = arith.constant 1 : index
    %c0_19 = arith.constant 0 : index
    %51 = vector.load %arg4[%c1_18, %c0_19] : memref<11x32xf32, #tpu.memory_space<vmem>>, vector<1x8xf32>
    %52 = vector.broadcast %51 : vector<1x8xf32> to vector<128x8xf32>
    %53 = arith.addf %50, %52 : vector<128x8xf32>
    %cst_20 = arith.constant 0.000000e+00 : f32
    %54 = vector.broadcast %cst_20 : f32 to vector<128x8xf32>
    %55 = arith.maximumf %53, %54 : vector<128x8xf32>
    %cst_21 = arith.constant 0.000000e+00 : f32
    %56 = vector.broadcast %cst_21 : f32 to vector<1x8xf32>
    %57 = vector.extract_strided_slice %55 {offsets = [0, 0], sizes = [127, 8], strides = [1, 1]} : vector<128x8xf32> to vector<127x8xf32>
    %58 = tpu.concatenate %56, %57 in 0 : vector<1x8xf32>, vector<127x8xf32> -> vector<128x8xf32>
    %cst_22 = arith.constant 0.000000e+00 : f32
    %59 = vector.shape_cast %5 : vector<128x1xi1> to vector<128x1xi1>
    %60 = vector.broadcast %59 : vector<128x1xi1> to vector<128x8xi1>
    %61 = vector.broadcast %cst_22 : f32 to vector<128x8xf32>
    %62 = arith.select %60, %58, %61 : vector<128x8xi1>, vector<128x8xf32>
    %63 = vector.extract_strided_slice %55 {offsets = [1, 0], sizes = [127, 8], strides = [1, 1]} : vector<128x8xf32> to vector<127x8xf32>
    %64 = tpu.concatenate %63, %56 in 0 : vector<127x8xf32>, vector<1x8xf32> -> vector<128x8xf32>
    %cst_23 = arith.constant 0.000000e+00 : f32
    %65 = vector.shape_cast %7 : vector<128x1xi1> to vector<128x1xi1>
    %66 = vector.broadcast %65 : vector<128x1xi1> to vector<128x8xi1>
    %67 = vector.broadcast %cst_23 : f32 to vector<128x8xf32>
    %68 = arith.select %66, %64, %67 : vector<128x8xi1>, vector<128x8xf32>
    %69 = tpu.concatenate %62, %55, %68 in 1 : vector<128x8xf32>, vector<128x8xf32>, vector<128x8xf32> -> vector<128x24xf32>
    %c48 = arith.constant 48 : index
    %c0_24 = arith.constant 0 : index
    %70 = vector.load %arg2[%c48, %c0_24] : memref<360x32xf32, #tpu.memory_space<vmem>>, vector<24x8xf32>
    %cst_25 = arith.constant dense<0.000000e+00> : vector<128x8xf32>
    %71 = tpu.matmul %69, %70, %cst_25 {dimension_numbers = #tpu.dot_dimension_numbers<[1], [0], [0], [1], [0, 0, 1, 1], [], []>} : vector<128x24xf32>, vector<24x8xf32>, vector<128x8xf32> -> vector<128x8xf32>
    %c2 = arith.constant 2 : index
    %c0_26 = arith.constant 0 : index
    %72 = vector.load %arg3[%c2, %c0_26] : memref<11x32xf32, #tpu.memory_space<vmem>>, vector<1x8xf32>
    %73 = vector.broadcast %72 : vector<1x8xf32> to vector<128x8xf32>
    %74 = arith.mulf %71, %73 : vector<128x8xf32>
    %c2_27 = arith.constant 2 : index
    %c0_28 = arith.constant 0 : index
    %75 = vector.load %arg4[%c2_27, %c0_28] : memref<11x32xf32, #tpu.memory_space<vmem>>, vector<1x8xf32>
    %76 = vector.broadcast %75 : vector<1x8xf32> to vector<128x8xf32>
    %77 = arith.addf %74, %76 : vector<128x8xf32>
    %78 = arith.addf %77, %31 : vector<128x8xf32>
    %cst_29 = arith.constant 0.000000e+00 : f32
    %79 = vector.broadcast %cst_29 : f32 to vector<128x8xf32>
    %80 = arith.maximumf %78, %79 : vector<128x8xf32>
    %cst_30 = arith.constant 0.000000e+00 : f32
    %81 = vector.broadcast %cst_30 : f32 to vector<1x8xf32>
    %82 = vector.extract_strided_slice %80 {offsets = [0, 0], sizes = [127, 8], strides = [1, 1]} : vector<128x8xf32> to vector<127x8xf32>
    %83 = tpu.concatenate %81, %82 in 0 : vector<1x8xf32>, vector<127x8xf32> -> vector<128x8xf32>
    %cst_31 = arith.constant 0.000000e+00 : f32
    %84 = vector.shape_cast %5 : vector<128x1xi1> to vector<128x1xi1>
    %85 = vector.broadcast %84 : vector<128x1xi1> to vector<128x8xi1>
    %86 = vector.broadcast %cst_31 : f32 to vector<128x8xf32>
    %87 = arith.select %85, %83, %86 : vector<128x8xi1>, vector<128x8xf32>
    %88 = vector.extract_strided_slice %80 {offsets = [1, 0], sizes = [127, 8], strides = [1, 1]} : vector<128x8xf32> to vector<127x8xf32>
    %89 = tpu.concatenate %88, %81 in 0 : vector<127x8xf32>, vector<1x8xf32> -> vector<128x8xf32>
    %cst_32 = arith.constant 0.000000e+00 : f32
    %90 = vector.shape_cast %7 : vector<128x1xi1> to vector<128x1xi1>
    %91 = vector.broadcast %90 : vector<128x1xi1> to vector<128x8xi1>
    %92 = vector.broadcast %cst_32 : f32 to vector<128x8xf32>
    %93 = arith.select %91, %89, %92 : vector<128x8xi1>, vector<128x8xf32>
    %94 = tpu.concatenate %87, %80, %93 in 1 : vector<128x8xf32>, vector<128x8xf32>, vector<128x8xf32> -> vector<128x24xf32>
    %c72 = arith.constant 72 : index
    %c0_33 = arith.constant 0 : index
    %95 = vector.load %arg2[%c72, %c0_33] : memref<360x32xf32, #tpu.memory_space<vmem>>, vector<24x8xf32>
    %cst_34 = arith.constant dense<0.000000e+00> : vector<128x8xf32>
    %96 = tpu.matmul %94, %95, %cst_34 {dimension_numbers = #tpu.dot_dimension_numbers<[1], [0], [0], [1], [0, 0, 1, 1], [], []>} : vector<128x24xf32>, vector<24x8xf32>, vector<128x8xf32> -> vector<128x8xf32>
    %c3 = arith.constant 3 : index
    %c0_35 = arith.constant 0 : index
    %97 = vector.load %arg3[%c3, %c0_35] : memref<11x32xf32, #tpu.memory_space<vmem>>, vector<1x8xf32>
    %98 = vector.broadcast %97 : vector<1x8xf32> to vector<128x8xf32>
    %99 = arith.mulf %96, %98 : vector<128x8xf32>
    %c3_36 = arith.constant 3 : index
    %c0_37 = arith.constant 0 : index
    %100 = vector.load %arg4[%c3_36, %c0_37] : memref<11x32xf32, #tpu.memory_space<vmem>>, vector<1x8xf32>
    %101 = vector.broadcast %100 : vector<1x8xf32> to vector<128x8xf32>
    %102 = arith.addf %99, %101 : vector<128x8xf32>
    %cst_38 = arith.constant 0.000000e+00 : f32
    %103 = vector.broadcast %cst_38 : f32 to vector<128x8xf32>
    %104 = arith.maximumf %102, %103 : vector<128x8xf32>
    %cst_39 = arith.constant 0.000000e+00 : f32
    %105 = vector.broadcast %cst_39 : f32 to vector<1x8xf32>
    %106 = vector.extract_strided_slice %104 {offsets = [0, 0], sizes = [127, 8], strides = [1, 1]} : vector<128x8xf32> to vector<127x8xf32>
    %107 = tpu.concatenate %105, %106 in 0 : vector<1x8xf32>, vector<127x8xf32> -> vector<128x8xf32>
    %cst_40 = arith.constant 0.000000e+00 : f32
    %108 = vector.shape_cast %5 : vector<128x1xi1> to vector<128x1xi1>
    %109 = vector.broadcast %108 : vector<128x1xi1> to vector<128x8xi1>
    %110 = vector.broadcast %cst_40 : f32 to vector<128x8xf32>
    %111 = arith.select %109, %107, %110 : vector<128x8xi1>, vector<128x8xf32>
    %112 = vector.extract_strided_slice %104 {offsets = [1, 0], sizes = [127, 8], strides = [1, 1]} : vector<128x8xf32> to vector<127x8xf32>
    %113 = tpu.concatenate %112, %105 in 0 : vector<127x8xf32>, vector<1x8xf32> -> vector<128x8xf32>
    %cst_41 = arith.constant 0.000000e+00 : f32
    %114 = vector.shape_cast %7 : vector<128x1xi1> to vector<128x1xi1>
    %115 = vector.broadcast %114 : vector<128x1xi1> to vector<128x8xi1>
    %116 = vector.broadcast %cst_41 : f32 to vector<128x8xf32>
    %117 = arith.select %115, %113, %116 : vector<128x8xi1>, vector<128x8xf32>
    %118 = tpu.concatenate %111, %104, %117 in 1 : vector<128x8xf32>, vector<128x8xf32>, vector<128x8xf32> -> vector<128x24xf32>
    %c96 = arith.constant 96 : index
    %c0_42 = arith.constant 0 : index
    %119 = vector.load %arg2[%c96, %c0_42] : memref<360x32xf32, #tpu.memory_space<vmem>>, vector<24x8xf32>
    %cst_43 = arith.constant dense<0.000000e+00> : vector<128x8xf32>
    %120 = tpu.matmul %118, %119, %cst_43 {dimension_numbers = #tpu.dot_dimension_numbers<[1], [0], [0], [1], [0, 0, 1, 1], [], []>} : vector<128x24xf32>, vector<24x8xf32>, vector<128x8xf32> -> vector<128x8xf32>
    %c4 = arith.constant 4 : index
    %c0_44 = arith.constant 0 : index
    %121 = vector.load %arg3[%c4, %c0_44] : memref<11x32xf32, #tpu.memory_space<vmem>>, vector<1x8xf32>
    %122 = vector.broadcast %121 : vector<1x8xf32> to vector<128x8xf32>
    %123 = arith.mulf %120, %122 : vector<128x8xf32>
    %c4_45 = arith.constant 4 : index
    %c0_46 = arith.constant 0 : index
    %124 = vector.load %arg4[%c4_45, %c0_46] : memref<11x32xf32, #tpu.memory_space<vmem>>, vector<1x8xf32>
    %125 = vector.broadcast %124 : vector<1x8xf32> to vector<128x8xf32>
    %126 = arith.addf %123, %125 : vector<128x8xf32>
    %127 = arith.addf %126, %80 : vector<128x8xf32>
    %cst_47 = arith.constant 0.000000e+00 : f32
    %128 = vector.broadcast %cst_47 : f32 to vector<128x8xf32>
    %129 = arith.maximumf %127, %128 : vector<128x8xf32>
    %c0_48 = arith.constant 0 : index
    %c0_49 = arith.constant 0 : index
    %130 = vector.load %arg5[%c0_48, %c0_49] : memref<64x128xf32, #tpu.memory_space<vmem>>, vector<64x128xf32>
    %cst_50 = arith.constant 0.000000e+00 : f32
    %131 = vector.broadcast %cst_50 : f32 to vector<1x8xf32>
    %132 = vector.extract_strided_slice %129 {offsets = [0, 0], sizes = [127, 8], strides = [1, 1]} : vector<128x8xf32> to vector<127x8xf32>
    %133 = tpu.concatenate %131, %132 in 0 : vector<1x8xf32>, vector<127x8xf32> -> vector<128x8xf32>
    %cst_51 = arith.constant 0.000000e+00 : f32
    %134 = vector.shape_cast %5 : vector<128x1xi1> to vector<128x1xi1>
    %135 = vector.broadcast %134 : vector<128x1xi1> to vector<128x8xi1>
    %136 = vector.broadcast %cst_51 : f32 to vector<128x8xf32>
    %137 = arith.select %135, %133, %136 : vector<128x8xi1>, vector<128x8xf32>
    %138 = vector.extract_strided_slice %129 {offsets = [1, 0], sizes = [127, 8], strides = [1, 1]} : vector<128x8xf32> to vector<127x8xf32>
    %139 = tpu.concatenate %138, %131 in 0 : vector<127x8xf32>, vector<1x8xf32> -> vector<128x8xf32>
    %cst_52 = arith.constant 0.000000e+00 : f32
    %140 = vector.shape_cast %7 : vector<128x1xi1> to vector<128x1xi1>
    %141 = vector.broadcast %140 : vector<128x1xi1> to vector<128x8xi1>
    %142 = vector.broadcast %cst_52 : f32 to vector<128x8xf32>
    %143 = arith.select %141, %139, %142 : vector<128x8xi1>, vector<128x8xf32>
    %144 = tpu.concatenate %137, %129, %143 in 1 : vector<128x8xf32>, vector<128x8xf32>, vector<128x8xf32> -> vector<128x24xf32>
    %cst_53 = arith.constant dense<0.000000e+00> : vector<64x24xf32>
    %145 = tpu.matmul %130, %144, %cst_53 {dimension_numbers = #tpu.dot_dimension_numbers<[1], [0], [0], [1], [0, 0, 1, 1], [], []>} : vector<64x128xf32>, vector<128x24xf32>, vector<64x24xf32> -> vector<64x24xf32>
    %146 = vector.extract_strided_slice %145 {offsets = [0, 8], sizes = [64, 8], strides = [1, 1]} : vector<64x24xf32> to vector<64x8xf32>
    %c192 = arith.constant 192 : index
    %c0_54 = arith.constant 0 : index
    %147 = vector.load %arg2[%c192, %c0_54] : memref<360x32xf32, #tpu.memory_space<vmem>>, vector<8x16xf32>
    %cst_55 = arith.constant dense<0.000000e+00> : vector<64x16xf32>
    %148 = tpu.matmul %146, %147, %cst_55 {dimension_numbers = #tpu.dot_dimension_numbers<[1], [0], [0], [1], [0, 0, 1, 1], [], []>} : vector<64x8xf32>, vector<8x16xf32>, vector<64x16xf32> -> vector<64x16xf32>
    %c7 = arith.constant 7 : index
    %c0_56 = arith.constant 0 : index
    %149 = vector.load %arg3[%c7, %c0_56] : memref<11x32xf32, #tpu.memory_space<vmem>>, vector<1x16xf32>
    %150 = vector.broadcast %149 : vector<1x16xf32> to vector<64x16xf32>
    %151 = arith.mulf %148, %150 : vector<64x16xf32>
    %c7_57 = arith.constant 7 : index
    %c0_58 = arith.constant 0 : index
    %152 = vector.load %arg4[%c7_57, %c0_58] : memref<11x32xf32, #tpu.memory_space<vmem>>, vector<1x16xf32>
    %153 = vector.broadcast %152 : vector<1x16xf32> to vector<64x16xf32>
    %154 = arith.addf %151, %153 : vector<64x16xf32>
    %c120 = arith.constant 120 : index
    %c0_59 = arith.constant 0 : index
    %155 = vector.load %arg2[%c120, %c0_59] : memref<360x32xf32, #tpu.memory_space<vmem>>, vector<24x16xf32>
    %cst_60 = arith.constant dense<0.000000e+00> : vector<64x16xf32>
    %156 = tpu.matmul %145, %155, %cst_60 {dimension_numbers = #tpu.dot_dimension_numbers<[1], [0], [0], [1], [0, 0, 1, 1], [], []>} : vector<64x24xf32>, vector<24x16xf32>, vector<64x16xf32> -> vector<64x16xf32>
    %c5 = arith.constant 5 : index
    %c0_61 = arith.constant 0 : index
    %157 = vector.load %arg3[%c5, %c0_61] : memref<11x32xf32, #tpu.memory_space<vmem>>, vector<1x16xf32>
    %158 = vector.broadcast %157 : vector<1x16xf32> to vector<64x16xf32>
    %159 = arith.mulf %156, %158 : vector<64x16xf32>
    %c5_62 = arith.constant 5 : index
    %c0_63 = arith.constant 0 : index
    %160 = vector.load %arg4[%c5_62, %c0_63] : memref<11x32xf32, #tpu.memory_space<vmem>>, vector<1x16xf32>
    %161 = vector.broadcast %160 : vector<1x16xf32> to vector<64x16xf32>
    %162 = arith.addf %159, %161 : vector<64x16xf32>
    %cst_64 = arith.constant 0.000000e+00 : f32
    %163 = vector.broadcast %cst_64 : f32 to vector<64x16xf32>
    %164 = arith.maximumf %162, %163 : vector<64x16xf32>
    %165 = tpu.iota {dimensions = array<i32: 0>} : vector<64x1xi32>
    %c7_i32 = arith.constant 7 : i32
    %166 = vector.broadcast %c7_i32 : i32 to vector<64x1xi32>
    %167 = arith.andi %165, %166 : vector<64x1xi32>
    %c0_i32_65 = arith.constant 0 : i32
    %168 = vector.broadcast %c0_i32_65 : i32 to vector<64x1xi32>
    %169 = arith.cmpi ne, %167, %168 : vector<64x1xi32>
    %c7_i32_66 = arith.constant 7 : i32
    %170 = vector.broadcast %c7_i32_66 : i32 to vector<64x1xi32>
    %171 = arith.cmpi ne, %167, %170 : vector<64x1xi32>
    %cst_67 = arith.constant 0.000000e+00 : f32
    %172 = vector.broadcast %cst_67 : f32 to vector<1x16xf32>
    %173 = vector.extract_strided_slice %164 {offsets = [0, 0], sizes = [63, 16], strides = [1, 1]} : vector<64x16xf32> to vector<63x16xf32>
    %174 = tpu.concatenate %172, %173 in 0 : vector<1x16xf32>, vector<63x16xf32> -> vector<64x16xf32>
    %cst_68 = arith.constant 0.000000e+00 : f32
    %175 = vector.shape_cast %169 : vector<64x1xi1> to vector<64x1xi1>
    %176 = vector.broadcast %175 : vector<64x1xi1> to vector<64x16xi1>
    %177 = vector.broadcast %cst_68 : f32 to vector<64x16xf32>
    %178 = arith.select %176, %174, %177 : vector<64x16xi1>, vector<64x16xf32>
    %179 = vector.extract_strided_slice %164 {offsets = [1, 0], sizes = [63, 16], strides = [1, 1]} : vector<64x16xf32> to vector<63x16xf32>
    %180 = tpu.concatenate %179, %172 in 0 : vector<63x16xf32>, vector<1x16xf32> -> vector<64x16xf32>
    %cst_69 = arith.constant 0.000000e+00 : f32
    %181 = vector.shape_cast %171 : vector<64x1xi1> to vector<64x1xi1>
    %182 = vector.broadcast %181 : vector<64x1xi1> to vector<64x16xi1>
    %183 = vector.broadcast %cst_69 : f32 to vector<64x16xf32>
    %184 = arith.select %182, %180, %183 : vector<64x16xi1>, vector<64x16xf32>
    %185 = tpu.concatenate %178, %164, %184 in 1 : vector<64x16xf32>, vector<64x16xf32>, vector<64x16xf32> -> vector<64x48xf32>
    %c144 = arith.constant 144 : index
    %c0_70 = arith.constant 0 : index
    %186 = vector.load %arg2[%c144, %c0_70] : memref<360x32xf32, #tpu.memory_space<vmem>>, vector<48x16xf32>
    %cst_71 = arith.constant dense<0.000000e+00> : vector<64x16xf32>
    %187 = tpu.matmul %185, %186, %cst_71 {dimension_numbers = #tpu.dot_dimension_numbers<[1], [0], [0], [1], [0, 0, 1, 1], [], []>} : vector<64x48xf32>, vector<48x16xf32>, vector<64x16xf32> -> vector<64x16xf32>
    %c6 = arith.constant 6 : index
    %c0_72 = arith.constant 0 : index
    %188 = vector.load %arg3[%c6, %c0_72] : memref<11x32xf32, #tpu.memory_space<vmem>>, vector<1x16xf32>
    %189 = vector.broadcast %188 : vector<1x16xf32> to vector<64x16xf32>
    %190 = arith.mulf %187, %189 : vector<64x16xf32>
    %c6_73 = arith.constant 6 : index
    %c0_74 = arith.constant 0 : index
    %191 = vector.load %arg4[%c6_73, %c0_74] : memref<11x32xf32, #tpu.memory_space<vmem>>, vector<1x16xf32>
    %192 = vector.broadcast %191 : vector<1x16xf32> to vector<64x16xf32>
    %193 = arith.addf %190, %192 : vector<64x16xf32>
    %194 = arith.addf %193, %154 : vector<64x16xf32>
    %cst_75 = arith.constant 0.000000e+00 : f32
    %195 = vector.broadcast %cst_75 : f32 to vector<64x16xf32>
    %196 = arith.maximumf %194, %195 : vector<64x16xf32>
    %c0_76 = arith.constant 0 : index
    %c0_77 = arith.constant 0 : index
    %197 = vector.load %arg6[%c0_76, %c0_77] : memref<32x64xf32, #tpu.memory_space<vmem>>, vector<32x64xf32>
    %cst_78 = arith.constant 0.000000e+00 : f32
    %198 = vector.broadcast %cst_78 : f32 to vector<1x16xf32>
    %199 = vector.extract_strided_slice %196 {offsets = [0, 0], sizes = [63, 16], strides = [1, 1]} : vector<64x16xf32> to vector<63x16xf32>
    %200 = tpu.concatenate %198, %199 in 0 : vector<1x16xf32>, vector<63x16xf32> -> vector<64x16xf32>
    %cst_79 = arith.constant 0.000000e+00 : f32
    %201 = vector.shape_cast %169 : vector<64x1xi1> to vector<64x1xi1>
    %202 = vector.broadcast %201 : vector<64x1xi1> to vector<64x16xi1>
    %203 = vector.broadcast %cst_79 : f32 to vector<64x16xf32>
    %204 = arith.select %202, %200, %203 : vector<64x16xi1>, vector<64x16xf32>
    %205 = vector.extract_strided_slice %196 {offsets = [1, 0], sizes = [63, 16], strides = [1, 1]} : vector<64x16xf32> to vector<63x16xf32>
    %206 = tpu.concatenate %205, %198 in 0 : vector<63x16xf32>, vector<1x16xf32> -> vector<64x16xf32>
    %cst_80 = arith.constant 0.000000e+00 : f32
    %207 = vector.shape_cast %171 : vector<64x1xi1> to vector<64x1xi1>
    %208 = vector.broadcast %207 : vector<64x1xi1> to vector<64x16xi1>
    %209 = vector.broadcast %cst_80 : f32 to vector<64x16xf32>
    %210 = arith.select %208, %206, %209 : vector<64x16xi1>, vector<64x16xf32>
    %211 = tpu.concatenate %204, %196, %210 in 1 : vector<64x16xf32>, vector<64x16xf32>, vector<64x16xf32> -> vector<64x48xf32>
    %cst_81 = arith.constant dense<0.000000e+00> : vector<32x48xf32>
    %212 = tpu.matmul %197, %211, %cst_81 {dimension_numbers = #tpu.dot_dimension_numbers<[1], [0], [0], [1], [0, 0, 1, 1], [], []>} : vector<32x64xf32>, vector<64x48xf32>, vector<32x48xf32> -> vector<32x48xf32>
    %213 = vector.extract_strided_slice %212 {offsets = [0, 16], sizes = [32, 16], strides = [1, 1]} : vector<32x48xf32> to vector<32x16xf32>
    %c344 = arith.constant 344 : index
    %c0_82 = arith.constant 0 : index
    %214 = vector.load %arg2[%c344, %c0_82] : memref<360x32xf32, #tpu.memory_space<vmem>>, vector<16x32xf32>
    %cst_83 = arith.constant dense<0.000000e+00> : vector<32x32xf32>
    %215 = tpu.matmul %213, %214, %cst_83 {dimension_numbers = #tpu.dot_dimension_numbers<[1], [0], [0], [1], [0, 0, 1, 1], [], []>} : vector<32x16xf32>, vector<16x32xf32>, vector<32x32xf32> -> vector<32x32xf32>
    %c10 = arith.constant 10 : index
    %c0_84 = arith.constant 0 : index
    %216 = vector.load %arg3[%c10, %c0_84] : memref<11x32xf32, #tpu.memory_space<vmem>>, vector<1x32xf32>
    %217 = vector.broadcast %216 : vector<1x32xf32> to vector<32x32xf32>
    %218 = arith.mulf %215, %217 : vector<32x32xf32>
    %c10_85 = arith.constant 10 : index
    %c0_86 = arith.constant 0 : index
    %219 = vector.load %arg4[%c10_85, %c0_86] : memref<11x32xf32, #tpu.memory_space<vmem>>, vector<1x32xf32>
    %220 = vector.broadcast %219 : vector<1x32xf32> to vector<32x32xf32>
    %221 = arith.addf %218, %220 : vector<32x32xf32>
    %c200 = arith.constant 200 : index
    %c0_87 = arith.constant 0 : index
    %222 = vector.load %arg2[%c200, %c0_87] : memref<360x32xf32, #tpu.memory_space<vmem>>, vector<48x32xf32>
    %cst_88 = arith.constant dense<0.000000e+00> : vector<32x32xf32>
    %223 = tpu.matmul %212, %222, %cst_88 {dimension_numbers = #tpu.dot_dimension_numbers<[1], [0], [0], [1], [0, 0, 1, 1], [], []>} : vector<32x48xf32>, vector<48x32xf32>, vector<32x32xf32> -> vector<32x32xf32>
    %c8 = arith.constant 8 : index
    %c0_89 = arith.constant 0 : index
    %224 = vector.load %arg3[%c8, %c0_89] : memref<11x32xf32, #tpu.memory_space<vmem>>, vector<1x32xf32>
    %225 = vector.broadcast %224 : vector<1x32xf32> to vector<32x32xf32>
    %226 = arith.mulf %223, %225 : vector<32x32xf32>
    %c8_90 = arith.constant 8 : index
    %c0_91 = arith.constant 0 : index
    %227 = vector.load %arg4[%c8_90, %c0_91] : memref<11x32xf32, #tpu.memory_space<vmem>>, vector<1x32xf32>
    %228 = vector.broadcast %227 : vector<1x32xf32> to vector<32x32xf32>
    %229 = arith.addf %226, %228 : vector<32x32xf32>
    %cst_92 = arith.constant 0.000000e+00 : f32
    %230 = vector.broadcast %cst_92 : f32 to vector<32x32xf32>
    %231 = arith.maximumf %229, %230 : vector<32x32xf32>
    %232 = tpu.iota {dimensions = array<i32: 0>} : vector<32x1xi32>
    %c3_i32 = arith.constant 3 : i32
    %233 = vector.broadcast %c3_i32 : i32 to vector<32x1xi32>
    %234 = arith.andi %232, %233 : vector<32x1xi32>
    %c0_i32_93 = arith.constant 0 : i32
    %235 = vector.broadcast %c0_i32_93 : i32 to vector<32x1xi32>
    %236 = arith.cmpi ne, %234, %235 : vector<32x1xi32>
    %c3_i32_94 = arith.constant 3 : i32
    %237 = vector.broadcast %c3_i32_94 : i32 to vector<32x1xi32>
    %238 = arith.cmpi ne, %234, %237 : vector<32x1xi32>
    %cst_95 = arith.constant 0.000000e+00 : f32
    %239 = vector.broadcast %cst_95 : f32 to vector<1x32xf32>
    %240 = vector.extract_strided_slice %231 {offsets = [0, 0], sizes = [31, 32], strides = [1, 1]} : vector<32x32xf32> to vector<31x32xf32>
    %241 = tpu.concatenate %239, %240 in 0 : vector<1x32xf32>, vector<31x32xf32> -> vector<32x32xf32>
    %cst_96 = arith.constant 0.000000e+00 : f32
    %242 = vector.shape_cast %236 : vector<32x1xi1> to vector<32x1xi1>
    %243 = vector.broadcast %242 : vector<32x1xi1> to vector<32x32xi1>
    %244 = vector.broadcast %cst_96 : f32 to vector<32x32xf32>
    %245 = arith.select %243, %241, %244 : vector<32x32xi1>, vector<32x32xf32>
    %246 = vector.extract_strided_slice %231 {offsets = [1, 0], sizes = [31, 32], strides = [1, 1]} : vector<32x32xf32> to vector<31x32xf32>
    %247 = tpu.concatenate %246, %239 in 0 : vector<31x32xf32>, vector<1x32xf32> -> vector<32x32xf32>
    %cst_97 = arith.constant 0.000000e+00 : f32
    %248 = vector.shape_cast %238 : vector<32x1xi1> to vector<32x1xi1>
    %249 = vector.broadcast %248 : vector<32x1xi1> to vector<32x32xi1>
    %250 = vector.broadcast %cst_97 : f32 to vector<32x32xf32>
    %251 = arith.select %249, %247, %250 : vector<32x32xi1>, vector<32x32xf32>
    %252 = tpu.concatenate %245, %231, %251 in 1 : vector<32x32xf32>, vector<32x32xf32>, vector<32x32xf32> -> vector<32x96xf32>
    %c248 = arith.constant 248 : index
    %c0_98 = arith.constant 0 : index
    %253 = vector.load %arg2[%c248, %c0_98] : memref<360x32xf32, #tpu.memory_space<vmem>>, vector<96x32xf32>
    %cst_99 = arith.constant dense<0.000000e+00> : vector<32x32xf32>
    %254 = tpu.matmul %252, %253, %cst_99 {dimension_numbers = #tpu.dot_dimension_numbers<[1], [0], [0], [1], [0, 0, 1, 1], [], []>} : vector<32x96xf32>, vector<96x32xf32>, vector<32x32xf32> -> vector<32x32xf32>
    %c9 = arith.constant 9 : index
    %c0_100 = arith.constant 0 : index
    %255 = vector.load %arg3[%c9, %c0_100] : memref<11x32xf32, #tpu.memory_space<vmem>>, vector<1x32xf32>
    %256 = vector.broadcast %255 : vector<1x32xf32> to vector<32x32xf32>
    %257 = arith.mulf %254, %256 : vector<32x32xf32>
    %c9_101 = arith.constant 9 : index
    %c0_102 = arith.constant 0 : index
    %258 = vector.load %arg4[%c9_101, %c0_102] : memref<11x32xf32, #tpu.memory_space<vmem>>, vector<1x32xf32>
    %259 = vector.broadcast %258 : vector<1x32xf32> to vector<32x32xf32>
    %260 = arith.addf %257, %259 : vector<32x32xf32>
    %261 = arith.addf %260, %221 : vector<32x32xf32>
    %cst_103 = arith.constant 0.000000e+00 : f32
    %262 = vector.broadcast %cst_103 : f32 to vector<32x32xf32>
    %263 = arith.maximumf %261, %262 : vector<32x32xf32>
    %c0_104 = arith.constant 0 : index
    %c0_105 = arith.constant 0 : index
    %264 = vector.load %arg7[%c0_104, %c0_105] : memref<8x32xf32, #tpu.memory_space<vmem>>, vector<8x32xf32>
    %cst_106 = arith.constant dense<0.000000e+00> : vector<8x32xf32>
    %265 = tpu.matmul %264, %263, %cst_106 {dimension_numbers = #tpu.dot_dimension_numbers<[1], [0], [0], [1], [0, 0, 1, 1], [], []>} : vector<8x32xf32>, vector<32x32xf32>, vector<8x32xf32> -> vector<8x32xf32>
    %c0_107 = arith.constant 0 : index
    %c0_108 = arith.constant 0 : index
    %266 = vector.load %arg8[%c0_107, %c0_108] : memref<32x128xf32, #tpu.memory_space<vmem>>, vector<32x128xf32>
    %cst_109 = arith.constant dense<0.000000e+00> : vector<8x128xf32>
    %267 = tpu.matmul %265, %266, %cst_109 {dimension_numbers = #tpu.dot_dimension_numbers<[1], [0], [0], [1], [0, 0, 1, 1], [], []>} : vector<8x32xf32>, vector<32x128xf32>, vector<8x128xf32> -> vector<8x128xf32>
    %c0_110 = arith.constant 0 : index
    %c0_111 = arith.constant 0 : index
    %268 = vector.load %arg9[%c0_110, %c0_111] : memref<1x128xf32, #tpu.memory_space<vmem>>, vector<1x128xf32>
    %269 = vector.broadcast %268 : vector<1x128xf32> to vector<8x128xf32>
    %270 = arith.addf %267, %269 : vector<8x128xf32>
    %c0_112 = arith.constant 0 : index
    %c0_113 = arith.constant 0 : index
    %271 = vector.load %arg10[%c0_112, %c0_113] : memref<8x128xf32, #tpu.memory_space<vmem>>, vector<8x128xf32>
    tpu.vector_store %arg10[%c0_112, %c0_113], %270 {strides = array<i32>} : memref<8x128xf32, #tpu.memory_space<vmem>>, vector<8x128xf32>,
    return
  }
  func.func @transform_0(%arg0: i32) -> (i32, i32) {
    %c0_i32 = arith.constant 0 : i32
    %c0_i32_0 = arith.constant 0 : i32
    return %arg0, %c0_i32 : i32, i32
  }
  func.func @transform_1(%arg0: i32) -> (i32, i32) {
    %c0_i32 = arith.constant 0 : i32
    %c0_i32_0 = arith.constant 0 : i32
    %c0_i32_1 = arith.constant 0 : i32
    return %c0_i32, %c0_i32_0 : i32, i32
  }
  func.func @transform_2(%arg0: i32) -> (i32, i32) {
    %c0_i32 = arith.constant 0 : i32
    %c0_i32_0 = arith.constant 0 : i32
    %c0_i32_1 = arith.constant 0 : i32
    return %c0_i32, %c0_i32_0 : i32, i32
  }
  func.func @transform_3(%arg0: i32) -> (i32, i32) {
    %c0_i32 = arith.constant 0 : i32
    %c0_i32_0 = arith.constant 0 : i32
    %c0_i32_1 = arith.constant 0 : i32
    return %c0_i32, %c0_i32_0 : i32, i32
  }
  func.func @transform_4(%arg0: i32) -> (i32, i32) {
    %c0_i32 = arith.constant 0 : i32
    %c0_i32_0 = arith.constant 0 : i32
    %c0_i32_1 = arith.constant 0 : i32
    return %c0_i32, %c0_i32_0 : i32, i32
  }
  func.func @transform_5(%arg0: i32) -> (i32, i32) {
    %c0_i32 = arith.constant 0 : i32
    %c0_i32_0 = arith.constant 0 : i32
    %c0_i32_1 = arith.constant 0 : i32
    return %c0_i32, %c0_i32_0 : i32, i32
  }
  func.func @transform_6(%arg0: i32) -> (i32, i32) {
    %c0_i32 = arith.constant 0 : i32
    %c0_i32_0 = arith.constant 0 : i32
    %c0_i32_1 = arith.constant 0 : i32
    return %c0_i32, %c0_i32_0 : i32, i32
  }
  func.func @transform_7(%arg0: i32) -> (i32, i32) {
    %c0_i32 = arith.constant 0 : i32
    %c0_i32_0 = arith.constant 0 : i32
    %c0_i32_1 = arith.constant 0 : i32
    return %c0_i32, %c0_i32_0 : i32, i32
  }
  func.func @transform_8(%arg0: i32) -> (i32, i32) {
    %c0_i32 = arith.constant 0 : i32
    %c0_i32_0 = arith.constant 0 : i32
    %c0_i32_1 = arith.constant 0 : i32
    return %c0_i32, %c0_i32_0 : i32, i32
  }
  func.func @transform_9(%arg0: i32) -> (i32, i32) {
    %c0_i32 = arith.constant 0 : i32
    %c0_i32_0 = arith.constant 0 : i32
    return %arg0, %c0_i32 : i32, i32
  }
}

</mosaic_0001>

<bundles_post_ra>
// kernel: resnet_forward.1
= control target key start
LH: loop header
LB: loop body
LE: loop exit
PB: predicated region body
PF: predicated region fallthrough
CT: control target
= control target key end

     0   :  { %v48_v0 = vlaneseq  ;;  %s5894_s15 = smov 8   ;;  %vm8291_vm0 = vcmask 1046528   ;;  %s5895_s20 = smov 16   ;;  %vm8290_vm4 = vcmask 1040384   ;;  %vm8300_vm11 = vcmask 64512   ;;  %s8280_s0 = inlined_call_operand.vmem [shape: f32[128,8], index: 0, kind: input, shape index: {}]   ;;  %s8281_s1 = inlined_call_operand.vmem [shape: f32[360,32], index: 1, kind: input, shape index: {}]   ;;  %s8282_s2 = inlined_call_operand.vmem [shape: f32[11,32], index: 2, kind: input, shape index: {}]   ;;  %s8283_s3 = inlined_call_operand.vmem [shape: f32[11,32], index: 3, kind: input, shape index: {}]   ;;  %s8284_s4 = inlined_call_operand.vmem [shape: f32[64,128], index: 4, kind: input, shape index: {}]   ;;  %s8285_s5 = inlined_call_operand.vmem [shape: f32[32,64], index: 5, kind: input, shape index: {}]   ;;  %s8286_s7 = inlined_call_operand.vmem [shape: f32[32,128], index: 7, kind: input, shape index: {}]   ;;  %s8287_s6 = inlined_call_operand.vmem [shape: f32[8,32], index: 6, kind: input, shape index: {}]   ;;  %s8288_s8 = inlined_call_operand.vmem [shape: f32[1,128], index: 8, kind: input, shape index: {}]   ;;  %s8289_s9 = inlined_call_operand.vmem [shape: f32[8,128], index: 9, kind: output, shape index: {}]  }
   0x1   :  { %v5956_v1 = vld [vmem:[%s8280_s0 + $0x18] sm:$0xff]  ;;  %v5961_v2 = vld [vmem:[%s8280_s0] sm:$0xff]  ;;  %v5966_v3 = vld [vmem:[%s8280_s0 + $0x8] sm:$0xff]  ;;  %vm8299_vm12 = vcmask 130048   ;;  %vm8298_vm13 = vcmask 195584   ;;  %s5896_s16 = smov 120  }
   0x2   :  { %329 = vrot.lane.b32.xlu1 %v5956_v1, %s5894_s15  ;;  %323 = vrot.lane.b32.xlu0 %v5961_v2, %s5894_s15  ;;  %v227_v4 = vrot.slane %v5961_v2, 1  ;;  %v34_v5 = vld [vmem:[%s8280_s0 + $0x10] sm:$0xff]  ;;  %v228_v6 = vrot.slane %v5966_v3, 1  ;;  %v5980_v7 = vld [vmem:[%s8280_s0 + $0x20] sm:$0xff]  ;;  %v5982_v9 = vshrl.u32 %v48_v0, 7  ;;  %v232_v11 = vrot.slane %v5956_v1, 1 }
   0x3   :  { %v230_v8 = vrot.slane %v34_v5, 1  ;;  %v234_v14 = vrot.slane %v5980_v7, 1  ;;  %v37_v24 = vld [vmem:[%s8280_s0 + $0x28] sm:$0xff]  ;;  %v38_v25 = vld [vmem:[%s8280_s0 + $0x30] sm:$0xff]  ;;  %v135_v30 = vrot.slane %v5956_v1, 7  ;;  %v133_v31 = vrot.slane %v34_v5, 7 }
   0x4   :  { %8347 = vst [vmem:[#allocation2_spill] sm:$0xff] %v5982_v9  ;;  %v229_v10 = vsel %vm8291_vm0, %v227_v4, %v228_v6  ;;  %v5990_v12 = vadd.s32 8, %v5982_v9  ;;  %v5993_v13 = vadd.s32 24, %v5982_v9  ;;  %v6010_v21 = vadd.s32 40, %v5982_v9  ;;  %v39_v33 = vld [vmem:[%s8280_s0 + $0x38] sm:$0xff]  ;;  %v6035_v34 = vld [vmem:[%s8280_s0 + $0x40] sm:$0xff] }
   0x5   :  { %v231_v16 = vsel %vm8291_vm0, %v228_v6, %v230_v8  ;;  %v235_v20 = vsel %vm8291_vm0, %v232_v11, %v234_v14  ;;  %v233_v23 = vsel %vm8291_vm0, %v230_v8, %v232_v11  ;;  %v236_v27 = vrot.slane %v37_v24, 1  ;;  %v469_v38 = vld [vmem:[%s8281_s1] sm:$0xff]  ;;  %v470_v39 = vld [vmem:[%s8281_s1 + $0x8] sm:$0xff]  ;;  %v471_v51 = vld [vmem:[%s8281_s1 + $0x10] sm:$0xff]  ;;  %s5897_s10 = smov 32  }
   0x6   :  { %325 = vrot.lane.b32.xlu0 %v5966_v3, %s5894_s15  ;;  %387 = vrot.lane.b32.xlu1 %v229_v10, %s5895_s20  ;;  %8348 = vst [vmem:[#allocation3_spill] sm:$0xff] %v5990_v12  ;;  %8349 = vst [vmem:[#allocation4_spill] sm:$0xff] %v5993_v13  ;;  %v66_v15 = vand.u32 15, %v5990_v12  ;;  %v68_v17 = vand.u32 15, %v5993_v13  ;;  %v70_v28 = vand.u32 15, %v6010_v21  ;;  %v238_v29 = vrot.slane %v38_v25, 1 }
   0x7   :  { %8354 = vst [vmem:[#allocation5_spill] sm:$0xff] %v6010_v21  ;;  %v131_v32 = vrot.slane %v5966_v3, 7  ;;  %v6038_v35 = vadd.s32 56, %v5982_v9  ;;  %v130_v40 = vrot.slane %v5961_v2, 7  ;;  %v237_v41 = vsel %vm8291_vm0, %v234_v14, %v236_v27  ;;  %v41_v53 = vld [vmem:[%s8280_s0 + $0x48] sm:$0xff]  ;;  %v43_v60 = vld [vmem:[%s8280_s0 + $0x58] sm:$0xff] }
   0x8   :  { %vm6000_vm1 = vcmp.ne.s32.totalorder %v66_v15, 15  ;;  %vm6004_vm2 = vcmp.ne.s32.totalorder %v68_v17, 15  ;;  %vm6042_vm3 = vcmp.ne.s32.totalorder %v70_v28, 15  ;;  %v239_v37 = vsel %vm8291_vm0, %v236_v27, %v238_v29 }
   0x9   :  { %v308_v22 = vsel %vm6000_vm1, %v231_v16, 0.0  ;;  %v310_v26 = vsel %vm6004_vm2, %v235_v20, 0.0  ;;  %8355 = vst [vmem:[#allocation6_spill] sm:$0xff] %v6038_v35  ;;  %v6056_v42 = vsel %vm8290_vm4, %v133_v31, %v135_v30  ;;  %v139_v43 = vrot.slane %v37_v24, 7  ;;  %v45_v20 = vld [vmem:[%s8280_s0 + $0x68] sm:$0xff] }
   0xa   :  { %327 = vrot.lane.b32.xlu0 %v34_v5, %s5894_s15  ;;  %389 = vrot.lane.b32.xlu1 %v308_v22, %s5895_s20  ;;  %v240_v44 = vrot.slane %v39_v33, 1  ;;  %v242_v45 = vrot.slane %v6035_v34, 1  ;;  %v312_v46 = vsel %vm6042_vm3, %v239_v37, 0.0  ;;  %v72_v47 = vand.u32 15, %v6038_v35  ;;  %v42_v5 = vld [vmem:[%s8280_s0 + $0x50] sm:$0xff]  ;;  %v47_v37 = vld [vmem:[%s8280_s0 + $0x78] sm:$0xff] }
   0xb   :  { %v5629_v48 = vpack.c.bf16 %v470_v39, %v469_v38  ;;  %v6066_v49 = vsel %vm8290_vm4, %v130_v40, %v131_v32  ;;  %v143_v50 = vrot.slane %v39_v33, 7  ;;  %v6073_v52 = vsel %vm8290_vm4, %v131_v32, %v133_v31 }
   0xc   :  { %v137_v54 = vrot.slane %v5980_v7, 7  ;;  %v147_v55 = vrot.slane %v41_v53, 7  ;;  %v141_v56 = vrot.slane %v38_v25, 7  ;;  %v145_v57 = vrot.slane %v6035_v34, 7 }
   0xd   :  { %5630 = vmatprep.subr.bf16.mxu0 %v5629_v48  ;;  %vm6081_vm5 = vcmp.ne.s32.totalorder %v72_v47, 15  ;;  %v243_v59 = vsel %vm8291_vm0, %v240_v44, %v242_v45  ;;  %v58_v63 = vadd.s32 72, %v5982_v9  ;;  %v151_v0 = vrot.slane %v43_v60, 7 }
   0xe   :  { %391 = vrot.lane.b32.xlu0 %v233_v23, %s5895_s20  ;;  %393 = vrot.lane.b32.xlu1 %v310_v26, %s5895_s20  ;;  %v6090_v61 = vsel %vm8290_vm4, %v135_v30, %v137_v54  ;;  %v6093_v62 = vsel %vm8290_vm4, %v137_v54, %v139_v43  ;;  %v6098_v1 = vsel %vm8290_vm4, %v139_v43, %v141_v56  ;;  %v149_v8 = vrot.slane %v42_v5, 7  ;;  %v46_v43 = vld [vmem:[%s8280_s0 + $0x70] sm:$0xff] }
   0xf   :  { %5632 = vmatpush3.bf16.msra.mxu0 %v5629_v48  ;;  %v6101_v3 = vsel %vm8290_vm4, %v141_v56, %v143_v50  ;;  %v241_v4 = vsel %vm8291_vm0, %v238_v29, %v240_v44  ;;  %v6108_v6 = vsel %vm8290_vm4, %v143_v50, %v145_v57  ;;  %v314_v10 = vsel %vm6081_vm5, %v243_v59, 0.0 }
  0x10   :  { %5281 = vmatprep.subr.mxu0 %v471_v51  ;;  %v244_v11 = vrot.slane %v41_v53, 1  ;;  %v74_v14 = vand.u32 15, %v58_v63  ;;  %v246_v15 = vrot.slane %v42_v5, 1  ;;  %v6118_v16 = vsel %vm8290_vm4, %v147_v55, %v149_v8 }
  0x11   :  { %v6121_v17 = vsel %vm8290_vm4, %v149_v8, %v151_v0  ;;  %v155_v22 = vrot.slane %v45_v20, 7  ;;  %v60_v26 = vadd.s32 88, %v5982_v9  ;;  %v248_v32 = vrot.slane %v43_v60, 1 }
  0x12   :  { %331 = vrot.lane.b32.xlu0 %v5980_v7, %s5894_s15  ;;  %333 = vrot.lane.b32.xlu1 %v37_v24, %s5894_s15  ;;  %v6112_v7 = vsel %vm8290_vm4, %v145_v57, %v147_v55  ;;  %vm6129_vm6 = vcmp.ne.s32.totalorder %v74_v14, 15  ;;  %v247_v24 = vsel %vm8291_vm0, %v244_v11, %v246_v15  ;;  %v245_v27 = vsel %vm8291_vm0, %v242_v45, %v244_v11 }
  0x13   :  { %5282 = vmatpush3.msra.mxu0 %v471_v51  ;;  %v316_v29 = vsel %vm6129_vm6, %v247_v24, 0.0  ;;  %v159_v38 = vrot.slane %v47_v37, 7  ;;  %v8362_v39 = vmov 0  ;;  %v62_v44 = vadd.s32 104, %v5982_v9 }
  0x14   :  { %v249_v45 = vsel %vm8291_vm0, %v246_v15, %v248_v32  ;;  %v252_v51 = vrot.slane %v45_v20, 1  ;;  %v254_v54 = vrot.slane %v46_v43, 1  ;;  %v8364_v55 = vmov 0 }
  0x15   :  { %v64_v57 = vadd.s32 120, %v5982_v9  ;;  %v256_v63 = vrot.slane %v47_v37, 1  ;;  %v65_v11 = vand.u32 15, %v5982_v9  ;;  %v8368_v14 = vmov 0 }
  0x16   :  { %395 = vrot.lane.b32.xlu0 %v237_v41, %s5895_s20  ;;  %397 = vrot.lane.b32.xlu1 %v312_v46, %s5895_s20  ;;  %v157_v46 = vrot.slane %v46_v43, 7  ;;  %v255_v56 = vsel %vm8291_vm0, %v252_v51, %v254_v54  ;;  %v177_v15 = vsel %vm8290_vm4, 0.0, %v130_v40  ;;  %v8371_v40 = vmov 0 }
  0x17   :  { %v257_v8 = vsel %vm8291_vm0, %v254_v54, %v256_v63  ;;  %vm6201_vm10 = vcmp.ne.s32.totalorder %v65_v11, 0 }
  0x18   :  { %v6168_v48 = vsel %vm8290_vm4, %v155_v22, %v157_v46  ;;  %v6171_v50 = vsel %vm8290_vm4, %v157_v46, %v159_v38  ;;  %v8369_v14 = vsel %vm6201_vm10, 4294967295, %v8368_v14 }
  0x1a   :  { %335 = vrot.lane.b32.xlu0 %v38_v25, %s5894_s15  ;;  %337 = vrot.lane.b32.xlu1 %v39_v33, %s5894_s15  ;;  %v44_v25 = vld [vmem:[%s8280_s0 + $0x60] sm:$0xff]  ;;  %v76_v33 = vand.u32 15, %v60_v26 }
  0x1b   :  { %v153_v28 = vrot.slane %v44_v25, 7 }
  0x1c   :  { %vm6154_vm7 = vcmp.ne.s32.totalorder %v76_v33, 15 }
  0x1d   :  { %v6143_v30 = vsel %vm8290_vm4, %v151_v0, %v153_v28  ;;  %v6146_v31 = vsel %vm8290_vm4, %v153_v28, %v155_v22  ;;  %v8363_v39 = vsel %vm6154_vm7, 4294967295, %v8362_v39  ;;  %v80_v0 = vand.u32 15, %v64_v57 }
  0x1e   :  { %399 = vrot.lane.b32.xlu0 %v241_v4, %s5895_s20  ;;  %401 = vrot.lane.b32.xlu1 %v314_v10, %s5895_s20  ;;  %v8366_v4 = vmov 0 }
  0x1f   :  { %vm6189_vm9 = vcmp.ne.s32.totalorder %v80_v0, 15 }
  0x20   :  { %v8367_v4 = vsel %vm6189_vm9, 4294967295, %v8366_v4 }
  0x22   :  { %339 = vrot.lane.b32.xlu0 %v6035_v34, %s5894_s15  ;;  %341 = vrot.lane.b32.xlu1 %v41_v53, %s5894_s15  ;;  %v250_v34 = vrot.slane %v44_v25, 1  ;;  %v78_v53 = vand.u32 15, %v62_v44 }
  0x24   :  { %v251_v41 = vsel %vm8291_vm0, %v248_v32, %v250_v34  ;;  %vm6176_vm8 = vcmp.ne.s32.totalorder %v78_v53, 15  ;;  %v253_v59 = vsel %vm8291_vm0, %v250_v34, %v252_v51  ;;  %v6222_v32 = vadd.s32 32, %v5982_v9 }
  0x25   :  { %v318_v47 = vsel %vm6154_vm7, %v251_v41, 0.0  ;;  %v8365_v55 = vsel %vm6176_vm8, 4294967295, %v8364_v55 }
  0x26   :  { %403 = vrot.lane.b32.xlu0 %v245_v27, %s5895_s20  ;;  %405 = vrot.lane.b32.xlu1 %v316_v29, %s5895_s20  ;;  %8373 = vst [vmem:[#allocation8_spill] sm:$0xff] %v6222_v32  ;;  %v69_v41 = vand.u32 15, %v6222_v32 }
  0x28   :  { %vm6237_vm15 = vcmp.ne.s32.totalorder %v69_v41, 0 }
  0x2a   :  { %343 = vrot.lane.b32.xlu0 %v42_v5, %s5894_s15  ;;  %345 = vrot.lane.b32.xlu1 %v43_v60, %s5894_s15  ;;  %v320_v60 = vsel %vm6176_vm8, %v255_v56, 0.0  ;;  %v274_v5 = vsel %vm8291_vm0, %v256_v63, 0.0  ;;  %v214_v56 = vsel %vm6237_vm15, %v6090_v61, 0.0  ;;  %v57_v61 = vadd.s32 64, %v5982_v9 }
  0x2b   :  { %v322_v10 = vsel %vm6189_vm9, %v274_v5, 0.0 }
  0x2e   :  { %407 = vrot.lane.b32.xlu0 %v249_v45, %s5895_s20  ;;  %409 = vrot.lane.b32.xlu1 %v318_v47, %s5895_s20 }
  0x32   :  { %347 = vrot.lane.b32.xlu0 %v44_v25, %s5894_s15  ;;  %349 = vrot.lane.b32.xlu1 %v45_v20, %s5894_s15  ;;  %v6209_v20 = vadd.s32 16, %v5982_v9  ;;  %v210_v25 = vsel %vm6201_vm10, %v177_v15, 0.0 }
  0x34   :  { %8370 = vst [vmem:[#allocation7_spill] sm:$0xff] %v6209_v20  ;;  %v67_v26 = vand.u32 15, %v6209_v20 }
  0x36   :  { %411 = vrot.lane.b32.xlu0 %v253_v59, %s5895_s20  ;;  %413 = vrot.lane.b32.xlu1 %v320_v60, %s5895_s20  ;;  %vm6217_vm14 = vcmp.ne.s32.totalorder %v67_v26, 0 }
  0x37   :  { %v8372_v40 = vsel %vm6217_vm14, 4294967295, %v8371_v40  ;;  %v212_v34 = vsel %vm6217_vm14, %v6073_v52, 0.0  ;;  %v6242_v52 = vadd.s32 48, %v5982_v9 }
  0x39   :  { %8376 = vst [vmem:[#allocation9_spill] sm:$0xff] %v6242_v52  ;;  %v71_v57 = vand.u32 15, %v6242_v52 }
  0x3a   :  { %351 = vrot.lane.b32.xlu0 %v46_v43, %s5894_s15  ;;  %353 = vrot.lane.b32.xlu1 %v47_v37, %s5894_s15 }
  0x3b   :  { %vm6255_vm4 = vcmp.ne.s32.totalorder %v71_v57, 0 }
  0x3c   :  { %v216_v15 = vsel %vm6255_vm4, %v6098_v1, 0.0 }
  0x3e   :  { %415 = vrot.lane.b32.xlu0 %v257_v8, %s5895_s20  ;;  %417 = vrot.lane.b32.xlu1 %v322_v10, %s5895_s20  ;;  %v8377_v8 = vmov 0 }
  0x3f   :  { %v8378_v8 = vsel %vm6255_vm4, 4294967295, %v8377_v8 }
  0x74   :  { %v330_v22 = vpop.permute.xlu1 %329  ;;  %v324_v24 = vpop.permute.xlu0 %323 }
  0x75   :  { %v436_v27 = vsel %vm8300_vm11, %v210_v25, %v324_v24  ;;  %v439_v47 = vsel %vm8300_vm11, %v6056_v42, %v330_v22 }
  0x78   :  { %v326_v28 = vpop.permute.xlu0 %325  ;;  %v388_v29 = vpop.permute.xlu1 %387 }
  0x79   :  { %v453_v2 = vsel %vm8299_vm12, %v436_v27, %v388_v29  ;;  %v437_v37 = vsel %vm8300_vm11, %v6066_v49, %v326_v28  ;;  %v8374_v49 = vmov 0  ;;  %v8379_v29 = vmov 0 }
  0x7a   :  { %5283 = vmatprep.mubr.msk.f32.mxu0 %vm8298_vm13, %v453_v2  ;;  %v8375_v49 = vsel %vm6237_vm15, 4294967295, %v8374_v49  ;;  %v59_v2 = vadd.s32 80, %v5982_v9 }
  0x7c   :  { %v328_v33 = vpop.permute.xlu0 %327  ;;  %v390_v38 = vpop.permute.xlu1 %389 }
  0x7d   :  { %v454_v43 = vsel %vm8299_vm12, %v437_v37, %v390_v38  ;;  %v438_v44 = vsel %vm8300_vm11, %v212_v34, %v328_v33 }
  0x7e   :  { %5284 = vmatmul.mubr.msk.f32.vlgmr.msra.gmra.mrb[0].mxu0 %vm8298_vm13, %v454_v43 }
  0x80   :  { %v392_v45 = vpop.permute.xlu0 %391  ;;  %v394_v51 = vpop.permute.xlu1 %393 }
  0x81   :  { %v455_v46 = vsel %vm8299_vm12, %v438_v44, %v392_v45  ;;  %v456_v53 = vsel %vm8299_vm12, %v439_v47, %v394_v51  ;;  %v61_v47 = vadd.s32 96, %v5982_v9 }
  0x82   :  { %5286 = vmatprep.mubr.msk.f32.mxu0 %vm8298_vm13, %v455_v46  ;;  %v8381_v46 = vmov 0 }
  0x83   :  { %5287 = vmatmul.mubr.msk.f32.gmra.mrb[2].mxu0 %vm8298_vm13, %v456_v53 }
  0x84   :  { %v332_v54 = vpop.permute.xlu0 %331  ;;  %v334_v42 = vpop.permute.xlu1 %333 }
  0x85   :  { %v440_v59 = vsel %vm8300_vm11, %v214_v56, %v332_v54  ;;  %v441_v0 = vsel %vm8300_vm11, %v6093_v62, %v334_v42  ;;  %v73_v62 = vand.u32 15, %v57_v61 }
  0x87   :  { %vm6270_vm0 = vcmp.ne.s32.totalorder %v73_v62, 0 }
  0x88   :  { %v396_v60 = vpop.permute.xlu0 %395  ;;  %v398_v5 = vpop.permute.xlu1 %397  ;;  %v8380_v29 = vsel %vm6270_vm0, 4294967295, %v8379_v29  ;;  %v218_v34 = vsel %vm6270_vm0, %v6108_v6, 0.0 }
  0x89   :  { %v457_v63 = vsel %vm8299_vm12, %v440_v59, %v396_v60  ;;  %v458_v10 = vsel %vm8299_vm12, %v441_v0, %v398_v5  ;;  %v63_v0 = vadd.s32 112, %v5982_v9 }
  0x8a   :  { %5289 = vmatprep.mubr.msk.f32.mxu0 %vm8298_vm13, %v457_v63  ;;  %v8383_v63 = vmov 0 }
  0x8b   :  { %5290 = vmatmul.mubr.msk.f32.gmra.mrb[4].mxu0 %vm8298_vm13, %v458_v10 }
  0x8c   :  { %v336_v11 = vpop.permute.xlu0 %335  ;;  %v338_v22 = vpop.permute.xlu1 %337 }
  0x8d   :  { %v442_v24 = vsel %vm8300_vm11, %v216_v15, %v336_v11  ;;  %v443_v27 = vsel %vm8300_vm11, %v6101_v3, %v338_v22  ;;  %v75_v3 = vand.u32 15, %v59_v2 }
  0x8f   :  { %vm6285_vm4 = vcmp.ne.s32.totalorder %v75_v3, 0 }
  0x90   :  { %v400_v25 = vpop.permute.xlu0 %399  ;;  %v402_v28 = vpop.permute.xlu1 %401  ;;  %v8382_v46 = vsel %vm6285_vm4, 4294967295, %v8381_v46  ;;  %v220_v53 = vsel %vm6285_vm4, %v6118_v16, 0.0 }
  0x91   :  { %v459_v26 = vsel %vm8299_vm12, %v442_v24, %v400_v25  ;;  %v460_v1 = vsel %vm8299_vm12, %v443_v27, %v402_v28  ;;  %v8385_v25 = vmov 0 }
  0x92   :  { %5292 = vmatprep.mubr.msk.f32.mxu0 %vm8298_vm13, %v459_v26 }
  0x93   :  { %5293 = vmatmul.mubr.msk.f32.gmra.mrb[6].mxu0 %vm8298_vm13, %v460_v1 }
  0x94   :  { %v340_v33 = vpop.permute.xlu0 %339  ;;  %v342_v37 = vpop.permute.xlu1 %341 }
  0x95   :  { %v444_v38 = vsel %vm8300_vm11, %v218_v34, %v340_v33  ;;  %v445_v44 = vsel %vm8300_vm11, %v6112_v7, %v342_v37  ;;  %v77_v7 = vand.u32 15, %v61_v47  ;;  %v1013_v47 = vld [vmem:[%s8281_s1 + $0x20] sm:$0xff] }
  0x97   :  { %vm6300_vm0 = vcmp.ne.s32.totalorder %v77_v7, 0 }
  0x98   :  { %v404_v41 = vpop.permute.xlu0 %403  ;;  %v406_v45 = vpop.permute.xlu1 %405  ;;  %v8384_v63 = vsel %vm6300_vm0, 4294967295, %v8383_v63  ;;  %v222_v61 = vsel %vm6300_vm0, %v6143_v30, 0.0 }
  0x99   :  { %v461_v43 = vsel %vm8299_vm12, %v444_v38, %v404_v41  ;;  %v462_v6 = vsel %vm8299_vm12, %v445_v44, %v406_v45  ;;  %v6339_v38 = vld [vmem:[%s8283_s3] ss:$0 sm:$0xff]  ;;  %v1012_v45 = vld [vmem:[%s8281_s1 + $0x18] sm:$0xff] }
  0x9a   :  { %5295 = vmatprep.mubr.msk.f32.mxu0 %vm8298_vm13, %v461_v43 }
  0x9b   :  { %5296 = vmatmul.mubr.msk.f32.gmra.mrb[8].mxu0 %vm8298_vm13, %v462_v6 }
  0x9c   :  { %v344_v51 = vpop.permute.xlu0 %343  ;;  %v346_v54 = vpop.permute.xlu1 %345 }
  0x9d   :  { %v446_v56 = vsel %vm8300_vm11, %v220_v53, %v344_v51  ;;  %v447_v59 = vsel %vm8300_vm11, %v6121_v17, %v346_v54  ;;  %v79_v17 = vand.u32 15, %v63_v0  ;;  %v5633_v53 = vpack.c.bf16 %v1013_v47, %v1012_v45  ;;  %v1014_v0 = vld [vmem:[%s8281_s1 + $0x28] sm:$0xff] }
  0x9f   :  { %vm6315_vm4 = vcmp.ne.s32.totalorder %v79_v17, 0  ;;  %5634 = vmatprep.subr.bf16.mxu1 %v5633_v53 }
  0xa0   :  { %v408_v42 = vpop.permute.xlu0 %407  ;;  %v410_v60 = vpop.permute.xlu1 %409  ;;  %v8386_v25 = vsel %vm6315_vm4, 4294967295, %v8385_v25  ;;  %v224_v27 = vsel %vm6315_vm4, %v6168_v48, 0.0  ;;  %v6334_v48 = vld [vmem:[%s8282_s2] ss:$0 sm:$0xff]  ;;  %5636 = vmatpush3.bf16.msra.mxu1 %v5633_v53 }
  0xa1   :  { %v463_v57 = vsel %vm8299_vm12, %v446_v56, %v408_v42  ;;  %v464_v16 = vsel %vm8299_vm12, %v447_v59, %v410_v60  ;;  %5311 = vmatprep.subr.mxu1 %v1014_v0 }
  0xa2   :  { %5298 = vmatprep.mubr.msk.f32.mxu0 %vm8298_vm13, %v463_v57 }
  0xa3   :  { %5299 = vmatmul.mubr.msk.f32.gmra.mrb[10].mxu0 %vm8298_vm13, %v464_v16 }
  0xa4   :  { %v348_v5 = vpop.permute.xlu0 %347  ;;  %v350_v10 = vpop.permute.xlu1 %349  ;;  %5312 = vmatpush3.msra.mxu1 %v1014_v0 }
  0xa5   :  { %v448_v11 = vsel %vm8300_vm11, %v222_v61, %v348_v5  ;;  %v449_v62 = vsel %vm8300_vm11, %v6146_v31, %v350_v10 }
  0xa8   :  { %v412_v15 = vpop.permute.xlu0 %411  ;;  %v414_v24 = vpop.permute.xlu1 %413 }
  0xa9   :  { %v465_v22 = vsel %vm8299_vm12, %v448_v11, %v412_v15  ;;  %v466_v26 = vsel %vm8299_vm12, %v449_v62, %v414_v24 }
  0xaa   :  { %5301 = vmatprep.mubr.msk.f32.mxu0 %vm8298_vm13, %v465_v22 }
  0xab   :  { %5302 = vmatmul.mubr.msk.f32.gmra.mrb[12].mxu0 %vm8298_vm13, %v466_v26 }
  0xac   :  { %v352_v30 = vpop.permute.xlu0 %351  ;;  %v354_v28 = vpop.permute.xlu1 %353 }
  0xad   :  { %v450_v2 = vsel %vm8300_vm11, %v224_v27, %v352_v30  ;;  %v451_v33 = vsel %vm8300_vm11, %v6171_v50, %v354_v28 }
  0xb0   :  { %v416_v31 = vpop.permute.xlu0 %415  ;;  %v418_v34 = vpop.permute.xlu1 %417 }
  0xb1   :  { %v467_v1 = vsel %vm8299_vm12, %v450_v2, %v416_v31  ;;  %v468_v37 = vsel %vm8299_vm12, %v451_v33, %v418_v34 }
  0xb2   :  { %5304 = vmatprep.mubr.msk.f32.mxu0 %vm8298_vm13, %v467_v1 }
  0xb3   :  { %5305 = vmatmul.mubr.msk.f32.gmra.mrb[14].mxu0 %vm8298_vm13, %v468_v37  ;;  %vm8387_vm13 = vcmask 1046528  }
  0xb4   :  { %vm8388_vm12 = vmmov %vm8387_vm13 }
  0xb5   :  { %vm8396_vm11 = vmmov %vm8388_vm12 }
 0x151   :  { %v5285_v3 = vpop.f32.mrb[0].mxu0 }
 0x152   :  { %v672_v50 = vmul.f32 %v5285_v3, %v6334_v48  ;;  %v587_v41 = vpop.f32.mrb[1].mxu0 }
 0x153   :  { %v671_v43 = vmul.f32 %v6334_v48, %v587_v41 }
 0x154   :  { %v693_v44 = vadd.f32 %v6339_v38, %v672_v50 }
 0x155   :  { %v692_v6 = vadd.f32 %v6339_v38, %v671_v43 }
 0x156   :  { %v5288_v51 = vpop.f32.mrb[2].mxu0  ;;  %v6351_v54 = vmax.f32 %v693_v44, 0.0 }
 0x157   :  { %v674_v7 = vmul.f32 %v5288_v51, %v6334_v48  ;;  %v597_v56 = vpop.f32.mrb[3].mxu0  ;;  %v6354_v42 = vmax.f32 %v692_v6, 0.0 }
 0x158   :  { %v673_v57 = vmul.f32 %v6334_v48, %v597_v56  ;;  %870 = vrot.lane.b32.xlu1 %v6351_v54, %s5894_s15  ;;  %v805_v60 = vrot.slane %v6351_v54, 1 }
 0x159   :  { %v695_v59 = vadd.f32 %v6339_v38, %v674_v7  ;;  %868 = vrot.lane.b32.xlu0 %v6354_v42, %s5894_s15  ;;  %v804_v5 = vrot.slane %v6354_v42, 1 }
 0x15a   :  { %v694_v16 = vadd.f32 %v6339_v38, %v673_v57 }
 0x15b   :  { %v6368_v61 = vmax.f32 %v695_v59, 0.0  ;;  %v806_v10 = vsel %vm8387_vm13, %v804_v5, %v805_v60 }
 0x15c   :  { %v6371_v17 = vmax.f32 %v694_v16, 0.0 }
 0x15d   :  { %874 = vrot.lane.b32.xlu1 %v6368_v61, %s5894_s15  ;;  %932 = vrot.lane.b32.xlu0 %v806_v10, %s5895_s20  ;;  %v809_v30 = vrot.slane %v6368_v61, 1 }
 0x15e   :  { %v5291_v11 = vpop.f32.mrb[4].mxu0  ;;  %v807_v26 = vrot.slane %v6371_v17, 1 }
 0x15f   :  { %v676_v15 = vmul.f32 %v5291_v11, %v6334_v48  ;;  %v607_v22 = vpop.f32.mrb[5].mxu0 }
 0x160   :  { %v675_v62 = vmul.f32 %v6334_v48, %v607_v22  ;;  %v810_v31 = vsel %vm8387_vm13, %v807_v26, %v809_v30  ;;  %v808_v1 = vsel %vm8388_vm12, %v805_v60, %v807_v26  ;;  %vm8389_vm13 = vmmov %vm8388_vm12 }
 0x161   :  { %v697_v24 = vadd.f32 %v6339_v38, %v676_v15  ;;  %872 = vrot.lane.b32.xlu0 %v6371_v17, %s5894_s15  ;;  %v853_v50 = vsel %vm6000_vm1, %v808_v1, 0.0 }
 0x162   :  { %v696_v27 = vadd.f32 %v6339_v38, %v675_v62 }
 0x163   :  { %v6384_v28 = vmax.f32 %v697_v24, 0.0 }
 0x164   :  { %v6386_v2 = vmax.f32 %v696_v27, 0.0 }
 0x165   :  { %878 = vrot.lane.b32.xlu1 %v6384_v28, %s5894_s15  ;;  %936 = vrot.lane.b32.xlu0 %v810_v31, %s5895_s20  ;;  %v813_v44 = vrot.slane %v6384_v28, 1 }
 0x166   :  { %v5294_v33 = vpop.f32.mrb[6].mxu0  ;;  %v811_v43 = vrot.slane %v6386_v2, 1 }
 0x167   :  { %v678_v34 = vmul.f32 %v5294_v33, %v6334_v48  ;;  %v617_v37 = vpop.f32.mrb[7].mxu0 }
 0x168   :  { %v677_v3 = vmul.f32 %v6334_v48, %v617_v37  ;;  %v814_v51 = vsel %vm8388_vm12, %v811_v43, %v813_v44  ;;  %v812_v53 = vsel %vm8389_vm13, %v809_v30, %v811_v43  ;;  %vm8390_vm13 = vmmov %vm8388_vm12 }
 0x169   :  { %v699_v41 = vadd.f32 %v6339_v38, %v678_v34  ;;  %934 = vrot.lane.b32.xlu1 %v853_v50, %s5895_s20  ;;  %876 = vrot.lane.b32.xlu0 %v6386_v2, %s5894_s15  ;;  %v855_v60 = vsel %vm6004_vm2, %v812_v53, 0.0 }
 0x16a   :  { %v698_v45 = vadd.f32 %v6339_v38, %v677_v3 }
 0x16b   :  { %v6404_v47 = vmax.f32 %v699_v41, 0.0 }
 0x16c   :  { %v6406_v6 = vmax.f32 %v698_v45, 0.0 }
 0x16d   :  { %882 = vrot.lane.b32.xlu1 %v6404_v47, %s5894_s15  ;;  %940 = vrot.lane.b32.xlu0 %v814_v51, %s5895_s20  ;;  %v817_v5 = vrot.slane %v6404_v47, 1 }
 0x16e   :  { %v5297_v7 = vpop.f32.mrb[8].mxu0  ;;  %v815_v16 = vrot.slane %v6406_v6, 1 }
 0x16f   :  { %v680_v56 = vmul.f32 %v5297_v7, %v6334_v48  ;;  %v627_v57 = vpop.f32.mrb[9].mxu0 }
 0x170   :  { %v679_v59 = vmul.f32 %v6334_v48, %v627_v57  ;;  %v818_v22 = vsel %vm8388_vm12, %v815_v16, %v817_v5  ;;  %v816_v62 = vsel %vm8390_vm13, %v813_v44, %v815_v16  ;;  %vm8391_vm13 = vmmov %vm8388_vm12 }
 0x171   :  { %v701_v0 = vadd.f32 %v6339_v38, %v680_v56  ;;  %938 = vrot.lane.b32.xlu1 %v855_v60, %s5895_s20  ;;  %880 = vrot.lane.b32.xlu0 %v6406_v6, %s5894_s15  ;;  %v857_v31 = vsel %vm6042_vm3, %v816_v62, 0.0 }
 0x172   :  { %v700_v10 = vadd.f32 %v6339_v38, %v679_v59 }
 0x173   :  { %v6424_v11 = vmax.f32 %v701_v0, 0.0 }
 0x174   :  { %v6426_v15 = vmax.f32 %v700_v10, 0.0 }
 0x175   :  { %886 = vrot.lane.b32.xlu1 %v6424_v11, %s5894_s15  ;;  %944 = vrot.lane.b32.xlu0 %v818_v22, %s5895_s20  ;;  %v821_v34 = vrot.slane %v6424_v11, 1 }
 0x176   :  { %v5300_v24 = vpop.f32.mrb[10].mxu0  ;;  %v819_v33 = vrot.slane %v6426_v15, 1 }
 0x177   :  { %v682_v26 = vmul.f32 %v5300_v24, %v6334_v48  ;;  %v637_v30 = vpop.f32.mrb[11].mxu0 }
 0x178   :  { %v681_v27 = vmul.f32 %v6334_v48, %v637_v30  ;;  %v822_v41 = vsel %vm8388_vm12, %v819_v33, %v821_v34  ;;  %v820_v43 = vsel %vm8391_vm13, %v817_v5, %v819_v33  ;;  %vm8392_vm13 = vmmov %vm8388_vm12 }
 0x179   :  { %v703_v1 = vadd.f32 %v6339_v38, %v682_v26  ;;  %942 = vrot.lane.b32.xlu1 %v857_v31, %s5895_s20  ;;  %884 = vrot.lane.b32.xlu0 %v6426_v15, %s5894_s15  ;;  %v859_v7 = vsel %vm6081_vm5, %v820_v43, 0.0 }
 0x17a   :  { %v702_v37 = vadd.f32 %v6339_v38, %v681_v27 }
 0x17b   :  { %v6444_v3 = vmax.f32 %v703_v1, 0.0 }
 0x17c   :  { %v6446_v50 = vmax.f32 %v702_v37, 0.0 }
 0x17d   :  { %890 = vrot.lane.b32.xlu1 %v6444_v3, %s5894_s15  ;;  %948 = vrot.lane.b32.xlu0 %v822_v41, %s5895_s20  ;;  %v825_v59 = vrot.slane %v6444_v3, 1 }
 0x17e   :  { %v5303_v44 = vpop.f32.mrb[12].mxu0  ;;  %v823_v57 = vrot.slane %v6446_v50, 1 }
 0x17f   :  { %v684_v45 = vmul.f32 %v5303_v44, %v6334_v48  ;;  %v647_v51 = vpop.f32.mrb[13].mxu0 }
 0x180   :  { %v683_v53 = vmul.f32 %v6334_v48, %v647_v51  ;;  %v826_v5 = vsel %vm8388_vm12, %v823_v57, %v825_v59  ;;  %v824_v10 = vsel %vm8392_vm13, %v821_v34, %v823_v57  ;;  %vm8395_vm13 = vmmov %vm8388_vm12  ;;  %v740_v57 = vrot.slane %v6354_v42, 7 }
 0x181   :  { %v705_v56 = vadd.f32 %v6339_v38, %v684_v45  ;;  %946 = vrot.lane.b32.xlu1 %v859_v7, %s5895_s20  ;;  %888 = vrot.lane.b32.xlu0 %v6446_v50, %s5894_s15  ;;  %v861_v30 = vsel %vm6129_vm6, %v824_v10, 0.0 }
 0x182   :  { %v704_v60 = vadd.f32 %v6339_v38, %v683_v53 }
 0x183   :  { %v6464_v0 = vmax.f32 %v705_v56, 0.0 }
 0x184   :  { %v6466_v16 = vmax.f32 %v704_v60, 0.0 }
 0x185   :  { %894 = vrot.lane.b32.xlu1 %v6464_v0, %s5894_s15  ;;  %952 = vrot.lane.b32.xlu0 %v826_v5, %s5895_s20  ;;  %v829_v1 = vrot.slane %v6464_v0, 1 }
 0x186   :  { %v5306_v22 = vpop.f32.mrb[14].mxu0  ;;  %v827_v31 = vrot.slane %v6466_v16, 1 }
 0x187   :  { %v686_v62 = vmul.f32 %v5306_v22, %v6334_v48  ;;  %v657_v24 = vpop.f32.mrb[15].mxu0 }
 0x188   :  { %v685_v26 = vmul.f32 %v6334_v48, %v657_v24  ;;  %v830_v48 = vsel %vm8388_vm12, %v827_v31, %v829_v1  ;;  %v828_v41 = vsel %vm8395_vm13, %v825_v59, %v827_v31  ;;  %vm8397_vm12 = vmmov %vm8396_vm11  ;;  %v741_v31 = vrot.slane %v6351_v54, 7 }
 0x189   :  { %v707_v27 = vadd.f32 %v6339_v38, %v686_v62  ;;  %950 = vrot.lane.b32.xlu1 %v861_v30, %s5895_s20  ;;  %892 = vrot.lane.b32.xlu0 %v6466_v16, %s5894_s15  ;;  %vm8398_vm13 = vmmov %vm8396_vm11  ;;  %v743_v30 = vrot.slane %v6371_v17, 7 }
 0x18a   :  { %v706_v33 = vadd.f32 %v6339_v38, %v685_v26  ;;  %v863_v38 = vsel %vm6154_vm7, %v828_v41, 0.0  ;;  %vm8409_vm7 = vcmask 195584  }
 0x18b   :  { %v6484_v34 = vmax.f32 %v707_v27, 0.0 }
 0x18c   :  { %v6486_v37 = vmax.f32 %v706_v33, 0.0 }
 0x18d   :  { %8393 = vst [vmem:[#allocation10_spill] sm:$0xff] %v6484_v34  ;;  %898 = vrot.lane.b32.xlu1 %v6484_v34, %s5894_s15  ;;  %956 = vrot.lane.b32.xlu0 %v830_v48, %s5895_s20  ;;  %v833_v44 = vrot.slane %v6484_v34, 1 }
 0x18e   :  { %8394 = vst [vmem:[#allocation11_spill] sm:$0xff] %v6486_v37  ;;  %v831_v43 = vrot.slane %v6486_v37, 1 }
 0x18f   :  { %v851_v7 = vsel %vm8398_vm13, %v833_v44, 0.0  ;;  %vm8401_vm13 = vcmask 130048  }
 0x190   :  { %v832_v45 = vsel %vm8396_vm11, %v829_v1, %v831_v43  ;;  %v834_v53 = vsel %vm8397_vm12, %v831_v43, %v833_v44  ;;  %v867_v56 = vsel %vm6189_vm9, %v851_v7, 0.0  ;;  %vm8399_vm11 = vcmask 1040384  }
 0x191   :  { %954 = vrot.lane.b32.xlu1 %v863_v38, %s5895_s20  ;;  %896 = vrot.lane.b32.xlu0 %v6486_v37, %s5894_s15  ;;  %v865_v51 = vsel %vm6176_vm8, %v832_v45, 0.0  ;;  %v787_v60 = vsel %vm8399_vm11, 0.0, %v740_v57  ;;  %vm8400_vm12 = vcmask 64512   ;;  %vm8402_vm8 = vcmask 195584   ;;  %vm8403_vm9 = vmmov %vm8399_vm11 }
 0x192   :  { %v788_v10 = vsel %vm6201_vm10, %v787_v60, 0.0  ;;  %v744_v33 = vsel %vm8403_vm9, %v741_v31, %v743_v30  ;;  %vm8404_vm11 = vmmov %vm8403_vm9 }
 0x193   :  { %v742_v41 = vsel %vm8404_vm11, %v740_v57, %v741_v31  ;;  %vm8405_vm10 = vmmov %vm8400_vm12  ;;  %v790_v38 = vsel %vm6217_vm14, %v744_v33, 0.0  ;;  %v751_v31 = vrot.slane %v6406_v6, 7 }
 0x194   :  { %vm8410_vm9 = vmmov %vm8409_vm7 }
 0x195   :  { %958 = vrot.lane.b32.xlu1 %v865_v51, %s5895_s20  ;;  %960 = vrot.lane.b32.xlu0 %v834_v53, %s5895_s20  ;;  %v747_v51 = vrot.slane %v6386_v2, 7 }
 0x199   :  { %962 = vrot.lane.b32.xlu1 %v867_v56, %s5895_s20 }
 0x1ca   :  { %v871_v5 = vpop.permute.xlu1 %870 }
 0x1cb   :  { %v869_v59 = vpop.permute.xlu0 %868  ;;  %v981_v43 = vsel %vm8405_vm10, %v742_v41, %v871_v5 }
 0x1cc   :  { %v980_v22 = vsel %vm8400_vm12, %v788_v10, %v869_v59  ;;  %vm8406_vm12 = vmmov %vm8405_vm10  ;;  %v745_v59 = vrot.slane %v6368_v61, 7 }
 0x1cd   :  { %vm8411_vm10 = vmmov %vm8404_vm11 }
 0x1ce   :  { %v748_v60 = vsel %vm8411_vm10, %v745_v59, %v747_v51  ;;  %vm8412_vm11 = vmmov %vm8411_vm10 }
 0x1cf   :  { %v933_v62 = vpop.permute.xlu0 %932  ;;  %v875_v26 = vpop.permute.xlu1 %874  ;;  %v746_v10 = vsel %vm8412_vm11, %v743_v30, %v745_v59  ;;  %vm8416_vm10 = vmmov %vm8410_vm9  ;;  %v755_v59 = vrot.slane %v6426_v15, 7 }
 0x1d0   :  { %v996_v24 = vsel %vm8401_vm13, %v980_v22, %v933_v62  ;;  %v983_v22 = vsel %vm8406_vm12, %v746_v10, %v875_v26  ;;  %v792_v62 = vsel %vm6237_vm15, %v748_v60, 0.0  ;;  %vm8418_vm15 = vnez %v8378_v8 }
 0x1d1   :  { %5313 = vmatprep.mubr.msk.f32.mxu1 %vm8402_vm8, %v996_v24  ;;  %vm8407_vm8 = vmmov %vm8401_vm13 }
 0x1d2   :  { %vm8408_vm13 = vmmov %vm8407_vm8 }
 0x1d3   :  { %v873_v27 = vpop.permute.xlu0 %872 }
 0x1d4   :  { %v982_v45 = vsel %vm8406_vm12, %v790_v38, %v873_v27 }
 0x1d7   :  { %v879_v1 = vpop.permute.xlu1 %878  ;;  %v937_v48 = vpop.permute.xlu0 %936 }
 0x1d8   :  { %v998_v56 = vsel %vm8408_vm13, %v982_v45, %v937_v48 }
 0x1db   :  { %v935_v44 = vpop.permute.xlu1 %934  ;;  %v877_v7 = vpop.permute.xlu0 %876 }
 0x1dc   :  { %v997_v53 = vsel %vm8407_vm8, %v981_v43, %v935_v44  ;;  %vm8413_vm8 = vmmov %vm8406_vm12  ;;  %v749_v43 = vrot.slane %v6384_v28, 7 }
 0x1dd   :  { %5314 = vmatmul.mubr.msk.f32.vlgmr.msra.gmra.mrb[0].mxu1 %vm8409_vm7, %v997_v53  ;;  %v984_v27 = vsel %vm8413_vm8, %v792_v62, %v877_v7  ;;  %vm8414_vm7 = vmmov %vm8408_vm13 }
 0x1de   :  { %5316 = vmatprep.mubr.msk.f32.mxu1 %vm8410_vm9, %v998_v56  ;;  %vm8415_vm13 = vmmov %vm8414_vm7  ;;  %v752_v30 = vsel %vm8412_vm11, %v749_v43, %v751_v31 }
 0x1df   :  { %v883_v57 = vpop.permute.xlu1 %882  ;;  %v941_v5 = vpop.permute.xlu0 %940  ;;  %vm8417_vm12 = vmmov %vm8412_vm11  ;;  %v794_v53 = vsel %vm8418_vm15, %v752_v30, 0.0  ;;  %vm8423_vm15 = vnez %v8380_v29 }
 0x1e0   :  { %v1000_v41 = vsel %vm8415_vm13, %v984_v27, %v941_v5  ;;  %v750_v44 = vsel %vm8417_vm12, %v747_v51, %v749_v43  ;;  %vm8421_vm11 = vmmov %vm8416_vm10  ;;  %v759_v43 = vrot.slane %v6446_v50, 7 }
 0x1e1   :  { %v985_v45 = vsel %vm8413_vm8, %v750_v44, %v879_v1 }
 0x1e3   :  { %v939_v24 = vpop.permute.xlu1 %938  ;;  %v881_v48 = vpop.permute.xlu0 %880 }
 0x1e4   :  { %v999_v33 = vsel %vm8414_vm7, %v983_v22, %v939_v24  ;;  %vm8419_vm7 = vmmov %vm8413_vm8  ;;  %v753_v22 = vrot.slane %v6404_v47, 7 }
 0x1e5   :  { %5317 = vmatmul.mubr.msk.f32.gmra.mrb[2].mxu1 %vm8410_vm9, %v999_v33  ;;  %v986_v56 = vsel %vm8419_vm7, %v794_v53, %v881_v48  ;;  %vm8420_vm9 = vmmov %vm8415_vm13 }
 0x1e6   :  { %5319 = vmatprep.mubr.msk.f32.mxu1 %vm8416_vm10, %v1000_v41  ;;  %v756_v51 = vsel %vm8417_vm12, %v753_v22, %v755_v59  ;;  %vm8422_vm8 = vmmov %vm8417_vm12 }
 0x1e7   :  { %v887_v26 = vpop.permute.xlu1 %886  ;;  %v945_v38 = vpop.permute.xlu0 %944  ;;  %v754_v24 = vsel %vm8422_vm8, %v751_v31, %v753_v22  ;;  %v796_v33 = vsel %vm8423_vm15, %v756_v51, 0.0  ;;  %vm8426_vm12 = vmmov %vm8421_vm11  ;;  %vm8428_vm15 = vnez %v8382_v46  ;;  %v763_v22 = vrot.slane %v6466_v16, 7 }
 0x1e8   :  { %v1002_v10 = vsel %vm8420_vm9, %v986_v56, %v945_v38  ;;  %v987_v27 = vsel %vm8419_vm7, %v754_v24, %v883_v57 }
 0x1eb   :  { %v943_v7 = vpop.permute.xlu1 %942  ;;  %v885_v5 = vpop.permute.xlu0 %884 }
 0x1ec   :  { %v1001_v60 = vsel %vm8415_vm13, %v985_v45, %v943_v7  ;;  %vm8424_vm13 = vmmov %vm8419_vm7  ;;  %v757_v45 = vrot.slane %v6424_v11, 7 }
 0x1ed   :  { %5320 = vmatmul.mubr.msk.f32.gmra.mrb[4].mxu1 %vm8416_vm10, %v1001_v60  ;;  %v988_v41 = vsel %vm8424_vm13, %v796_v33, %v885_v5  ;;  %vm8425_vm10 = vmmov %vm8420_vm9 }
 0x1ee   :  { %5322 = vmatprep.mubr.msk.f32.mxu1 %vm8421_vm11, %v1002_v10  ;;  %v760_v31 = vsel %vm8422_vm8, %v757_v45, %v759_v43  ;;  %vm8427_vm7 = vmmov %vm8422_vm8 }
 0x1ef   :  { %v891_v1 = vpop.permute.xlu1 %890  ;;  %v949_v62 = vpop.permute.xlu0 %948  ;;  %v758_v7 = vsel %vm8427_vm7, %v755_v59, %v757_v45  ;;  %v798_v60 = vsel %vm8428_vm15, %v760_v31, 0.0  ;;  %vm8431_vm8 = vmmov %vm8426_vm12 }
 0x1f0   :  { %v1004_v44 = vsel %vm8425_vm10, %v988_v41, %v949_v62  ;;  %v989_v56 = vsel %vm8424_vm13, %v758_v7, %v887_v26 }
 0x1f3   :  { %v947_v48 = vpop.permute.xlu1 %946  ;;  %v889_v38 = vpop.permute.xlu0 %888 }
 0x1f4   :  { %v1003_v30 = vsel %vm8420_vm9, %v987_v27, %v947_v48  ;;  %vm8429_vm9 = vmmov %vm8424_vm13  ;;  %v761_v27 = vrot.slane %v6444_v3, 7  ;;  %v767_v48 = vrot.slane %v6486_v37, 7 }
 0x1f5   :  { %5323 = vmatmul.mubr.msk.f32.gmra.mrb[6].mxu1 %vm8421_vm11, %v1003_v30  ;;  %v990_v10 = vsel %vm8429_vm9, %v798_v60, %v889_v38  ;;  %vm8430_vm11 = vmmov %vm8425_vm10  ;;  %v765_v30 = vrot.slane %v6464_v0, 7 }
 0x1f6   :  { %5325 = vmatprep.mubr.msk.f32.mxu1 %vm8426_vm12, %v1004_v44  ;;  %v764_v59 = vsel %vm8427_vm7, %v761_v27, %v763_v22  ;;  %vm8432_vm13 = vmmov %vm8427_vm7 }
 0x1f7   :  { %v895_v57 = vpop.permute.xlu1 %894  ;;  %v953_v53 = vpop.permute.xlu0 %952  ;;  %v762_v41 = vsel %vm8432_vm13, %v759_v43, %v761_v27  ;;  %v800_v44 = vsel %vm6300_vm0, %v764_v59, 0.0 }
 0x1f8   :  { %v1006_v24 = vsel %vm8430_vm11, %v990_v10, %v953_v53  ;;  %v991_v38 = vsel %vm8429_vm9, %v762_v41, %v891_v1 }
 0x1fb   :  { %v951_v5 = vpop.permute.xlu1 %950  ;;  %v893_v62 = vpop.permute.xlu0 %892 }
 0x1fc   :  { %v1005_v51 = vsel %vm8425_vm10, %v989_v56, %v951_v5  ;;  %vm8433_vm10 = vmmov %vm8429_vm9  ;;  %v769_v5 = vrot.slane %v6484_v34, 7 }
 0x1fd   :  { %5326 = vmatmul.mubr.msk.f32.gmra.mrb[8].mxu1 %vm8426_vm12, %v1005_v51  ;;  %v992_v31 = vsel %vm8433_vm10, %v800_v44, %v893_v62  ;;  %vm8434_vm12 = vmmov %vm8427_vm7  ;;  %vm8436_vm7 = vcmask 195584  }
 0x1fe   :  { %5328 = vmatprep.mubr.msk.f32.mxu1 %vm8431_vm8, %v1006_v24  ;;  %v768_v56 = vsel %vm8434_vm12, %v765_v30, %v767_v48  ;;  %vm8435_vm8 = vmmov %vm8430_vm11 }
 0x1ff   :  { %v899_v26 = vpop.permute.xlu1 %898  ;;  %v957_v33 = vpop.permute.xlu0 %956  ;;  %vm8437_vm13 = vmmov %vm8434_vm12  ;;  %v802_v10 = vsel %vm6315_vm4, %v768_v56, 0.0 }
 0x200   :  { %v1008_v60 = vsel %vm8435_vm8, %v992_v31, %v957_v33  ;;  %v766_v43 = vsel %vm8437_vm13, %v763_v22, %v765_v30  ;;  %vm8438_vm9 = vmmov %vm8436_vm7  ;;  %v1554_v30 = vld [vmem:[%s8281_s1 + $0x30] sm:$0xff] }
 0x201   :  { %vm8439_vm15 = vmmov %vm8433_vm10 }
 0x202   :  { %v993_v1 = vsel %vm8439_vm15, %v766_v43, %v895_v57  ;;  %vm8441_vm12 = vmmov %vm8435_vm8 }
 0x203   :  { %v955_v45 = vpop.permute.xlu1 %954  ;;  %v897_v7 = vpop.permute.xlu0 %896 }
 0x204   :  { %v1007_v53 = vsel %vm8430_vm11, %v991_v38, %v955_v45  ;;  %v994_v62 = vsel %vm8433_vm10, %v802_v10, %v897_v7  ;;  %vm8440_vm11 = vmmov %vm8435_vm8  ;;  %v1555_v38 = vld [vmem:[%s8281_s1 + $0x38] sm:$0xff]  ;;  %v6620_v45 = vld [vmem:[%s8283_s3 + $0x1] ss:$0 sm:$0xff] }
 0x205   :  { %5329 = vmatmul.mubr.msk.f32.gmra.mrb[10].mxu1 %vm8436_vm7, %v1007_v53  ;;  %vm8442_vm8 = vmmov %vm8436_vm7  ;;  %v5637_v44 = vpack.c.bf16 %v1555_v38, %v1554_v30 }
 0x206   :  { %5331 = vmatprep.mubr.msk.f32.mxu1 %vm8438_vm9, %v1008_v60  ;;  %vm8443_vm7 = vmmov %vm8437_vm13 }
 0x207   :  { %v959_v51 = vpop.permute.xlu1 %958  ;;  %v961_v24 = vpop.permute.xlu0 %960  ;;  %v770_v22 = vsel %vm8443_vm7, %v767_v48, %v769_v5  ;;  %vm8444_vm13 = vmmov %vm8442_vm8  ;;  %5638 = vmatprep.subr.bf16.mxu0 %v5637_v44 }
 0x208   :  { %v1009_v27 = vsel %vm8440_vm11, %v993_v1, %v959_v51  ;;  %v1010_v59 = vsel %vm8441_vm12, %v994_v62, %v961_v24  ;;  %vm8445_vm9 = vmmov %vm8433_vm10  ;;  %5640 = vmatpush3.bf16.msra.mxu0 %v5637_v44  ;;  %v1556_v51 = vld [vmem:[%s8281_s1 + $0x40] sm:$0xff] }
 0x209   :  { %5332 = vmatmul.mubr.msk.f32.gmra.mrb[12].mxu1 %vm8442_vm8, %v1009_v27  ;;  %v995_v33 = vsel %vm8445_vm9, %v770_v22, %v899_v26  ;;  %vm8446_vm15 = vmmov %vm8440_vm11  ;;  %v6615_v26 = vld [vmem:[%s8282_s2 + $0x1] ss:$0 sm:$0xff]  ;;  %5341 = vmatprep.subr.mxu0 %v1556_v51 }
 0x20a   :  { %5334 = vmatprep.mubr.msk.f32.mxu1 %vm8444_vm13, %v1010_v59  ;;  %vm8447_vm4 = vmmov %vm8442_vm8 }
 0x20b   :  { %v963_v57 = vpop.permute.xlu1 %962  ;;  %vm8449_vm10 = vmmov %vm8443_vm7 }
 0x20c   :  { %v1011_v41 = vsel %vm8446_vm15, %v995_v33, %v963_v57  ;;  %5342 = vmatpush3.msra.mxu0 %v1556_v51  ;;  %vm8452_vm8 = vmmov %vm8443_vm7 }
 0x20d   :  { %5335 = vmatmul.mubr.msk.f32.gmra.mrb[14].mxu1 %vm8447_vm4, %v1011_v41  ;;  %vm8448_vm4 = vcmask 1046528   ;;  %vm8455_vm15 = vmmov %vm8443_vm7 }
 0x20e   :  { %vm8450_vm11 = vmmov %vm8448_vm4 }
 0x20f   :  { %vm8451_vm12 = vmmov %vm8448_vm4 }
 0x210   :  { %vm8453_vm13 = vmmov %vm8448_vm4 }
 0x211   :  { %vm8454_vm9 = vmmov %vm8448_vm4 }
 0x2b0   :  { %v5315_v48 = vpop.f32.mrb[0].mxu1 }
 0x2b1   :  { %v1214_v31 = vmul.f32 %v5315_v48, %v6615_v26  ;;  %v1129_v53 = vpop.f32.mrb[1].mxu1 }
 0x2b2   :  { %v1213_v7 = vmul.f32 %v6615_v26, %v1129_v53 }
 0x2b3   :  { %v1235_v56 = vadd.f32 %v6620_v45, %v1214_v31 }
 0x2b4   :  { %v1234_v60 = vadd.f32 %v6620_v45, %v1213_v7 }
 0x2b5   :  { %v1251_v43 = vmax.f32 %v1235_v56, 0.0 }
 0x2b6   :  { %v6626_v5 = vmax.f32 %v1234_v60, 0.0 }
 0x2b7   :  { %v1283_v1 = vrot.slane %v1251_v43, 7  ;;  %1412 = vrot.lane.b32.xlu1 %v1251_v43, %s5894_s15  ;;  %v1347_v10 = vrot.slane %v1251_v43, 1 }
 0x2b8   :  { %v8313_v62 = vrot.slane %v6626_v5, 7  ;;  %v5318_v24 = vpop.f32.mrb[2].mxu1  ;;  %1410 = vrot.lane.b32.xlu0 %v6626_v5, %s5894_s15  ;;  %v1346_v27 = vrot.slane %v6626_v5, 1 }
 0x2b9   :  { %v1216_v59 = vmul.f32 %v5318_v24, %v6615_v26  ;;  %v1139_v22 = vpop.f32.mrb[3].mxu1 }
 0x2ba   :  { %v1215_v33 = vmul.f32 %v6615_v26, %v1139_v22  ;;  %v1348_v57 = vsel %vm8448_vm4, %v1346_v27, %v1347_v10  ;;  %v6642_v41 = vsel %vm8449_vm10, %v8313_v62, %v1283_v1  ;;  %vm8456_vm4 = vmmov %vm8443_vm7 }
 0x2bb   :  { %v1237_v30 = vadd.f32 %v6620_v45, %v1216_v59  ;;  %vm8457_vm10 = vmmov %vm8454_vm9 }
 0x2bc   :  { %v1236_v38 = vadd.f32 %v6620_v45, %v1215_v33  ;;  %1474 = vrot.lane.b32.xlu0 %v1348_v57, %s5895_s20 }
 0x2bd   :  { %v1253_v44 = vmax.f32 %v1237_v30, 0.0 }
 0x2be   :  { %v1252_v48 = vmax.f32 %v1236_v38, 0.0 }
 0x2bf   :  { %v1287_v31 = vrot.slane %v1253_v44, 7  ;;  %1416 = vrot.lane.b32.xlu1 %v1253_v44, %s5894_s15  ;;  %v1351_v53 = vrot.slane %v1253_v44, 1 }
 0x2c0   :  { %v1285_v7 = vrot.slane %v1252_v48, 7  ;;  %v5321_v56 = vpop.f32.mrb[4].mxu1  ;;  %1414 = vrot.lane.b32.xlu0 %v1252_v48, %s5894_s15  ;;  %v1349_v60 = vrot.slane %v1252_v48, 1 }
 0x2c1   :  { %v1218_v43 = vmul.f32 %v5321_v56, %v6615_v26  ;;  %v1149_v51 = vpop.f32.mrb[5].mxu1 }
 0x2c2   :  { %v1217_v24 = vmul.f32 %v6615_v26, %v1149_v51  ;;  %v1352_v27 = vsel %vm8450_vm11, %v1349_v60, %v1351_v53  ;;  %v1350_v59 = vsel %vm8451_vm12, %v1347_v10, %v1349_v60  ;;  %v6654_v22 = vsel %vm8452_vm8, %v1285_v7, %v1287_v31  ;;  %vm8458_vm11 = vmmov %vm8454_vm9 }
 0x2c3   :  { %v1239_v33 = vadd.f32 %v6620_v45, %v1218_v43  ;;  %v6658_v57 = vsel %vm8443_vm7, %v1283_v1, %v1285_v7  ;;  %v1395_v1 = vsel %vm6000_vm1, %v1350_v59, 0.0  ;;  %vm8459_vm12 = vmmov %vm8456_vm4 }
 0x2c4   :  { %v1238_v30 = vadd.f32 %v6620_v45, %v1217_v24  ;;  %1478 = vrot.lane.b32.xlu0 %v1352_v27, %s5895_s20  ;;  %vm8460_vm8 = vmmov %vm8456_vm4 }
 0x2c5   :  { %v1255_v38 = vmax.f32 %v1239_v33, 0.0  ;;  %vm8461_vm7 = vmmov %vm8454_vm9 }
 0x2c6   :  { %v1254_v44 = vmax.f32 %v1238_v30, 0.0 }
 0x2c7   :  { %v1291_v48 = vrot.slane %v1255_v38, 7  ;;  %1420 = vrot.lane.b32.xlu1 %v1255_v38, %s5894_s15  ;;  %v1355_v56 = vrot.slane %v1255_v38, 1 }
 0x2c8   :  { %v1289_v51 = vrot.slane %v1254_v44, 7  ;;  %v5324_v10 = vpop.f32.mrb[6].mxu1  ;;  %1418 = vrot.lane.b32.xlu0 %v1254_v44, %s5894_s15  ;;  %v1353_v60 = vrot.slane %v1254_v44, 1 }
 0x2c9   :  { %v1220_v43 = vmul.f32 %v5324_v10, %v6615_v26  ;;  %v1159_v62 = vpop.f32.mrb[7].mxu1 }
 0x2ca   :  { %v1219_v7 = vmul.f32 %v6615_v26, %v1159_v62  ;;  %v1356_v24 = vsel %vm8453_vm13, %v1353_v60, %v1355_v56  ;;  %v1354_v27 = vsel %vm8454_vm9, %v1351_v53, %v1353_v60  ;;  %v6671_v33 = vsel %vm8455_vm15, %v1289_v51, %v1291_v48  ;;  %vm8462_vm13 = vmmov %vm8461_vm7 }
 0x2cb   :  { %v1241_v30 = vadd.f32 %v6620_v45, %v1220_v43  ;;  %1476 = vrot.lane.b32.xlu1 %v1395_v1, %s5895_s20  ;;  %v6676_v38 = vsel %vm8456_vm4, %v1287_v31, %v1289_v51  ;;  %v1397_v31 = vsel %vm6004_vm2, %v1354_v27, 0.0  ;;  %vm8463_vm9 = vmmov %vm8456_vm4 }
 0x2cc   :  { %v1240_v44 = vadd.f32 %v6620_v45, %v1219_v7  ;;  %1482 = vrot.lane.b32.xlu0 %v1356_v24, %s5895_s20  ;;  %vm8464_vm15 = vmmov %vm8456_vm4 }
 0x2cd   :  { %v1257_v59 = vmax.f32 %v1241_v30, 0.0  ;;  %vm8465_vm4 = vmmov %vm8461_vm7 }
 0x2ce   :  { %v1256_v62 = vmax.f32 %v1240_v44, 0.0 }
 0x2cf   :  { %v1295_v10 = vrot.slane %v1257_v59, 7  ;;  %1424 = vrot.lane.b32.xlu1 %v1257_v59, %s5894_s15  ;;  %v1359_v53 = vrot.slane %v1257_v59, 1 }
 0x2d0   :  { %v1293_v60 = vrot.slane %v1256_v62, 7  ;;  %v5327_v52 = vpop.f32.mrb[8].mxu1  ;;  %1422 = vrot.lane.b32.xlu0 %v1256_v62, %s5894_s15  ;;  %v1357_v43 = vrot.slane %v1256_v62, 1 }
 0x2d1   :  { %v1222_v1 = vmul.f32 %v5327_v52, %v6615_v26  ;;  %v1169_v35 = vpop.f32.mrb[9].mxu1 }
 0x2d2   :  { %v1221_v51 = vmul.f32 %v6615_v26, %v1169_v35  ;;  %v1360_v7 = vsel %vm8457_vm10, %v1357_v43, %v1359_v53  ;;  %v1358_v24 = vsel %vm8458_vm11, %v1355_v56, %v1357_v43  ;;  %v6689_v30 = vsel %vm8459_vm12, %v1293_v60, %v1295_v10  ;;  %vm8466_vm10 = vmmov %vm8465_vm4 }
 0x2d3   :  { %v1243_v44 = vadd.f32 %v6620_v45, %v1222_v1  ;;  %1480 = vrot.lane.b32.xlu1 %v1397_v31, %s5895_s20  ;;  %v6694_v59 = vsel %vm8460_vm8, %v1291_v48, %v1293_v60  ;;  %v1399_v48 = vsel %vm6042_vm3, %v1358_v24, 0.0  ;;  %vm8467_vm11 = vmmov %vm8460_vm8 }
 0x2d4   :  { %v1242_v52 = vadd.f32 %v6620_v45, %v1221_v51  ;;  %1486 = vrot.lane.b32.xlu0 %v1360_v7, %s5895_s20  ;;  %vm8468_vm12 = vmmov %vm8460_vm8 }
 0x2d5   :  { %v1259_v27 = vmax.f32 %v1243_v44, 0.0  ;;  %vm8469_vm8 = vmmov %vm8465_vm4 }
 0x2d6   :  { %v1258_v35 = vmax.f32 %v1242_v52, 0.0 }
 0x2d7   :  { %v1299_v62 = vrot.slane %v1259_v27, 7  ;;  %1428 = vrot.lane.b32.xlu1 %v1259_v27, %s5894_s15  ;;  %v1363_v56 = vrot.slane %v1259_v27, 1 }
 0x2d8   :  { %v1297_v43 = vrot.slane %v1258_v35, 7  ;;  %v5330_v21 = vpop.f32.mrb[10].mxu1  ;;  %1426 = vrot.lane.b32.xlu0 %v1258_v35, %s5894_s15  ;;  %v1361_v1 = vrot.slane %v1258_v35, 1 }
 0x2d9   :  { %v1224_v31 = vmul.f32 %v5330_v21, %v6615_v26  ;;  %v1179_v13 = vpop.f32.mrb[11].mxu1 }
 0x2da   :  { %v1223_v60 = vmul.f32 %v6615_v26, %v1179_v13  ;;  %v1364_v51 = vsel %vm8461_vm7, %v1361_v1, %v1363_v56  ;;  %v1362_v7 = vsel %vm8462_vm13, %v1359_v53, %v1361_v1  ;;  %v6707_v44 = vsel %vm8463_vm9, %v1297_v43, %v1299_v62  ;;  %vm8470_vm7 = vmmov %vm8465_vm4 }
 0x2db   :  { %v1245_v52 = vadd.f32 %v6620_v45, %v1224_v31  ;;  %1484 = vrot.lane.b32.xlu1 %v1399_v48, %s5895_s20  ;;  %v6712_v27 = vsel %vm8464_vm15, %v1295_v10, %v1297_v43  ;;  %vm8471_vm13 = vmmov %vm8463_vm9 }
 0x2dc   :  { %v1244_v21 = vadd.f32 %v6620_v45, %v1223_v60  ;;  %1490 = vrot.lane.b32.xlu0 %v1364_v51, %s5895_s20  ;;  %v5333_v24 = vpop.f32.mrb[12].mxu1  ;;  %vm8472_vm15 = vmmov %vm8465_vm4 }
 0x2dd   :  { %v1261_v13 = vmax.f32 %v1245_v52, 0.0  ;;  %v1226_v35 = vmul.f32 %v5333_v24, %v6615_v26  ;;  %v1189_v32 = vpop.f32.mrb[13].mxu1 }
 0x2de   :  { %v1260_v53 = vmax.f32 %v1244_v21, 0.0  ;;  %v1225_v1 = vmul.f32 %v6615_v26, %v1189_v32  ;;  %v1401_v32 = vsel %vm6081_vm5, %v1362_v7, 0.0 }
 0x2df   :  { %v1247_v12 = vadd.f32 %v6620_v45, %v1226_v35  ;;  %1432 = vrot.lane.b32.xlu1 %v1261_v13, %s5894_s15  ;;  %v1367_v31 = vrot.slane %v1261_v13, 1  ;;  %v1303_v48 = vrot.slane %v1261_v13, 7 }
 0x2e0   :  { %v1301_v10 = vrot.slane %v1260_v53, 7  ;;  %v1246_v43 = vadd.f32 %v6620_v45, %v1225_v1  ;;  %1430 = vrot.lane.b32.xlu0 %v1260_v53, %s5894_s15  ;;  %v5336_v60 = vpop.f32.mrb[14].mxu1  ;;  %v1365_v51 = vrot.slane %v1260_v53, 1 }
 0x2e1   :  { %v1263_v52 = vmax.f32 %v1247_v12, 0.0  ;;  %v1228_v24 = vmul.f32 %v5336_v60, %v6615_v26  ;;  %v1199_v20 = vpop.f32.mrb[15].mxu1 }
 0x2e2   :  { %v1262_v21 = vmax.f32 %v1246_v43, 0.0  ;;  %v1227_v35 = vmul.f32 %v6615_v26, %v1199_v20  ;;  %v1368_v9 = vsel %vm8465_vm4, %v1365_v51, %v1367_v31  ;;  %v1366_v13 = vsel %vm8466_vm10, %v1363_v56, %v1365_v51  ;;  %vm8473_vm10 = vmmov %vm8463_vm9 }
 0x2e3   :  { %v1307_v37 = vrot.slane %v1263_v52, 7  ;;  %v1249_v1 = vadd.f32 %v6620_v45, %v1228_v24  ;;  %1488 = vrot.lane.b32.xlu1 %v1401_v32, %s5895_s20  ;;  %v1371_v53 = vrot.slane %v1263_v52, 1  ;;  %v6733_v7 = vsel %vm8467_vm11, %v1301_v10, %v1303_v48  ;;  %vm8474_vm11 = vmmov %vm8463_vm9 }
 0x2e4   :  { %v1305_v12 = vrot.slane %v1262_v21, 7  ;;  %v1248_v60 = vadd.f32 %v6620_v45, %v1227_v35  ;;  %1494 = vrot.lane.b32.xlu0 %v1368_v9, %s5895_s20  ;;  %v1369_v34 = vrot.slane %v1262_v21, 1  ;;  %v6736_v26 = vsel %vm8468_vm12, %v1299_v62, %v1301_v10 }
 0x2e5   :  { %v1265_v20 = vmax.f32 %v1249_v1, 0.0  ;;  %v1403_v62 = vsel %vm6129_vm6, %v1366_v13, 0.0  ;;  %vm8475_vm12 = vnez %v8363_v39 }
 0x2e6   :  { %v1264_v56 = vmax.f32 %v1248_v60, 0.0  ;;  %v1372_v43 = vsel %vm8469_vm8, %v1369_v34, %v1371_v53  ;;  %v1370_v51 = vsel %vm8470_vm7, %v1367_v31, %v1369_v34  ;;  %v6742_v45 = vsel %vm8471_vm13, %v1305_v12, %v1307_v37  ;;  %vm8477_vm7 = vmmov %vm8465_vm4 }
 0x2e7   :  { %v1311_v24 = vrot.slane %v1265_v20, 7  ;;  %1436 = vrot.lane.b32.xlu1 %v1263_v52, %s5894_s15  ;;  %v1375_v32 = vrot.slane %v1265_v20, 1  ;;  %v6746_v1 = vsel %vm8463_vm9, %v1303_v48, %v1305_v12  ;;  %v1405_v48 = vsel %vm8475_vm12, %v1370_v51, 0.0 }
 0x2e8   :  { %v1309_v9 = vrot.slane %v1264_v56, 7  ;;  %1434 = vrot.lane.b32.xlu0 %v1262_v21, %s5894_s15  ;;  %v1373_v35 = vrot.slane %v1264_v56, 1  ;;  %vm8476_vm8 = vnez %v8365_v55  ;;  %vm8478_vm13 = vnez %v8367_v4 }
 0x2ea   :  { %v1376_v10 = vsel %vm8472_vm15, %v1373_v35, %v1375_v32  ;;  %v1374_v34 = vsel %vm8465_vm4, %v1371_v53, %v1373_v35  ;;  %v6753_v31 = vsel %vm8473_vm10, %v1309_v9, %v1311_v24  ;;  %v6757_v52 = vsel %vm8474_vm11, %v1307_v37, %v1309_v9 }
 0x2eb   :  { %1492 = vrot.lane.b32.xlu1 %v1403_v62, %s5895_s20  ;;  %v1407_v21 = vsel %vm8476_vm8, %v1374_v34, 0.0  ;;  %v1393_v37 = vsel %vm8477_vm7, %v1375_v32, 0.0  ;;  %v8479_v53 = vrot.slane %v6626_v5, 7  ;;  %vm8480_vm15 = vnez %v8369_v14 }
 0x2ec   :  { %1498 = vrot.lane.b32.xlu0 %v1372_v43, %s5895_s20  ;;  %v1409_v13 = vsel %vm8478_vm13, %v1393_v37, 0.0  ;;  %vm8481_vm4 = vcmask 64512   ;;  %vm8482_vm10 = vcmask 130048   ;;  %vm8483_vm11 = vcmask 195584  }
 0x2ed   :  { %v1329_v12 = vsel %vm8463_vm9, 0.0, %v8479_v53  ;;  %vm8484_vm7 = vmmov %vm8481_vm4  ;;  %v1332_v34 = vsel %vm6217_vm14, %v6658_v57, 0.0  ;;  %vm8489_vm14 = vnez %v8375_v49 }
 0x2ee   :  { %vm8485_vm9 = vmmov %vm8481_vm4  ;;  %v1334_v57 = vsel %vm8489_vm14, %v6676_v38, 0.0  ;;  %vm8493_vm14 = vnez %v8378_v8 }
 0x2ef   :  { %1440 = vrot.lane.b32.xlu1 %v1265_v20, %s5894_s15  ;;  %v1330_v20 = vsel %vm8480_vm15, %v1329_v12, 0.0  ;;  %vm8488_vm15 = vmmov %vm8483_vm11  ;;  %v1336_v38 = vsel %vm8493_vm14, %v6694_v59, 0.0  ;;  %vm8497_vm14 = vnez %v8380_v29 }
 0x2f0   :  { %1438 = vrot.lane.b32.xlu0 %v1264_v56, %s5894_s15  ;;  %v1338_v59 = vsel %vm8497_vm14, %v6712_v27, 0.0  ;;  %vm8501_vm14 = vnez %v8382_v46 }
 0x2f1   :  { %v1340_v27 = vsel %vm8501_vm14, %v6736_v26, 0.0  ;;  %v1342_v26 = vsel %vm6300_vm0, %v6746_v1, 0.0 }
 0x2f3   :  { %1496 = vrot.lane.b32.xlu1 %v1405_v48, %s5895_s20 }
 0x2f4   :  { %1502 = vrot.lane.b32.xlu0 %v1376_v10, %s5895_s20 }
 0x2f7   :  { %1500 = vrot.lane.b32.xlu1 %v1407_v21, %s5895_s20 }
 0x2fb   :  { %1504 = vrot.lane.b32.xlu1 %v1409_v13, %s5895_s20 }
 0x329   :  { %v1413_v24 = vpop.permute.xlu1 %1412 }
 0x32a   :  { %v1411_v60 = vpop.permute.xlu0 %1410  ;;  %v1523_v5 = vsel %vm8484_vm7, %v6642_v41, %v1413_v24 }
 0x32b   :  { %v1522_v56 = vsel %vm8481_vm4, %v1330_v20, %v1411_v60  ;;  %vm8486_vm4 = vmmov %vm8482_vm10 }
 0x32c   :  { %vm8506_vm14 = vmmov %vm8486_vm4 }
 0x32e   :  { %v1475_v43 = vpop.permute.xlu0 %1474 }
 0x32f   :  { %v1538_v51 = vsel %vm8482_vm10, %v1522_v56, %v1475_v43  ;;  %vm8487_vm10 = vmmov %vm8486_vm4 }
 0x330   :  { %5343 = vmatprep.mubr.msk.f32.mxu0 %vm8483_vm11, %v1538_v51 }
 0x331   :  { %v1417_v9 = vpop.permute.xlu1 %1416 }
 0x332   :  { %v1415_v32 = vpop.permute.xlu0 %1414  ;;  %v1525_v41 = vsel %vm8484_vm7, %v6654_v22, %v1417_v9 }
 0x333   :  { %v1524_v21 = vsel %vm8485_vm9, %v1332_v34, %v1415_v32  ;;  %vm8490_vm9 = vmmov %vm8484_vm7 }
 0x336   :  { %v1479_v35 = vpop.permute.xlu0 %1478 }
 0x337   :  { %v1540_v53 = vsel %vm8487_vm10, %v1524_v21, %v1479_v35  ;;  %vm8491_vm10 = vmmov %vm8486_vm4 }
 0x339   :  { %v1421_v62 = vpop.permute.xlu1 %1420 }
 0x33a   :  { %v1419_v10 = vpop.permute.xlu0 %1418  ;;  %v1527_v22 = vsel %vm8484_vm7, %v6671_v33, %v1421_v62 }
 0x33b   :  { %v1526_v56 = vsel %vm8490_vm9, %v1334_v57, %v1419_v10  ;;  %vm8494_vm9 = vmmov %vm8484_vm7 }
 0x33d   :  { %v1477_v48 = vpop.permute.xlu1 %1476 }
 0x33e   :  { %v1539_v37 = vsel %vm8486_vm4, %v1523_v5, %v1477_v48  ;;  %v1483_v13 = vpop.permute.xlu0 %1482 }
 0x33f   :  { %5344 = vmatmul.mubr.msk.f32.vlgmr.msra.gmra.mrb[16].mxu0 %vm8483_vm11, %v1539_v37  ;;  %v1542_v24 = vsel %vm8491_vm10, %v1526_v56, %v1483_v13  ;;  %vm8495_vm10 = vmmov %vm8486_vm4 }
 0x340   :  { %5346 = vmatprep.mubr.msk.f32.mxu0 %vm8488_vm15, %v1540_v53  ;;  %vm8492_vm15 = vmmov %vm8483_vm11 }
 0x341   :  { %v1425_v12 = vpop.permute.xlu1 %1424 }
 0x342   :  { %v1423_v60 = vpop.permute.xlu0 %1422  ;;  %v1529_v33 = vsel %vm8484_vm7, %v6689_v30, %v1425_v12 }
 0x343   :  { %v1528_v10 = vsel %vm8494_vm9, %v1336_v38, %v1423_v60  ;;  %vm8498_vm9 = vmmov %vm8484_vm7 }
 0x345   :  { %v1481_v20 = vpop.permute.xlu1 %1480 }
 0x346   :  { %v1541_v43 = vsel %vm8486_vm4, %v1525_v41, %v1481_v20  ;;  %v1487_v51 = vpop.permute.xlu0 %1486 }
 0x347   :  { %5347 = vmatmul.mubr.msk.f32.gmra.mrb[18].mxu0 %vm8483_vm11, %v1541_v43  ;;  %v1544_v48 = vsel %vm8495_vm10, %v1528_v10, %v1487_v51  ;;  %vm8499_vm10 = vmmov %vm8486_vm4 }
 0x348   :  { %5349 = vmatprep.mubr.msk.f32.mxu0 %vm8492_vm15, %v1542_v24  ;;  %vm8496_vm15 = vmmov %vm8483_vm11 }
 0x349   :  { %v1429_v32 = vpop.permute.xlu1 %1428 }
 0x34a   :  { %v1427_v35 = vpop.permute.xlu0 %1426  ;;  %v1531_v30 = vsel %vm8484_vm7, %v6707_v44, %v1429_v32 }
 0x34b   :  { %v1530_v13 = vsel %vm8498_vm9, %v1338_v59, %v1427_v35  ;;  %vm8502_vm9 = vmmov %vm8484_vm7 }
 0x34d   :  { %v1485_v9 = vpop.permute.xlu1 %1484 }
 0x34e   :  { %v1543_v5 = vsel %vm8486_vm4, %v1527_v22, %v1485_v9  ;;  %v1491_v34 = vpop.permute.xlu0 %1490 }
 0x34f   :  { %5350 = vmatmul.mubr.msk.f32.gmra.mrb[20].mxu0 %vm8483_vm11, %v1543_v5  ;;  %v1546_v41 = vsel %vm8499_vm10, %v1530_v13, %v1491_v34  ;;  %vm8503_vm10 = vmmov %vm8486_vm4 }
 0x350   :  { %5352 = vmatprep.mubr.msk.f32.mxu0 %vm8496_vm15, %v1544_v48  ;;  %vm8500_vm15 = vmmov %vm8483_vm11 }
 0x351   :  { %v1433_v21 = vpop.permute.xlu1 %1432 }
 0x352   :  { %v1431_v37 = vpop.permute.xlu0 %1430  ;;  %v1533_v44 = vsel %vm8484_vm7, %v6733_v7, %v1433_v21 }
 0x353   :  { %v1532_v56 = vsel %vm8502_vm9, %v1340_v27, %v1431_v37  ;;  %vm8505_vm9 = vmmov %vm8484_vm7 }
 0x354   :  { %vm8511_vm0 = vmmov %vm8505_vm9 }
 0x355   :  { %v1489_v62 = vpop.permute.xlu1 %1488 }
 0x356   :  { %v1545_v53 = vsel %vm8486_vm4, %v1529_v33, %v1489_v62  ;;  %v1495_v60 = vpop.permute.xlu0 %1494  ;;  %v2113_v62 = vld [vmem:[%s8281_s1 + $0x50] sm:$0xff] }
 0x357   :  { %5353 = vmatmul.mubr.msk.f32.gmra.mrb[22].mxu0 %vm8483_vm11, %v1545_v53  ;;  %v1548_v24 = vsel %vm8503_vm10, %v1532_v56, %v1495_v60  ;;  %vm8507_vm10 = vmmov %vm8483_vm11  ;;  %v6869_v60 = vld [vmem:[%s8283_s3 + $0x2] ss:$0 sm:$0xff]  ;;  %v2114_v56 = vld [vmem:[%s8281_s1 + $0x58] sm:$0xff] }
 0x358   :  { %5355 = vmatprep.mubr.msk.f32.mxu0 %vm8500_vm15, %v1546_v41  ;;  %vm8504_vm15 = vmmov %vm8483_vm11 }
 0x359   :  { %v1437_v57 = vpop.permute.xlu1 %1436  ;;  %vm8516_vm13 = vmmov %vm8507_vm10 }
 0x35a   :  { %v1435_v20 = vpop.permute.xlu0 %1434 }
 0x35b   :  { %v1534_v38 = vsel %vm8505_vm9, %v1342_v26, %v1435_v20  ;;  %vm8512_vm9 = vmmov %vm8486_vm4 }
 0x35d   :  { %v1493_v12 = vpop.permute.xlu1 %1492 }
 0x35e   :  { %v1547_v43 = vsel %vm8486_vm4, %v1531_v30, %v1493_v12  ;;  %v1499_v51 = vpop.permute.xlu0 %1498 }
 0x35f   :  { %5356 = vmatmul.mubr.msk.f32.gmra.mrb[24].mxu0 %vm8483_vm11, %v1547_v43  ;;  %v1550_v10 = vsel %vm8506_vm14, %v1534_v38, %v1499_v51  ;;  %vm8508_vm11 = vmmov %vm8507_vm10 }
 0x360   :  { %5358 = vmatprep.mubr.msk.f32.mxu0 %vm8504_vm15, %v1548_v24  ;;  %vm8509_vm15 = vmmov %vm8484_vm7  ;;  %vm8510_vm7 = vnez %v8386_v25  ;;  %v2925_v25 = vld [vmem:[%s8284_s4 + $0x8] sm:$0xff] }
 0x361   :  { %v1441_v35 = vpop.permute.xlu1 %1440  ;;  %v1535_v34 = vsel %vm8509_vm15, %v6742_v45, %v1437_v57  ;;  %v1344_v7 = vsel %vm8510_vm7, %v6757_v52, 0.0  ;;  %vm8513_vm14 = vmmov %vm8507_vm10  ;;  %v2112_v52 = vld [vmem:[%s8281_s1 + $0x48] sm:$0xff] }
 0x362   :  { %v1439_v22 = vpop.permute.xlu0 %1438  ;;  %vm8515_vm15 = vmmov %vm8486_vm4  ;;  %v5641_v13 = vpack.c.bf16 %v2113_v62, %v2112_v52 }
 0x363   :  { %v1536_v48 = vsel %vm8511_vm0, %v1344_v7, %v1439_v22 }
 0x364   :  { %5642 = vmatprep.subr.bf16.mxu1 %v5641_v13 }
 0x365   :  { %v1497_v32 = vpop.permute.xlu1 %1496  ;;  %5644 = vmatpush3.bf16.msra.mxu1 %v5641_v13 }
 0x366   :  { %v1549_v9 = vsel %vm8486_vm4, %v1533_v44, %v1497_v32  ;;  %v1503_v5 = vpop.permute.xlu0 %1502  ;;  %5371 = vmatprep.subr.mxu1 %v2114_v56 }
 0x367   :  { %5359 = vmatmul.mubr.msk.f32.gmra.mrb[26].mxu0 %vm8507_vm10, %v1549_v9  ;;  %v1552_v37 = vsel %vm8486_vm4, %v1536_v48, %v1503_v5 }
 0x368   :  { %5361 = vmatprep.mubr.msk.f32.mxu0 %vm8508_vm11, %v1550_v10  ;;  %vm8514_vm11 = vmmov %vm8511_vm0  ;;  %vm8517_vm0 = vcmask 1046528  }
 0x369   :  { %v1501_v1 = vpop.permute.xlu1 %1500  ;;  %v1537_v33 = vsel %vm8514_vm11, %v6753_v31, %v1441_v35  ;;  %v6864_v31 = vld [vmem:[%s8282_s2 + $0x2] ss:$0 sm:$0xff]  ;;  %5372 = vmatpush3.msra.mxu1 %v2114_v56  ;;  %vm8520_vm4 = vmmov %vm8517_vm0 }
 0x36a   :  { %v1551_v21 = vsel %vm8512_vm9, %v1535_v34, %v1501_v1  ;;  %vm8519_vm9 = vmmov %vm8517_vm0 }
 0x36b   :  { %5362 = vmatmul.mubr.msk.f32.gmra.mrb[28].mxu0 %vm8513_vm14, %v1551_v21  ;;  %vm8521_vm14 = vmmov %vm8517_vm0 }
 0x36c   :  { %5364 = vmatprep.mubr.msk.f32.mxu0 %vm8507_vm10, %v1552_v37  ;;  %vm8522_vm10 = vmmov %vm8517_vm0 }
 0x36d   :  { %v1505_v59 = vpop.permute.xlu1 %1504  ;;  %vm8523_vm11 = vmmov %vm8517_vm0 }
 0x36e   :  { %v1553_v45 = vsel %vm8515_vm15, %v1537_v33, %v1505_v59  ;;  %vm8524_vm15 = vmmov %vm8517_vm0 }
 0x36f   :  { %5365 = vmatmul.mubr.msk.f32.gmra.mrb[30].mxu0 %vm8516_vm13, %v1553_v45  ;;  %vm8518_vm13 = vmmov %vm8517_vm0 }
 0x412   :  { %v5345_v53 = vpop.f32.mrb[16].mxu0 }
 0x413   :  { %v1756_v41 = vmul.f32 %v5345_v53, %v6864_v31  ;;  %v1671_v57 = vpop.f32.mrb[17].mxu0 }
 0x414   :  { %v1755_v20 = vmul.f32 %v6864_v31, %v1671_v57 }
 0x415   :  { %v1777_v30 = vadd.f32 %v6869_v60, %v1756_v41 }
 0x416   :  { %v1776_v27 = vadd.f32 %v6869_v60, %v1755_v20 }
 0x417   :  { %v1793_v12 = vadd.f32 %v1777_v30, %v6351_v54 }
 0x418   :  { %v1792_v43 = vadd.f32 %v1776_v27, %v6354_v42 }
 0x419   :  { %v6880_v51 = vmax.f32 %v1793_v12, 0.0 }
 0x41a   :  { %v6882_v24 = vmax.f32 %v1792_v43, 0.0  ;;  %v5348_v35 = vpop.f32.mrb[18].mxu0 }
 0x41b   :  { %v1758_v22 = vmul.f32 %v5348_v35, %v6864_v31  ;;  %v1681_v44 = vpop.f32.mrb[19].mxu0  ;;  %1970 = vrot.lane.b32.xlu1 %v6880_v51, %s5894_s15  ;;  %v1905_v54 = vrot.slane %v6880_v51, 1 }
 0x41c   :  { %v1757_v26 = vmul.f32 %v6864_v31, %v1681_v44  ;;  %1968 = vrot.lane.b32.xlu0 %v6882_v24, %s5894_s15  ;;  %v1904_v42 = vrot.slane %v6882_v24, 1 }
 0x41d   :  { %v1779_v32 = vadd.f32 %v6869_v60, %v1758_v22 }
 0x41e   :  { %v1778_v38 = vadd.f32 %v6869_v60, %v1757_v26  ;;  %v1906_v9 = vsel %vm8517_vm0, %v1904_v42, %v1905_v54 }
 0x41f   :  { %v1795_v10 = vadd.f32 %v1779_v32, %v6368_v61 }
 0x420   :  { %v1794_v5 = vadd.f32 %v1778_v38, %v6371_v17  ;;  %2032 = vrot.lane.b32.xlu0 %v1906_v9, %s5895_s20 }
 0x421   :  { %v6898_v34 = vmax.f32 %v1795_v10, 0.0 }
 0x422   :  { %v6900_v7 = vmax.f32 %v1794_v5, 0.0  ;;  %v5351_v1 = vpop.f32.mrb[20].mxu0 }
 0x423   :  { %v1760_v48 = vmul.f32 %v5351_v1, %v6864_v31  ;;  %v1691_v21 = vpop.f32.mrb[21].mxu0  ;;  %1974 = vrot.lane.b32.xlu1 %v6898_v34, %s5894_s15  ;;  %v1909_v37 = vrot.slane %v6898_v34, 1 }
 0x424   :  { %v1759_v33 = vmul.f32 %v6864_v31, %v1691_v21  ;;  %1972 = vrot.lane.b32.xlu0 %v6900_v7, %s5894_s15  ;;  %v1907_v61 = vrot.slane %v6900_v7, 1 }
 0x425   :  { %v1781_v17 = vadd.f32 %v6869_v60, %v1760_v48 }
 0x426   :  { %v1780_v59 = vadd.f32 %v6869_v60, %v1759_v33  ;;  %v1910_v45 = vsel %vm8518_vm13, %v1907_v61, %v1909_v37  ;;  %v1908_v30 = vsel %vm8519_vm9, %v1905_v54, %v1907_v61  ;;  %vm8525_vm13 = vmmov %vm8517_vm0 }
 0x427   :  { %v1797_v52 = vadd.f32 %v1781_v17, %v6384_v28  ;;  %v1953_v43 = vsel %vm6000_vm1, %v1908_v30, 0.0  ;;  %vm8526_vm9 = vmmov %vm8517_vm0 }
 0x428   :  { %v1796_v62 = vadd.f32 %v1780_v59, %v6386_v2  ;;  %2036 = vrot.lane.b32.xlu0 %v1910_v45, %s5895_s20 }
 0x429   :  { %v6916_v13 = vmax.f32 %v1797_v52, 0.0 }
 0x42a   :  { %v6918_v53 = vmax.f32 %v1796_v62, 0.0  ;;  %v5354_v41 = vpop.f32.mrb[22].mxu0 }
 0x42b   :  { %v1762_v57 = vmul.f32 %v5354_v41, %v6864_v31  ;;  %v1701_v20 = vpop.f32.mrb[23].mxu0  ;;  %1978 = vrot.lane.b32.xlu1 %v6916_v13, %s5894_s15  ;;  %v1913_v27 = vrot.slane %v6916_v13, 1 }
 0x42c   :  { %v1761_v28 = vmul.f32 %v6864_v31, %v1701_v20  ;;  %1976 = vrot.lane.b32.xlu0 %v6918_v53, %s5894_s15  ;;  %v1911_v2 = vrot.slane %v6918_v53, 1 }
 0x42d   :  { %v1783_v12 = vadd.f32 %v6869_v60, %v1762_v57 }
 0x42e   :  { %v1782_v56 = vadd.f32 %v6869_v60, %v1761_v28  ;;  %v1914_v35 = vsel %vm8520_vm4, %v1911_v2, %v1913_v27  ;;  %v1912_v9 = vsel %vm8521_vm14, %v1909_v37, %v1911_v2  ;;  %vm8531_vm4 = vmmov %vm8517_vm0 }
 0x42f   :  { %v1799_v22 = vadd.f32 %v1783_v12, %v6404_v47  ;;  %2034 = vrot.lane.b32.xlu1 %v1953_v43, %s5895_s20  ;;  %v1955_v48 = vsel %vm6004_vm2, %v1912_v9, 0.0  ;;  %vm8532_vm14 = vmmov %vm8517_vm0 }
 0x430   :  { %v1798_v44 = vadd.f32 %v1782_v56, %v6406_v6  ;;  %2040 = vrot.lane.b32.xlu0 %v1914_v35, %s5895_s20 }
 0x431   :  { %v6938_v54 = vmax.f32 %v1799_v22, 0.0 }
 0x432   :  { %v6940_v26 = vmax.f32 %v1798_v44, 0.0  ;;  %v5357_v42 = vpop.f32.mrb[24].mxu0 }
 0x433   :  { %v1764_v32 = vmul.f32 %v5357_v42, %v6864_v31  ;;  %v1711_v38 = vpop.f32.mrb[25].mxu0  ;;  %1982 = vrot.lane.b32.xlu1 %v6938_v54, %s5894_s15  ;;  %v1917_v47 = vrot.slane %v6938_v54, 1 }
 0x434   :  { %v1763_v10 = vmul.f32 %v6864_v31, %v1711_v38  ;;  %1980 = vrot.lane.b32.xlu0 %v6940_v26, %s5894_s15  ;;  %v1915_v6 = vrot.slane %v6940_v26, 1 }
 0x435   :  { %v1785_v5 = vadd.f32 %v6869_v60, %v1764_v32 }
 0x436   :  { %v1784_v1 = vadd.f32 %v6869_v60, %v1763_v10  ;;  %v1918_v21 = vsel %vm8522_vm10, %v1915_v6, %v1917_v47  ;;  %v1916_v62 = vsel %vm8523_vm11, %v1913_v27, %v1915_v6  ;;  %vm8533_vm10 = vmmov %vm8517_vm0 }
 0x437   :  { %v1801_v37 = vadd.f32 %v1785_v5, %v6424_v11  ;;  %2038 = vrot.lane.b32.xlu1 %v1955_v48, %s5895_s20  ;;  %v1957_v28 = vsel %vm6042_vm3, %v1916_v62, 0.0  ;;  %vm8534_vm11 = vmmov %vm8517_vm0 }
 0x438   :  { %v1800_v33 = vadd.f32 %v1784_v1, %v6426_v15  ;;  %2044 = vrot.lane.b32.xlu0 %v1918_v21, %s5895_s20 }
 0x439   :  { %v6960_v61 = vmax.f32 %v1801_v37, 0.0 }
 0x43a   :  { %v6962_v17 = vmax.f32 %v1800_v33, 0.0  ;;  %v5360_v59 = vpop.f32.mrb[26].mxu0 }
 0x43b   :  { %v1766_v45 = vmul.f32 %v5360_v59, %v6864_v31  ;;  %v1721_v52 = vpop.f32.mrb[27].mxu0  ;;  %1986 = vrot.lane.b32.xlu1 %v6960_v61, %s5894_s15  ;;  %v1921_v11 = vrot.slane %v6960_v61, 1  ;;  %v8527_v59 = vld [vmem:[#allocation10_spill] sm:$0xff] }
 0x43c   :  { %v1765_v41 = vmul.f32 %v6864_v31, %v1721_v52  ;;  %1984 = vrot.lane.b32.xlu0 %v6962_v17, %s5894_s15  ;;  %v1919_v15 = vrot.slane %v6962_v17, 1  ;;  %v8528_v52 = vld [vmem:[#allocation11_spill] sm:$0xff] }
 0x43d   :  { %v1787_v57 = vadd.f32 %v6869_v60, %v1766_v45 }
 0x43e   :  { %v1786_v20 = vadd.f32 %v6869_v60, %v1765_v41  ;;  %v5363_v30 = vpop.f32.mrb[28].mxu0  ;;  %v1922_v2 = vsel %vm8524_vm15, %v1919_v15, %v1921_v11  ;;  %v1920_v10 = vsel %vm8517_vm0, %v1917_v47, %v1919_v15  ;;  %vm8535_vm15 = vmmov %vm8517_vm0  ;;  %vm8536_vm0 = vnez %v8367_v4 }
 0x43f   :  { %v1803_v27 = vadd.f32 %v1787_v57, %v6444_v3  ;;  %v1768_v12 = vmul.f32 %v5363_v30, %v6864_v31  ;;  %2042 = vrot.lane.b32.xlu1 %v1957_v28, %s5895_s20  ;;  %v1731_v56 = vpop.f32.mrb[29].mxu0 }
 0x440   :  { %v1802_v43 = vadd.f32 %v1786_v20, %v6446_v50  ;;  %v1767_v35 = vmul.f32 %v6864_v31, %v1731_v56  ;;  %2048 = vrot.lane.b32.xlu0 %v1922_v2, %s5895_s20 }
 0x441   :  { %v6984_v22 = vmax.f32 %v1803_v27, 0.0  ;;  %v1789_v44 = vadd.f32 %v6869_v60, %v1768_v12 }
 0x442   :  { %v6987_v42 = vmax.f32 %v1802_v43, 0.0  ;;  %v1788_v32 = vadd.f32 %v6869_v60, %v1767_v35  ;;  %v5366_v3 = vpop.f32.mrb[30].mxu0 }
 0x443   :  { %v1805_v38 = vadd.f32 %v1789_v44, %v6464_v0  ;;  %v1770_v9 = vmul.f32 %v5366_v3, %v6864_v31  ;;  %1990 = vrot.lane.b32.xlu1 %v6984_v22, %s5894_s15  ;;  %v1741_v50 = vpop.f32.mrb[31].mxu0  ;;  %v1925_v6 = vrot.slane %v6984_v22, 1  ;;  %v1959_v0 = vsel %vm6081_vm5, %v1920_v10, 0.0 }
 0x444   :  { %v1804_v5 = vadd.f32 %v1788_v32, %v6466_v16  ;;  %v1769_v1 = vmul.f32 %v6864_v31, %v1741_v50  ;;  %1988 = vrot.lane.b32.xlu0 %v6987_v42, %s5894_s15  ;;  %v1923_v48 = vrot.slane %v6987_v42, 1  ;;  %v1840_v32 = vrot.slane %v6882_v24, 7 }
 0x445   :  { %v7004_v37 = vmax.f32 %v1805_v38, 0.0  ;;  %v1791_v47 = vadd.f32 %v6869_v60, %v1770_v9 }
 0x446   :  { %v1926_v21 = vsel %vm8525_vm13, %v1923_v48, %v1925_v6  ;;  %v7006_v33 = vmax.f32 %v1804_v5, 0.0  ;;  %v1790_v16 = vadd.f32 %v6869_v60, %v1769_v1  ;;  %v1924_v31 = vsel %vm8526_vm9, %v1921_v11, %v1923_v48 }
 0x447   :  { %2046 = vrot.lane.b32.xlu1 %v1959_v0, %s5895_s20  ;;  %v1807_v45 = vadd.f32 %v1791_v47, %v8527_v59  ;;  %v1929_v15 = vrot.slane %v7004_v37, 1  ;;  %v1961_v60 = vsel %vm6129_vm6, %v1924_v31, 0.0  ;;  %vm8537_vm13 = vcmask 1040384  }
 0x448   :  { %2052 = vrot.lane.b32.xlu0 %v1926_v21, %s5895_s20  ;;  %v1806_v62 = vadd.f32 %v1790_v16, %v8528_v52  ;;  %v1927_v41 = vrot.slane %v7006_v33, 1  ;;  %v1887_v3 = vsel %vm8537_vm13, 0.0, %v1840_v32  ;;  %vm8538_vm9 = vnez %v8369_v14 }
 0x449   :  { %v7023_v57 = vmax.f32 %v1807_v45, 0.0  ;;  %v1888_v9 = vsel %vm8538_vm9, %v1887_v3, 0.0  ;;  %v1843_v0 = vrot.slane %v6900_v7, 7  ;;  %v1841_v47 = vrot.slane %v6880_v51, 7 }
 0x44a   :  { %v7025_v11 = vmax.f32 %v1806_v62, 0.0  ;;  %v1930_v20 = vsel %vm8531_vm4, %v1927_v41, %v1929_v15  ;;  %v1928_v30 = vsel %vm8532_vm14, %v1925_v6, %v1927_v41  ;;  %vm8539_vm4 = vcmask 64512  }
 0x44b   :  { %1994 = vrot.lane.b32.xlu1 %v7004_v37, %s5894_s15  ;;  %8529 = vst [vmem:[#allocation10_spill] sm:$0xff] %v7023_v57  ;;  %v1933_v2 = vrot.slane %v7023_v57, 1  ;;  %v1963_v27 = vsel %vm8475_vm12, %v1928_v30, 0.0  ;;  %vm8540_vm14 = vcmask 130048  }
 0x44c   :  { %1992 = vrot.lane.b32.xlu0 %v7006_v33, %s5894_s15  ;;  %8530 = vst [vmem:[#allocation11_spill] sm:$0xff] %v7025_v11  ;;  %v1931_v28 = vrot.slane %v7025_v11, 1 }
 0x44d   :  { %v1951_v35 = vsel %vm8535_vm15, %v1933_v2, 0.0 }
 0x44e   :  { %v1934_v12 = vsel %vm8533_vm10, %v1931_v28, %v1933_v2  ;;  %v1932_v56 = vsel %vm8534_vm11, %v1929_v15, %v1931_v28  ;;  %v1967_v44 = vsel %vm8536_vm0, %v1951_v35, 0.0  ;;  %vm8541_vm10 = vcmask 195584   ;;  %vm8542_vm11 = vmmov %vm8537_vm13 }
 0x44f   :  { %2050 = vrot.lane.b32.xlu1 %v1961_v60, %s5895_s20  ;;  %v1965_v43 = vsel %vm8476_vm8, %v1932_v56, 0.0  ;;  %v1844_v31 = vsel %vm8542_vm11, %v1841_v47, %v1843_v0  ;;  %vm8543_vm15 = vmmov %vm8542_vm11  ;;  %v1847_v60 = vrot.slane %v6918_v53, 7  ;;  %vm8549_vm0 = vcmask 195584  }
 0x450   :  { %2056 = vrot.lane.b32.xlu0 %v1930_v20, %s5895_s20  ;;  %v1842_v45 = vsel %vm8543_vm15, %v1840_v32, %v1841_v47  ;;  %vm8544_vm13 = vmmov %vm8539_vm4  ;;  %v1845_v2 = vrot.slane %v6898_v34, 7 }
 0x451   :  { %vm8550_vm11 = vmmov %vm8549_vm0 }
 0x453   :  { %1998 = vrot.lane.b32.xlu1 %v7023_v57, %s5894_s15 }
 0x454   :  { %1996 = vrot.lane.b32.xlu0 %v7025_v11, %s5894_s15 }
 0x457   :  { %2054 = vrot.lane.b32.xlu1 %v1963_v27, %s5895_s20 }
 0x458   :  { %2060 = vrot.lane.b32.xlu0 %v1934_v12, %s5895_s20  ;;  %v1848_v12 = vsel %vm8543_vm15, %v1845_v2, %v1847_v60 }
 0x45b   :  { %2058 = vrot.lane.b32.xlu1 %v1965_v43, %s5895_s20 }
 0x45f   :  { %2062 = vrot.lane.b32.xlu1 %v1967_v44, %s5895_s20 }
 0x48d   :  { %v1971_v5 = vpop.permute.xlu1 %1970 }
 0x48e   :  { %v1969_v38 = vpop.permute.xlu0 %1968  ;;  %v2081_v52 = vsel %vm8544_vm13, %v1842_v45, %v1971_v5  ;;  %v1855_v45 = vrot.slane %v6962_v17, 7 }
 0x48f   :  { %v2080_v50 = vsel %vm8539_vm4, %v1888_v9, %v1969_v38  ;;  %vm8545_vm4 = vnez %v8372_v40  ;;  %v1851_v38 = vrot.slane %v6940_v26, 7 }
 0x490   :  { %v1890_v62 = vsel %vm8545_vm4, %v1844_v31, 0.0  ;;  %vm8552_vm4 = vnez %v8375_v49 }
 0x491   :  { %v1892_v44 = vsel %vm8552_vm4, %v1848_v12, 0.0  ;;  %vm8558_vm4 = vnez %v8378_v8 }
 0x492   :  { %v2033_v10 = vpop.permute.xlu0 %2032 }
 0x493   :  { %v2096_v6 = vsel %vm8540_vm14, %v2080_v50, %v2033_v10  ;;  %vm8546_vm14 = vmmov %vm8544_vm13 }
 0x494   :  { %5373 = vmatprep.mubr.msk.f32.mxu1 %vm8541_vm10, %v2096_v6  ;;  %vm8547_vm10 = vcmask 130048   ;;  %vm8551_vm13 = vmmov %vm8543_vm15  ;;  %v1849_v6 = vrot.slane %v6916_v13, 7 }
 0x495   :  { %v1975_v48 = vpop.permute.xlu1 %1974  ;;  %vm8548_vm9 = vmmov %vm8547_vm10  ;;  %v1846_v43 = vsel %vm8551_vm13, %v1843_v0, %v1845_v2 }
 0x496   :  { %v1973_v1 = vpop.permute.xlu0 %1972  ;;  %v2083_v35 = vsel %vm8546_vm14, %v1846_v43, %v1975_v48  ;;  %vm8556_vm15 = vmmov %vm8550_vm11  ;;  %v1859_v43 = vrot.slane %v6987_v42, 7 }
 0x497   :  { %v2082_v15 = vsel %vm8546_vm14, %v1890_v62, %v1973_v1  ;;  %v1852_v1 = vsel %vm8551_vm13, %v1849_v6, %v1851_v38 }
 0x498   :  { %v1894_v47 = vsel %vm8558_vm4, %v1852_v1, 0.0  ;;  %vm8563_vm4 = vnez %v8380_v29 }
 0x49a   :  { %v2037_v21 = vpop.permute.xlu0 %2036 }
 0x49b   :  { %v2098_v28 = vsel %vm8548_vm9, %v2082_v15, %v2037_v21  ;;  %v1853_v15 = vrot.slane %v6938_v54, 7 }
 0x49d   :  { %v1979_v16 = vpop.permute.xlu1 %1978 }
 0x49e   :  { %v1977_v59 = vpop.permute.xlu0 %1976 }
 0x4a1   :  { %v2035_v41 = vpop.permute.xlu1 %2034 }
 0x4a2   :  { %v2097_v20 = vsel %vm8547_vm10, %v2081_v52, %v2035_v41  ;;  %v2041_v30 = vpop.permute.xlu0 %2040  ;;  %vm8553_vm10 = vmmov %vm8546_vm14 }
 0x4a3   :  { %5374 = vmatmul.mubr.msk.f32.vlgmr.msra.gmra.mrb[16].mxu1 %vm8549_vm0, %v2097_v20  ;;  %v2084_v3 = vsel %vm8553_vm10, %v1892_v44, %v1977_v59  ;;  %vm8554_vm0 = vmmov %vm8548_vm9 }
 0x4a4   :  { %5376 = vmatprep.mubr.msk.f32.mxu1 %vm8550_vm11, %v2098_v28  ;;  %vm8555_vm9 = vmmov %vm8554_vm0 }
 0x4a5   :  { %v1983_v27 = vpop.permute.xlu1 %1982  ;;  %v2100_v10 = vsel %vm8555_vm9, %v2084_v3, %v2041_v30  ;;  %vm8557_vm14 = vmmov %vm8551_vm13  ;;  %v1857_v3 = vrot.slane %v6960_v61, 7 }
 0x4a6   :  { %v1981_v56 = vpop.permute.xlu0 %1980  ;;  %v1850_v0 = vsel %vm8557_vm14, %v1847_v60, %v1849_v6  ;;  %vm8561_vm13 = vmmov %vm8556_vm15  ;;  %v1856_v60 = vsel %vm8557_vm14, %v1853_v15, %v1855_v45 }
 0x4a7   :  { %v2085_v21 = vsel %vm8553_vm10, %v1850_v0, %v1979_v16  ;;  %v1896_v2 = vsel %vm8563_vm4, %v1856_v60, 0.0  ;;  %vm8568_vm4 = vnez %v8382_v46  ;;  %v1863_v0 = vrot.slane %v7006_v33, 7 }
 0x4a9   :  { %v2039_v32 = vpop.permute.xlu1 %2038 }
 0x4aa   :  { %v2099_v9 = vsel %vm8554_vm0, %v2083_v35, %v2039_v32  ;;  %v2045_v50 = vpop.permute.xlu0 %2044  ;;  %vm8559_vm0 = vmmov %vm8553_vm10 }
 0x4ab   :  { %5377 = vmatmul.mubr.msk.f32.gmra.mrb[18].mxu1 %vm8550_vm11, %v2099_v9  ;;  %v2086_v59 = vsel %vm8559_vm0, %v1894_v47, %v1981_v56  ;;  %vm8560_vm11 = vmmov %vm8555_vm9 }
 0x4ac   :  { %5379 = vmatprep.mubr.msk.f32.mxu1 %vm8556_vm15, %v2100_v10  ;;  %v2102_v41 = vsel %vm8560_vm11, %v2086_v59, %v2045_v50  ;;  %vm8562_vm10 = vmmov %vm8557_vm14  ;;  %v1861_v59 = vrot.slane %v6984_v22, 7 }
 0x4ad   :  { %v1987_v5 = vpop.permute.xlu1 %1986  ;;  %v1854_v30 = vsel %vm8562_vm10, %v1851_v38, %v1853_v15  ;;  %vm8566_vm14 = vmmov %vm8561_vm13  ;;  %v1860_v38 = vsel %vm8562_vm10, %v1857_v3, %v1859_v43  ;;  %v1865_v15 = vrot.slane %v7004_v37, 7 }
 0x4ae   :  { %v1985_v48 = vpop.permute.xlu0 %1984  ;;  %v2087_v28 = vsel %vm8559_vm0, %v1854_v30, %v1983_v27  ;;  %v1898_v6 = vsel %vm8568_vm4, %v1860_v38, 0.0  ;;  %vm8578_vm4 = vcmask 195584  }
 0x4b1   :  { %v2043_v31 = vpop.permute.xlu1 %2042 }
 0x4b2   :  { %v2101_v52 = vsel %vm8555_vm9, %v2085_v21, %v2043_v31  ;;  %v2049_v62 = vpop.permute.xlu0 %2048  ;;  %vm8564_vm9 = vmmov %vm8559_vm0 }
 0x4b3   :  { %5380 = vmatmul.mubr.msk.f32.gmra.mrb[20].mxu1 %vm8556_vm15, %v2101_v52  ;;  %v2088_v56 = vsel %vm8564_vm9, %v1896_v2, %v1985_v48  ;;  %vm8565_vm15 = vmmov %vm8560_vm11  ;;  %v1867_v52 = vrot.slane %v7025_v11, 7 }
 0x4b4   :  { %5382 = vmatprep.mubr.msk.f32.mxu1 %vm8561_vm13, %v2102_v41  ;;  %v2104_v32 = vsel %vm8565_vm15, %v2088_v56, %v2049_v62  ;;  %vm8567_vm0 = vmmov %vm8562_vm10 }
 0x4b5   :  { %v1991_v16 = vpop.permute.xlu1 %1990  ;;  %v1858_v50 = vsel %vm8567_vm0, %v1855_v45, %v1857_v3  ;;  %vm8571_vm10 = vmmov %vm8566_vm14  ;;  %v1864_v45 = vsel %vm8567_vm0, %v1861_v59, %v1863_v0 }
 0x4b6   :  { %v1989_v20 = vpop.permute.xlu0 %1988  ;;  %v2089_v10 = vsel %vm8564_vm9, %v1858_v50, %v1987_v5 }
 0x4b9   :  { %v2047_v12 = vpop.permute.xlu1 %2046 }
 0x4ba   :  { %v2103_v35 = vsel %vm8560_vm11, %v2087_v28, %v2047_v12  ;;  %v2053_v44 = vpop.permute.xlu0 %2052  ;;  %vm8569_vm11 = vmmov %vm8564_vm9 }
 0x4bb   :  { %5383 = vmatmul.mubr.msk.f32.gmra.mrb[22].mxu1 %vm8561_vm13, %v2103_v35  ;;  %v2090_v48 = vsel %vm8569_vm11, %v1898_v6, %v1989_v20  ;;  %vm8570_vm13 = vmmov %vm8565_vm15  ;;  %v1869_v35 = vrot.slane %v7023_v57, 7 }
 0x4bc   :  { %5385 = vmatprep.mubr.msk.f32.mxu1 %vm8566_vm14, %v2104_v32  ;;  %v2106_v31 = vsel %vm8570_vm13, %v2090_v48, %v2053_v44  ;;  %vm8572_vm9 = vmmov %vm8567_vm0  ;;  %v7149_v48 = vld [vmem:[%s8282_s2 + $0x3] ss:$0 sm:$0xff] }
 0x4bd   :  { %v1995_v27 = vpop.permute.xlu1 %1994  ;;  %v1862_v41 = vsel %vm8572_vm9, %v1859_v43, %v1861_v59  ;;  %vm8574_vm13 = vmmov %vm8569_vm11 }
 0x4be   :  { %v1993_v9 = vpop.permute.xlu0 %1992  ;;  %v2091_v60 = vsel %vm8569_vm11, %v1862_v41, %v1991_v16  ;;  %vm8579_vm8 = vmmov %vm8572_vm9 }
 0x4bf   :  { %v1866_v43 = vsel %vm8579_vm8, %v1863_v0, %v1865_v15  ;;  %vm8580_vm9 = vmmov %vm8578_vm4 }
 0x4c0   :  { %v2093_v16 = vsel %vm8569_vm11, %v1866_v43, %v1995_v27 }
 0x4c1   :  { %v2051_v1 = vpop.permute.xlu1 %2050 }
 0x4c2   :  { %v2105_v21 = vsel %vm8565_vm15, %v2089_v10, %v2051_v1  ;;  %v2057_v47 = vpop.permute.xlu0 %2056  ;;  %vm8573_vm15 = vnez %v8384_v63  ;;  %v1870_v10 = vsel %vm8579_vm8, %v1867_v52, %v1869_v35 }
 0x4c3   :  { %5386 = vmatmul.mubr.msk.f32.gmra.mrb[24].mxu1 %vm8566_vm14, %v2105_v21  ;;  %v1900_v20 = vsel %vm8573_vm15, %v1864_v45, 0.0  ;;  %vm8575_vm14 = vmmov %vm8567_vm0  ;;  %v7154_v21 = vld [vmem:[%s8283_s3 + $0x3] ss:$0 sm:$0xff] }
 0x4c4   :  { %5388 = vmatprep.mubr.msk.f32.mxu1 %vm8571_vm10, %v2106_v31  ;;  %v2092_v28 = vsel %vm8574_vm13, %v1900_v20, %v1993_v9  ;;  %v1868_v2 = vsel %vm8575_vm14, %v1865_v15, %v1867_v52  ;;  %vm8576_vm10 = vcmask 130048   ;;  %vm8581_vm13 = vmmov %vm8569_vm11  ;;  %v2654_v45 = vld [vmem:[%s8281_s1 + $0x60] sm:$0xff]  ;;  %v2655_v52 = vld [vmem:[%s8281_s1 + $0x68] sm:$0xff] }
 0x4c5   :  { %v1999_v5 = vpop.permute.xlu1 %1998  ;;  %vm8577_vm0 = vmmov %vm8576_vm10  ;;  %v1902_v32 = vsel %vm8510_vm7, %v1868_v2, 0.0  ;;  %v5645_v41 = vpack.c.bf16 %v2655_v52, %v2654_v45 }
 0x4c6   :  { %v1997_v62 = vpop.permute.xlu0 %1996  ;;  %v2108_v56 = vsel %vm8577_vm0, %v2092_v28, %v2057_v47  ;;  %vm8582_vm14 = vmmov %vm8577_vm0 }
 0x4c7   :  { %v2094_v38 = vsel %vm8581_vm13, %v1902_v32, %v1997_v62  ;;  %vm8585_vm15 = vmmov %vm8569_vm11  ;;  %5646 = vmatprep.subr.bf16.mxu0 %v5645_v41 }
 0x4c8   :  { %v2095_v6 = vsel %vm8585_vm15, %v1870_v10, %v1999_v5  ;;  %5648 = vmatpush3.bf16.msra.mxu0 %v5645_v41  ;;  %vm8588_vm15 = vcmask 1046528   ;;  %vm8589_vm13 = vmmov %vm8579_vm8 }
 0x4c9   :  { %v2055_v30 = vpop.permute.xlu1 %2054 }
 0x4ca   :  { %v2107_v12 = vsel %vm8576_vm10, %v2091_v60, %v2055_v30  ;;  %v2061_v44 = vpop.permute.xlu0 %2060  ;;  %vm8583_vm10 = vmmov %vm8577_vm0 }
 0x4cb   :  { %5389 = vmatmul.mubr.msk.f32.gmra.mrb[26].mxu1 %vm8578_vm4, %v2107_v12  ;;  %v2110_v50 = vsel %vm8583_vm10, %v2094_v38, %v2061_v44  ;;  %vm8584_vm0 = vmmov %vm8578_vm4 }
 0x4cc   :  { %5391 = vmatprep.mubr.msk.f32.mxu1 %vm8580_vm9, %v2108_v56  ;;  %vm8586_vm9 = vmmov %vm8583_vm10 }
 0x4cd   :  { %v2059_v3 = vpop.permute.xlu1 %2058  ;;  %vm8587_vm11 = vmmov %vm8584_vm0 }
 0x4ce   :  { %v2109_v9 = vsel %vm8582_vm14, %v2093_v16, %v2059_v3  ;;  %v2656_v3 = vld [vmem:[%s8281_s1 + $0x70] sm:$0xff]  ;;  %vm8590_vm14 = vmmov %vm8588_vm15 }
 0x4cf   :  { %5392 = vmatmul.mubr.msk.f32.gmra.mrb[28].mxu1 %vm8578_vm4, %v2109_v9  ;;  %5401 = vmatprep.subr.mxu0 %v2656_v3  ;;  %vm8591_vm10 = vmmov %vm8590_vm14 }
 0x4d0   :  { %5394 = vmatprep.mubr.msk.f32.mxu1 %vm8584_vm0, %v2110_v50  ;;  %5402 = vmatpush3.msra.mxu0 %v2656_v3  ;;  %vm8592_vm4 = vmmov %vm8579_vm8 }
 0x4d1   :  { %v2063_v1 = vpop.permute.xlu1 %2062  ;;  %vm8593_vm8 = vmmov %vm8592_vm4 }
 0x4d2   :  { %v2111_v27 = vsel %vm8586_vm9, %v2095_v6, %v2063_v1  ;;  %vm8594_vm0 = vmmov %vm8591_vm10 }
 0x4d3   :  { %5395 = vmatmul.mubr.msk.f32.gmra.mrb[30].mxu1 %vm8587_vm11, %v2111_v27  ;;  %vm8595_vm9 = vmmov %vm8594_vm0 }
 0x4d4   :  { %vm8596_vm11 = vmmov %vm8592_vm4 }
 0x576   :  { %v5375_v0 = vpop.f32.mrb[16].mxu1 }
 0x577   :  { %v2314_v47 = vmul.f32 %v5375_v0, %v7149_v48  ;;  %v2229_v31 = vpop.f32.mrb[17].mxu1 }
 0x578   :  { %v2313_v59 = vmul.f32 %v7149_v48, %v2229_v31 }
 0x579   :  { %v2335_v5 = vadd.f32 %v7154_v21, %v2314_v47 }
 0x57a   :  { %v2334_v62 = vadd.f32 %v7154_v21, %v2313_v59 }
 0x57b   :  { %v2351_v15 = vmax.f32 %v2335_v5, 0.0 }
 0x57c   :  { %v7166_v60 = vmax.f32 %v2334_v62, 0.0 }
 0x57d   :  { %v2383_v20 = vrot.slane %v2351_v15, 7  ;;  %v2447_v30 = vrot.slane %v2351_v15, 1  ;;  %2512 = vrot.lane.b32.xlu1 %v2351_v15, %s5894_s15 }
 0x57e   :  { %v8336_v28 = vrot.slane %v7166_v60, 7  ;;  %v2446_v2 = vrot.slane %v7166_v60, 1  ;;  %v5378_v12 = vpop.f32.mrb[18].mxu1  ;;  %2510 = vrot.lane.b32.xlu0 %v7166_v60, %s5894_s15 }
 0x57f   :  { %v2316_v56 = vmul.f32 %v5378_v12, %v7149_v48  ;;  %v2239_v43 = vpop.f32.mrb[19].mxu1 }
 0x580   :  { %v2315_v35 = vmul.f32 %v7149_v48, %v2239_v43  ;;  %v2448_v44 = vsel %vm8588_vm15, %v2446_v2, %v2447_v30  ;;  %v7179_v16 = vsel %vm8589_vm13, %v8336_v28, %v2383_v20  ;;  %vm8597_vm15 = vmmov %vm8592_vm4 }
 0x581   :  { %v2337_v32 = vadd.f32 %v7154_v21, %v2316_v56  ;;  %vm8598_vm13 = vmmov %vm8594_vm0 }
 0x582   :  { %v2336_v38 = vadd.f32 %v7154_v21, %v2315_v35  ;;  %2574 = vrot.lane.b32.xlu0 %v2448_v44, %s5895_s20 }
 0x583   :  { %v2353_v9 = vmax.f32 %v2337_v32, 0.0 }
 0x584   :  { %v2352_v50 = vmax.f32 %v2336_v38, 0.0 }
 0x585   :  { %v2387_v10 = vrot.slane %v2353_v9, 7  ;;  %v2451_v6 = vrot.slane %v2353_v9, 1  ;;  %2516 = vrot.lane.b32.xlu1 %v2353_v9, %s5894_s15 }
 0x586   :  { %v2385_v1 = vrot.slane %v2352_v50, 7  ;;  %v2449_v27 = vrot.slane %v2352_v50, 1  ;;  %v5381_v0 = vpop.f32.mrb[20].mxu1  ;;  %2514 = vrot.lane.b32.xlu0 %v2352_v50, %s5894_s15 }
 0x587   :  { %v2318_v47 = vmul.f32 %v5381_v0, %v7149_v48  ;;  %v2249_v31 = vpop.f32.mrb[21].mxu1 }
 0x588   :  { %v2317_v59 = vmul.f32 %v7149_v48, %v2249_v31  ;;  %v2452_v5 = vsel %vm8590_vm14, %v2449_v27, %v2451_v6  ;;  %v2450_v45 = vsel %vm8591_vm10, %v2447_v30, %v2449_v27  ;;  %v7194_v52 = vsel %vm8592_vm4, %v2385_v1, %v2387_v10  ;;  %vm8599_vm14 = vmmov %vm8594_vm0 }
 0x589   :  { %v2339_v62 = vadd.f32 %v7154_v21, %v2318_v47  ;;  %v7198_v41 = vsel %vm8593_vm8, %v2383_v20, %v2385_v1  ;;  %v2495_v20 = vsel %vm6000_vm1, %v2450_v45, 0.0  ;;  %vm8600_vm10 = vmmov %vm8592_vm4 }
 0x58a   :  { %v2338_v15 = vadd.f32 %v7154_v21, %v2317_v59  ;;  %2578 = vrot.lane.b32.xlu0 %v2452_v5, %s5895_s20  ;;  %vm8601_vm8 = vmmov %vm8594_vm0 }
 0x58b   :  { %v2355_v2 = vmax.f32 %v2339_v62, 0.0 }
 0x58c   :  { %v2354_v12 = vmax.f32 %v2338_v15, 0.0 }
 0x58d   :  { %v2391_v56 = vrot.slane %v2355_v2, 7  ;;  %v2455_v43 = vrot.slane %v2355_v2, 1  ;;  %2520 = vrot.lane.b32.xlu1 %v2355_v2, %s5894_s15 }
 0x58e   :  { %v2389_v35 = vrot.slane %v2354_v12, 7  ;;  %v2453_v30 = vrot.slane %v2354_v12, 1  ;;  %v5384_v44 = vpop.f32.mrb[22].mxu1  ;;  %2518 = vrot.lane.b32.xlu0 %v2354_v12, %s5894_s15 }
 0x58f   :  { %v2320_v32 = vmul.f32 %v5384_v44, %v7149_v48  ;;  %v2259_v3 = vpop.f32.mrb[23].mxu1 }
 0x590   :  { %v2319_v38 = vmul.f32 %v7149_v48, %v2259_v3  ;;  %v2456_v9 = vsel %vm8594_vm0, %v2453_v30, %v2455_v43  ;;  %v2454_v50 = vsel %vm8595_vm9, %v2451_v6, %v2453_v30  ;;  %v7211_v1 = vsel %vm8596_vm11, %v2389_v35, %v2391_v56  ;;  %vm8602_vm9 = vmmov %vm8592_vm4 }
 0x591   :  { %v2341_v27 = vadd.f32 %v7154_v21, %v2320_v32  ;;  %2576 = vrot.lane.b32.xlu1 %v2495_v20, %s5895_s20  ;;  %v7216_v0 = vsel %vm8597_vm15, %v2387_v10, %v2389_v35  ;;  %v2497_v10 = vsel %vm6004_vm2, %v2454_v50, 0.0  ;;  %vm8603_vm11 = vmmov %vm8592_vm4 }
 0x592   :  { %v2340_v47 = vadd.f32 %v7154_v21, %v2319_v38  ;;  %2582 = vrot.lane.b32.xlu0 %v2456_v9, %s5895_s20  ;;  %vm8604_vm15 = vmmov %vm8594_vm0 }
 0x593   :  { %v2357_v31 = vmax.f32 %v2341_v27, 0.0 }
 0x594   :  { %v2356_v59 = vmax.f32 %v2340_v47, 0.0 }
 0x595   :  { %v2395_v5 = vrot.slane %v2357_v31, 7  ;;  %v2459_v45 = vrot.slane %v2357_v31, 1  ;;  %2524 = vrot.lane.b32.xlu1 %v2357_v31, %s5894_s15 }
 0x596   :  { %v2393_v6 = vrot.slane %v2356_v59, 7  ;;  %v2457_v62 = vrot.slane %v2356_v59, 1  ;;  %v5387_v15 = vpop.f32.mrb[24].mxu1  ;;  %2522 = vrot.lane.b32.xlu0 %v2356_v59, %s5894_s15 }
 0x597   :  { %v2322_v2 = vmul.f32 %v5387_v15, %v7149_v48  ;;  %v2269_v12 = vpop.f32.mrb[25].mxu1 }
 0x598   :  { %v2321_v35 = vmul.f32 %v7149_v48, %v2269_v12  ;;  %v2460_v30 = vsel %vm8598_vm13, %v2457_v62, %v2459_v45  ;;  %v2458_v44 = vsel %vm8599_vm14, %v2455_v43, %v2457_v62  ;;  %v7229_v32 = vsel %vm8600_vm10, %v2393_v6, %v2395_v5  ;;  %vm8605_vm13 = vmmov %vm8594_vm0 }
 0x599   :  { %v2343_v3 = vadd.f32 %v7154_v21, %v2322_v2  ;;  %2580 = vrot.lane.b32.xlu1 %v2497_v10, %s5895_s20  ;;  %v7234_v20 = vsel %vm8592_vm4, %v2391_v56, %v2393_v6  ;;  %v2499_v56 = vsel %vm6042_vm3, %v2458_v44, 0.0  ;;  %vm8606_vm14 = vmmov %vm8592_vm4 }
 0x59a   :  { %v2342_v38 = vadd.f32 %v7154_v21, %v2321_v35  ;;  %2586 = vrot.lane.b32.xlu0 %v2460_v30, %s5895_s20  ;;  %vm8607_vm10 = vmmov %vm8592_vm4 }
 0x59b   :  { %v2359_v9 = vmax.f32 %v2343_v3, 0.0  ;;  %vm8608_vm4 = vmmov %vm8594_vm0 }
 0x59c   :  { %v2358_v50 = vmax.f32 %v2342_v38, 0.0 }
 0x59d   :  { %v2399_v27 = vrot.slane %v2359_v9, 7  ;;  %v2463_v47 = vrot.slane %v2359_v9, 1  ;;  %2528 = vrot.lane.b32.xlu1 %v2359_v9, %s5894_s15 }
 0x59e   :  { %v2397_v43 = vrot.slane %v2358_v50, 7  ;;  %v2461_v31 = vrot.slane %v2358_v50, 1  ;;  %v5390_v59 = vpop.f32.mrb[26].mxu1  ;;  %2526 = vrot.lane.b32.xlu0 %v2358_v50, %s5894_s15 }
 0x59f   :  { %v2324_v62 = vmul.f32 %v5390_v59, %v7149_v48  ;;  %v2279_v15 = vpop.f32.mrb[27].mxu1 }
 0x5a0   :  { %v2323_v6 = vmul.f32 %v7149_v48, %v2279_v15  ;;  %v2464_v2 = vsel %vm8601_vm8, %v2461_v31, %v2463_v47  ;;  %v2462_v12 = vsel %vm8594_vm0, %v2459_v45, %v2461_v31  ;;  %v7247_v10 = vsel %vm8602_vm9, %v2397_v43, %v2399_v27  ;;  %vm8609_vm8 = vmmov %vm8594_vm0 }
 0x5a1   :  { %v2345_v35 = vadd.f32 %v7154_v21, %v2324_v62  ;;  %2584 = vrot.lane.b32.xlu1 %v2499_v56, %s5895_s20  ;;  %v7252_v30 = vsel %vm8603_vm11, %v2395_v5, %v2397_v43  ;;  %vm8610_vm0 = vmmov %vm8602_vm9 }
 0x5a2   :  { %v2344_v3 = vadd.f32 %v7154_v21, %v2323_v6  ;;  %2590 = vrot.lane.b32.xlu0 %v2464_v2, %s5895_s20  ;;  %v5393_v44 = vpop.f32.mrb[28].mxu1  ;;  %vm8611_vm9 = vmmov %vm8610_vm0 }
 0x5a3   :  { %v2361_v38 = vmax.f32 %v2345_v35, 0.0  ;;  %v2326_v9 = vmul.f32 %v5393_v44, %v7149_v48  ;;  %v2289_v50 = vpop.f32.mrb[29].mxu1  ;;  %vm8612_vm11 = vmmov %vm8608_vm4 }
 0x5a4   :  { %v2360_v45 = vmax.f32 %v2344_v3, 0.0  ;;  %v2325_v31 = vmul.f32 %v7149_v48, %v2289_v50  ;;  %v2501_v3 = vsel %vm6081_vm5, %v2462_v12, 0.0 }
 0x5a5   :  { %v2467_v59 = vrot.slane %v2361_v38, 1  ;;  %v2347_v62 = vadd.f32 %v7154_v21, %v2326_v9  ;;  %2532 = vrot.lane.b32.xlu1 %v2361_v38, %s5894_s15  ;;  %v2403_v15 = vrot.slane %v2361_v38, 7 }
 0x5a6   :  { %v2401_v5 = vrot.slane %v2360_v45, 7  ;;  %v2465_v43 = vrot.slane %v2360_v45, 1  ;;  %v2346_v56 = vadd.f32 %v7154_v21, %v2325_v31  ;;  %2530 = vrot.lane.b32.xlu0 %v2360_v45, %s5894_s15  ;;  %v5396_v6 = vpop.f32.mrb[30].mxu1 }
 0x5a7   :  { %v2363_v2 = vmax.f32 %v2347_v62, 0.0  ;;  %v2328_v35 = vmul.f32 %v5396_v6, %v7149_v48  ;;  %v2299_v44 = vpop.f32.mrb[31].mxu1 }
 0x5a8   :  { %v2362_v50 = vmax.f32 %v2346_v56, 0.0  ;;  %v2327_v9 = vmul.f32 %v7149_v48, %v2299_v44  ;;  %v2468_v28 = vsel %vm8604_vm15, %v2465_v43, %v2467_v59  ;;  %v2466_v38 = vsel %vm8605_vm13, %v2463_v47, %v2465_v43  ;;  %vm8613_vm15 = vmmov %vm8608_vm4 }
 0x5a9   :  { %v2407_v11 = vrot.slane %v2363_v2, 7  ;;  %v2471_v57 = vrot.slane %v2363_v2, 1  ;;  %v2349_v31 = vadd.f32 %v7154_v21, %v2328_v35  ;;  %2588 = vrot.lane.b32.xlu1 %v2501_v3, %s5895_s20  ;;  %v7273_v12 = vsel %vm8606_vm14, %v2401_v5, %v2403_v15  ;;  %vm8614_vm13 = vmmov %vm8610_vm0 }
 0x5aa   :  { %v2405_v45 = vrot.slane %v2362_v50, 7  ;;  %v2469_v62 = vrot.slane %v2362_v50, 1  ;;  %v2348_v6 = vadd.f32 %v7154_v21, %v2327_v9  ;;  %2594 = vrot.lane.b32.xlu0 %v2468_v28, %s5895_s20  ;;  %v7276_v56 = vsel %vm8607_vm10, %v2399_v27, %v2401_v5  ;;  %vm8615_vm14 = vmmov %vm8610_vm0 }
 0x5ab   :  { %v2365_v48 = vmax.f32 %v2349_v31, 0.0  ;;  %v2503_v27 = vsel %vm6129_vm6, %v2466_v38, 0.0  ;;  %vm8616_vm10 = vnez %v8365_v55  ;;  %v8618_v38 = vrot.slane %v7166_v60, 7 }
 0x5ac   :  { %v2364_v47 = vmax.f32 %v2348_v6, 0.0  ;;  %v2472_v43 = vsel %vm8608_vm4, %v2469_v62, %v2471_v57  ;;  %v2470_v35 = vsel %vm8609_vm8, %v2467_v59, %v2469_v62  ;;  %v7282_v21 = vsel %vm8610_vm0, %v2405_v45, %v2407_v11 }
 0x5ad   :  { %v2411_v44 = vrot.slane %v2365_v48, 7  ;;  %v2475_v3 = vrot.slane %v2365_v48, 1  ;;  %2536 = vrot.lane.b32.xlu1 %v2363_v2, %s5894_s15  ;;  %v7286_v31 = vsel %vm8611_vm9, %v2403_v15, %v2405_v45  ;;  %v2505_v15 = vsel %vm8475_vm12, %v2470_v35, 0.0 }
 0x5ae   :  { %v2409_v28 = vrot.slane %v2364_v47, 7  ;;  %v2473_v9 = vrot.slane %v2364_v47, 1  ;;  %2534 = vrot.lane.b32.xlu0 %v2362_v50, %s5894_s15  ;;  %vm8617_vm8 = vnez %v8367_v4  ;;  %v2429_v45 = vsel %vm8610_vm0, 0.0, %v8618_v38  ;;  %v3497_v4 = vld [vmem:[%s8281_s1 + $0x78] sm:$0xff] }
 0x5af   :  { %vm8619_vm9 = vnez %v8369_v14 }
 0x5b0   :  { %v2476_v5 = vsel %vm8612_vm11, %v2473_v9, %v2475_v3  ;;  %v2474_v59 = vsel %vm8613_vm15, %v2471_v57, %v2473_v9  ;;  %v7293_v62 = vsel %vm8614_vm13, %v2409_v28, %v2411_v44  ;;  %v7297_v2 = vsel %vm8615_vm14, %v2407_v11, %v2409_v28 }
 0x5b1   :  { %2592 = vrot.lane.b32.xlu1 %v2503_v27, %s5895_s20  ;;  %v2507_v57 = vsel %vm8616_vm10, %v2474_v59, 0.0  ;;  %v2493_v11 = vsel %vm8608_vm4, %v2475_v3, 0.0  ;;  %vm8620_vm11 = vcmask 64512   ;;  %vm8621_vm15 = vcmask 130048  }
 0x5b2   :  { %2598 = vrot.lane.b32.xlu0 %v2472_v43, %s5895_s20  ;;  %v2509_v50 = vsel %vm8617_vm8, %v2493_v11, 0.0  ;;  %vm8622_vm13 = vcmask 195584   ;;  %vm8623_vm14 = vmmov %vm8620_vm11  ;;  %vm8624_vm4 = vnez %v8372_v40 }
 0x5b3   :  { %v2432_v59 = vsel %vm8624_vm4, %v7198_v41, 0.0  ;;  %vm8625_vm0 = vmmov %vm8620_vm11  ;;  %vm8630_vm4 = vnez %v8375_v49 }
 0x5b4   :  { %v2434_v41 = vsel %vm8630_vm4, %v7216_v0, 0.0  ;;  %vm8634_vm4 = vnez %v8378_v8 }
 0x5b5   :  { %2540 = vrot.lane.b32.xlu1 %v2365_v48, %s5894_s15  ;;  %v2430_v48 = vsel %vm8619_vm9, %v2429_v45, 0.0  ;;  %vm8628_vm9 = vmmov %vm8622_vm13  ;;  %v2436_v0 = vsel %vm8634_vm4, %v7234_v20, 0.0  ;;  %vm8638_vm4 = vnez %v8380_v29 }
 0x5b6   :  { %2538 = vrot.lane.b32.xlu0 %v2364_v47, %s5894_s15  ;;  %v2438_v20 = vsel %vm8638_vm4, %v7252_v30, 0.0  ;;  %vm8642_vm4 = vnez %v8382_v46 }
 0x5b7   :  { %v2440_v30 = vsel %vm8642_vm4, %v7276_v56, 0.0  ;;  %vm8646_vm4 = vnez %v8384_v63 }
 0x5b8   :  { %v2442_v56 = vsel %vm8646_vm4, %v7286_v31, 0.0 }
 0x5b9   :  { %2596 = vrot.lane.b32.xlu1 %v2505_v15, %s5895_s20 }
 0x5ba   :  { %2602 = vrot.lane.b32.xlu0 %v2476_v5, %s5895_s20 }
 0x5bd   :  { %2600 = vrot.lane.b32.xlu1 %v2507_v57, %s5895_s20 }
 0x5c1   :  { %2604 = vrot.lane.b32.xlu1 %v2509_v50, %s5895_s20 }
 0x5ef   :  { %v2513_v44 = vpop.permute.xlu1 %2512 }
 0x5f0   :  { %v2511_v6 = vpop.permute.xlu0 %2510  ;;  %v2623_v60 = vsel %vm8623_vm14, %v7179_v16, %v2513_v44  ;;  %vm8629_vm14 = vmmov %vm8625_vm0 }
 0x5f1   :  { %v2622_v47 = vsel %vm8620_vm11, %v2430_v48, %v2511_v6  ;;  %vm8626_vm11 = vmmov %vm8621_vm15 }
 0x5f2   :  { %vm8647_vm10 = vmmov %vm8626_vm11 }
 0x5f4   :  { %v2575_v43 = vpop.permute.xlu0 %2574 }
 0x5f5   :  { %v2638_v35 = vsel %vm8621_vm15, %v2622_v47, %v2575_v43  ;;  %vm8627_vm15 = vmmov %vm8626_vm11 }
 0x5f6   :  { %5403 = vmatprep.mubr.msk.f32.mxu0 %vm8622_vm13, %v2638_v35 }
 0x5f7   :  { %v2517_v28 = vpop.permute.xlu1 %2516 }
 0x5f8   :  { %v2515_v3 = vpop.permute.xlu0 %2514  ;;  %v2625_v16 = vsel %vm8629_vm14, %v7194_v52, %v2517_v28  ;;  %vm8633_vm14 = vmmov %vm8625_vm0 }
 0x5f9   :  { %v2624_v57 = vsel %vm8625_vm0, %v2432_v59, %v2515_v3 }
 0x5fc   :  { %v2579_v9 = vpop.permute.xlu0 %2578 }
 0x5fd   :  { %v2640_v38 = vsel %vm8627_vm15, %v2624_v57, %v2579_v9  ;;  %vm8631_vm15 = vmmov %vm8626_vm11 }
 0x5ff   :  { %v2521_v27 = vpop.permute.xlu1 %2520 }
 0x600   :  { %v2519_v5 = vpop.permute.xlu0 %2518  ;;  %v2627_v52 = vsel %vm8633_vm14, %v7211_v1, %v2521_v27  ;;  %vm8637_vm14 = vmmov %vm8625_vm0 }
 0x601   :  { %v2626_v47 = vsel %vm8625_vm0, %v2434_v41, %v2519_v5 }
 0x603   :  { %v2577_v15 = vpop.permute.xlu1 %2576 }
 0x604   :  { %v2639_v11 = vsel %vm8626_vm11, %v2623_v60, %v2577_v15  ;;  %v2583_v50 = vpop.permute.xlu0 %2582 }
 0x605   :  { %5404 = vmatmul.mubr.msk.f32.vlgmr.msra.gmra.mrb[32].mxu0 %vm8622_vm13, %v2639_v11  ;;  %v2642_v44 = vsel %vm8631_vm15, %v2626_v47, %v2583_v50  ;;  %vm8632_vm13 = vmmov %vm8628_vm9 }
 0x606   :  { %5406 = vmatprep.mubr.msk.f32.mxu0 %vm8628_vm9, %v2640_v38  ;;  %vm8635_vm15 = vmmov %vm8626_vm11 }
 0x607   :  { %v2525_v45 = vpop.permute.xlu1 %2524 }
 0x608   :  { %v2523_v6 = vpop.permute.xlu0 %2522  ;;  %v2629_v1 = vsel %vm8637_vm14, %v7229_v32, %v2525_v45  ;;  %vm8641_vm14 = vmmov %vm8625_vm0 }
 0x609   :  { %v2628_v5 = vsel %vm8625_vm0, %v2436_v0, %v2523_v6 }
 0x60b   :  { %v2581_v48 = vpop.permute.xlu1 %2580 }
 0x60c   :  { %v2641_v43 = vsel %vm8626_vm11, %v2625_v16, %v2581_v48  ;;  %v2587_v35 = vpop.permute.xlu0 %2586 }
 0x60d   :  { %5407 = vmatmul.mubr.msk.f32.gmra.mrb[34].mxu0 %vm8632_vm13, %v2641_v43  ;;  %v2644_v15 = vsel %vm8635_vm15, %v2628_v5, %v2587_v35  ;;  %vm8636_vm13 = vmmov %vm8628_vm9 }
 0x60e   :  { %5409 = vmatprep.mubr.msk.f32.mxu0 %vm8628_vm9, %v2642_v44  ;;  %vm8639_vm15 = vmmov %vm8626_vm11 }
 0x60f   :  { %v2529_v3 = vpop.permute.xlu1 %2528 }
 0x610   :  { %v2527_v9 = vpop.permute.xlu0 %2526  ;;  %v2631_v32 = vsel %vm8641_vm14, %v7247_v10, %v2529_v3  ;;  %vm8645_vm14 = vmmov %vm8625_vm0 }
 0x611   :  { %v2630_v50 = vsel %vm8625_vm0, %v2438_v20, %v2527_v9 }
 0x613   :  { %v2585_v28 = vpop.permute.xlu1 %2584 }
 0x614   :  { %v2643_v60 = vsel %vm8626_vm11, %v2627_v52, %v2585_v28  ;;  %v2591_v59 = vpop.permute.xlu0 %2590 }
 0x615   :  { %5410 = vmatmul.mubr.msk.f32.gmra.mrb[36].mxu0 %vm8636_vm13, %v2643_v60  ;;  %v2646_v16 = vsel %vm8639_vm15, %v2630_v50, %v2591_v59  ;;  %vm8640_vm13 = vmmov %vm8628_vm9  ;;  %v7403_v50 = vld [vmem:[%s8283_s3 + $0x4] ss:$0 sm:$0xff] }
 0x616   :  { %5412 = vmatprep.mubr.msk.f32.mxu0 %vm8628_vm9, %v2644_v15  ;;  %vm8643_vm15 = vmmov %vm8626_vm11 }
 0x617   :  { %v2533_v57 = vpop.permute.xlu1 %2532 }
 0x618   :  { %v2531_v11 = vpop.permute.xlu0 %2530  ;;  %v2633_v10 = vsel %vm8645_vm14, %v7273_v12, %v2533_v57  ;;  %v2444_v12 = vsel %vm8510_vm7, %v7297_v2, 0.0  ;;  %vm8651_vm14 = vmmov %vm8625_vm0  ;;  %v7398_v2 = vld [vmem:[%s8282_s2 + $0x4] ss:$0 sm:$0xff] }
 0x619   :  { %v2632_v47 = vsel %vm8625_vm0, %v2440_v30, %v2531_v11 }
 0x61b   :  { %v2589_v27 = vpop.permute.xlu1 %2588 }
 0x61c   :  { %v2645_v38 = vsel %vm8626_vm11, %v2629_v1, %v2589_v27  ;;  %v2595_v6 = vpop.permute.xlu0 %2594 }
 0x61d   :  { %5413 = vmatmul.mubr.msk.f32.gmra.mrb[38].mxu0 %vm8640_vm13, %v2645_v38  ;;  %v2648_v44 = vsel %vm8643_vm15, %v2632_v47, %v2595_v6  ;;  %vm8644_vm13 = vmmov %vm8628_vm9 }
 0x61e   :  { %5415 = vmatprep.mubr.msk.f32.mxu0 %vm8628_vm9, %v2646_v16  ;;  %vm8648_vm15 = vmmov %vm8628_vm9 }
 0x61f   :  { %v2537_v41 = vpop.permute.xlu1 %2536 }
 0x620   :  { %v2535_v48 = vpop.permute.xlu0 %2534 }
 0x621   :  { %v2634_v0 = vsel %vm8625_vm0, %v2442_v56, %v2535_v48 }
 0x623   :  { %v2593_v45 = vpop.permute.xlu1 %2592 }
 0x624   :  { %v2647_v43 = vsel %vm8626_vm11, %v2631_v32, %v2593_v45  ;;  %v2599_v35 = vpop.permute.xlu0 %2598 }
 0x625   :  { %5416 = vmatmul.mubr.msk.f32.gmra.mrb[40].mxu0 %vm8644_vm13, %v2647_v43  ;;  %v2650_v5 = vsel %vm8647_vm10, %v2634_v0, %v2599_v35  ;;  %vm8649_vm13 = vmmov %vm8628_vm9 }
 0x626   :  { %5418 = vmatprep.mubr.msk.f32.mxu0 %vm8628_vm9, %v2648_v44  ;;  %vm8650_vm9 = vmmov %vm8625_vm0 }
 0x627   :  { %v2541_v9 = vpop.permute.xlu1 %2540  ;;  %v2635_v59 = vsel %vm8650_vm9, %v7282_v21, %v2537_v41  ;;  %vm8652_vm0 = vmmov %vm8647_vm10 }
 0x628   :  { %v2539_v52 = vpop.permute.xlu0 %2538  ;;  %vm8654_vm10 = vmmov %vm8649_vm13 }
 0x629   :  { %v2636_v15 = vsel %vm8651_vm14, %v2444_v12, %v2539_v52  ;;  %vm8658_vm4 = vmmov %vm8654_vm10  ;;  %vm8660_vm14 = vcmask 1040384  }
 0x62b   :  { %v2597_v3 = vpop.permute.xlu1 %2596 }
 0x62c   :  { %v2649_v28 = vsel %vm8626_vm11, %v2633_v10, %v2597_v3  ;;  %v2603_v60 = vpop.permute.xlu0 %2602  ;;  %vm8653_vm11 = vmmov %vm8652_vm0 }
 0x62d   :  { %5419 = vmatmul.mubr.msk.f32.gmra.mrb[42].mxu0 %vm8648_vm15, %v2649_v28  ;;  %v2652_v11 = vsel %vm8653_vm11, %v2636_v15, %v2603_v60  ;;  %vm8655_vm15 = vmmov %vm8654_vm10 }
 0x62e   :  { %5421 = vmatprep.mubr.msk.f32.mxu0 %vm8649_vm13, %v2650_v5  ;;  %vm8656_vm13 = vmmov %vm8650_vm9 }
 0x62f   :  { %v2601_v31 = vpop.permute.xlu1 %2600  ;;  %v2637_v1 = vsel %vm8656_vm13, %v7293_v62, %v2541_v9  ;;  %vm8657_vm9 = vmmov %vm8652_vm0 }
 0x630   :  { %v2651_v57 = vsel %vm8652_vm0, %v2635_v59, %v2601_v31 }
 0x631   :  { %5422 = vmatmul.mubr.msk.f32.gmra.mrb[44].mxu0 %vm8654_vm10, %v2651_v57  ;;  %vm8663_vm10 = vmmov %vm8660_vm14 }
 0x632   :  { %5424 = vmatprep.mubr.msk.f32.mxu0 %vm8655_vm15, %v2652_v11  ;;  %vm8664_vm15 = vmmov %vm8663_vm10 }
 0x633   :  { %v2605_v20 = vpop.permute.xlu1 %2604 }
 0x634   :  { %v2653_v21 = vsel %vm8657_vm9, %v2637_v1, %v2605_v20  ;;  %vm8667_vm9 = vmmov %vm8663_vm10 }
 0x635   :  { %5425 = vmatmul.mubr.msk.f32.gmra.mrb[46].mxu0 %vm8658_vm4, %v2653_v21  ;;  %vm8659_vm4 = vcmask 1046528  }
 0x636   :  { %vm8661_vm0 = vmmov %vm8659_vm4 }
 0x637   :  { %vm8662_vm11 = vmmov %vm8661_vm0 }
 0x638   :  { %vm8666_vm13 = vmmov %vm8661_vm0 }
 0x6d8   :  { %v5405_v27 = vpop.f32.mrb[32].mxu0 }
 0x6d9   :  { %v2856_v38 = vmul.f32 %v5405_v27, %v7398_v2  ;;  %v2771_v6 = vpop.f32.mrb[33].mxu0 }
 0x6da   :  { %v2855_v62 = vmul.f32 %v7398_v2, %v2771_v6 }
 0x6db   :  { %v2877_v16 = vadd.f32 %v7403_v50, %v2856_v38 }
 0x6dc   :  { %v2876_v41 = vadd.f32 %v7403_v50, %v2855_v62 }
 0x6dd   :  { %v2893_v48 = vadd.f32 %v2877_v16, %v6880_v51 }
 0x6de   :  { %v2892_v32 = vadd.f32 %v2876_v41, %v6882_v24 }
 0x6df   :  { %v2909_v30 = vmax.f32 %v2893_v48, 0.0 }
 0x6e0   :  { %v7411_v45 = vmax.f32 %v2892_v32, 0.0  ;;  %v5408_v47 = vpop.f32.mrb[34].mxu0 }
 0x6e1   :  { %v2949_v43 = vrot.slane %v2909_v30, 7  ;;  %v3013_v35 = vrot.slane %v2909_v30, 1  ;;  %v2858_v44 = vmul.f32 %v5408_v47, %v7398_v2  ;;  %v2781_v9 = vpop.f32.mrb[35].mxu0 }
 0x6e2   :  { %v2948_v52 = vrot.slane %v7411_v45, 7  ;;  %v3012_v10 = vrot.slane %v7411_v45, 1  ;;  %v2857_v56 = vmul.f32 %v7398_v2, %v2781_v9  ;;  %v5774_v3 = vpack.i.bf16 %v2909_v30, %v7411_v45 }
 0x6e3   :  { %v2879_v51 = vadd.f32 %v7403_v50, %v2858_v44 }
 0x6e4   :  { %v2878_v24 = vadd.f32 %v7403_v50, %v2857_v56  ;;  %5775 = vrot.lane.b32.xlu0 %v5774_v3, %s5894_s15  ;;  %v3014_v0 = vsel %vm8659_vm4, %v3012_v10, %v3013_v35  ;;  %v7425_v28 = vsel %vm8660_vm14, %v2948_v52, %v2949_v43  ;;  %vm8668_vm4 = vmmov %vm8667_vm9 }
 0x6e5   :  { %v2895_v5 = vadd.f32 %v2879_v51, %v6898_v34  ;;  %vm8670_vm14 = vmmov %vm8661_vm0 }
 0x6e6   :  { %v2894_v60 = vadd.f32 %v2878_v24, %v6900_v7 }
 0x6e7   :  { %v2911_v59 = vmax.f32 %v2895_v5, 0.0 }
 0x6e8   :  { %v2910_v12 = vmax.f32 %v2894_v60, 0.0  ;;  %v5411_v31 = vpop.f32.mrb[36].mxu0 }
 0x6e9   :  { %v2953_v15 = vrot.slane %v2911_v59, 7  ;;  %v3017_v57 = vrot.slane %v2911_v59, 1  ;;  %v2860_v11 = vmul.f32 %v5411_v31, %v7398_v2  ;;  %v2791_v1 = vpop.f32.mrb[37].mxu0 }
 0x6ea   :  { %v2951_v20 = vrot.slane %v2910_v12, 7  ;;  %v3015_v21 = vrot.slane %v2910_v12, 1  ;;  %v2859_v27 = vmul.f32 %v7398_v2, %v2791_v1  ;;  %v5779_v38 = vpack.i.bf16 %v2911_v59, %v2910_v12 }
 0x6eb   :  { %v2881_v6 = vadd.f32 %v7403_v50, %v2860_v11 }
 0x6ec   :  { %v2880_v62 = vadd.f32 %v7403_v50, %v2859_v27  ;;  %5780 = vrot.lane.b32.xlu0 %v5779_v38, %s5894_s15  ;;  %v3016_v34 = vsel %vm8661_vm0, %v3013_v35, %v3015_v21  ;;  %v3018_v7 = vsel %vm8662_vm11, %v3015_v21, %v3017_v57  ;;  %v7437_v16 = vsel %vm8663_vm10, %v2949_v43, %v2951_v20 }
 0x6ed   :  { %v2897_v41 = vadd.f32 %v2881_v6, %v6916_v13  ;;  %v3061_v48 = vsel %vm6000_vm1, %v3016_v34, 0.0  ;;  %v7443_v32 = vsel %vm8664_vm15, %v2951_v20, %v2953_v15  ;;  %vm8665_vm1 = vmmov %vm8661_vm0 }
 0x6ee   :  { %v2896_v30 = vadd.f32 %v2880_v62, %v6918_v53  ;;  %v5784_v47 = vpack.i.bf16 %v3061_v48, %v3014_v0  ;;  %vm8674_vm10 = vmmov %vm8665_vm1 }
 0x6ef   :  { %v2913_v44 = vmax.f32 %v2897_v41, 0.0 }
 0x6f0   :  { %v2912_v9 = vmax.f32 %v2896_v30, 0.0  ;;  %v5414_v10 = vpop.f32.mrb[38].mxu0  ;;  %5785 = vrot.lane.b32.xlu1 %v5784_v47, %s5895_s20 }
 0x6f1   :  { %v2957_v35 = vrot.slane %v2913_v44, 7  ;;  %v3021_v56 = vrot.slane %v2913_v44, 1  ;;  %v2862_v43 = vmul.f32 %v5414_v10, %v7398_v2  ;;  %v2801_v3 = vpop.f32.mrb[39].mxu0 }
 0x6f2   :  { %v2955_v13 = vrot.slane %v2912_v9, 7  ;;  %v3019_v51 = vrot.slane %v2912_v9, 1  ;;  %v2861_v18 = vmul.f32 %v7398_v2, %v2801_v3  ;;  %v5789_v24 = vpack.i.bf16 %v2913_v44, %v2912_v9 }
 0x6f3   :  { %v2883_v5 = vadd.f32 %v7403_v50, %v2862_v43 }
 0x6f4   :  { %v2882_v53 = vadd.f32 %v7403_v50, %v2861_v18  ;;  %5790 = vrot.lane.b32.xlu0 %v5789_v24, %s5894_s15  ;;  %v3020_v0 = vsel %vm8665_vm1, %v3017_v57, %v3019_v51  ;;  %v3022_v60 = vsel %vm8666_vm13, %v3019_v51, %v3021_v56  ;;  %v7455_v59 = vsel %vm8667_vm9, %v2953_v15, %v2955_v13 }
 0x6f5   :  { %v2899_v12 = vadd.f32 %v2883_v5, %v6938_v54  ;;  %v3063_v31 = vsel %vm6004_vm2, %v3020_v0, 0.0  ;;  %v7461_v11 = vsel %vm8668_vm4, %v2955_v13, %v2957_v35  ;;  %vm8669_vm2 = vmmov %vm8661_vm0 }
 0x6f6   :  { %v2898_v1 = vadd.f32 %v2882_v53, %v6940_v26  ;;  %v5794_v20 = vpack.i.bf16 %v3063_v31, %v3018_v7  ;;  %vm8671_vm0 = vmmov %vm8668_vm4 }
 0x6f7   :  { %v2915_v21 = vmax.f32 %v2899_v12, 0.0  ;;  %vm8672_vm11 = vmmov %vm8671_vm0 }
 0x6f8   :  { %v2914_v27 = vmax.f32 %v2898_v1, 0.0  ;;  %v5417_v38 = vpop.f32.mrb[40].mxu0  ;;  %5795 = vrot.lane.b32.xlu1 %v5794_v20, %s5895_s20  ;;  %vm8675_vm15 = vmmov %vm8671_vm0 }
 0x6f9   :  { %v2961_v57 = vrot.slane %v2915_v21, 7  ;;  %v3025_v6 = vrot.slane %v2915_v21, 1  ;;  %v2864_v15 = vmul.f32 %v5417_v38, %v7398_v2  ;;  %v2811_v62 = vpop.f32.mrb[41].mxu0  ;;  %vm8678_vm13 = vmmov %vm8669_vm2 }
 0x6fa   :  { %v2959_v54 = vrot.slane %v2914_v27, 7  ;;  %v3023_v34 = vrot.slane %v2914_v27, 1  ;;  %v2863_v19 = vmul.f32 %v7398_v2, %v2811_v62  ;;  %v5799_v41 = vpack.i.bf16 %v2915_v21, %v2914_v27  ;;  %vm8681_vm9 = vmmov %vm8671_vm0 }
 0x6fb   :  { %v2885_v48 = vadd.f32 %v7403_v50, %v2864_v15  ;;  %vm8682_vm4 = vmmov %vm8671_vm0 }
 0x6fc   :  { %v2884_v26 = vadd.f32 %v7403_v50, %v2863_v19  ;;  %5800 = vrot.lane.b32.xlu0 %v5799_v41, %s5894_s15  ;;  %v3024_v7 = vsel %vm8669_vm2, %v3021_v56, %v3023_v34  ;;  %v3026_v30 = vsel %vm8670_vm14, %v3023_v34, %v3025_v6  ;;  %v7473_v47 = vsel %vm8671_vm0, %v2957_v35, %v2959_v54  ;;  %vm8683_vm14 = vmmov %vm8669_vm2 }
 0x6fd   :  { %v2901_v44 = vadd.f32 %v2885_v48, %v6960_v61  ;;  %v3065_v9 = vsel %vm6042_vm3, %v3024_v7, 0.0  ;;  %v7479_v10 = vsel %vm8672_vm11, %v2959_v54, %v2961_v57  ;;  %vm8673_vm3 = vmmov %vm8665_vm1 }
 0x6fe   :  { %v2900_v43 = vadd.f32 %v2884_v26, %v6962_v17  ;;  %v5804_v3 = vpack.i.bf16 %v3065_v9, %v3022_v60  ;;  %vm8676_vm1 = vmmov %vm8671_vm0 }
 0x6ff   :  { %v2917_v13 = vmax.f32 %v2901_v44, 0.0  ;;  %vm8686_vm11 = vmmov %vm8676_vm1 }
 0x700   :  { %v2916_v51 = vmax.f32 %v2900_v43, 0.0  ;;  %v5420_v18 = vpop.f32.mrb[42].mxu0  ;;  %5805 = vrot.lane.b32.xlu1 %v5804_v3, %s5895_s20 }
 0x701   :  { %v2965_v56 = vrot.slane %v2917_v13, 7  ;;  %v3029_v24 = vrot.slane %v2917_v13, 1  ;;  %v2866_v35 = vmul.f32 %v5420_v18, %v7398_v2  ;;  %v2821_v5 = vpop.f32.mrb[43].mxu0 }
 0x702   :  { %v2963_v61 = vrot.slane %v2916_v51, 7  ;;  %v3027_v53 = vrot.slane %v2916_v51, 1  ;;  %v2865_v36 = vmul.f32 %v7398_v2, %v2821_v5  ;;  %v5809_v0 = vpack.i.bf16 %v2917_v13, %v2916_v51 }
 0x703   :  { %v2887_v12 = vadd.f32 %v7403_v50, %v2866_v35 }
 0x704   :  { %v2886_v17 = vadd.f32 %v7403_v50, %v2865_v36  ;;  %5810 = vrot.lane.b32.xlu0 %v5809_v0, %s5894_s15  ;;  %v5423_v60 = vpop.f32.mrb[44].mxu0  ;;  %v3028_v31 = vsel %vm8673_vm3, %v3025_v6, %v3027_v53  ;;  %v3030_v1 = vsel %vm8674_vm10, %v3027_v53, %v3029_v24  ;;  %v7491_v20 = vsel %vm8675_vm15, %v2961_v57, %v2963_v61  ;;  %v8679_v0 = vld [vmem:[#allocation10_spill] sm:$0xff] }
 0x705   :  { %v2903_v21 = vadd.f32 %v2887_v12, %v6984_v22  ;;  %v2868_v27 = vmul.f32 %v5423_v60, %v7398_v2  ;;  %v2831_v38 = vpop.f32.mrb[45].mxu0  ;;  %v3067_v15 = vsel %vm6081_vm5, %v3028_v31, 0.0  ;;  %v7498_v62 = vsel %vm8676_vm1, %v2963_v61, %v2965_v56  ;;  %vm8677_vm5 = vmmov %vm8669_vm2  ;;  %v8680_v60 = vld [vmem:[#allocation11_spill] sm:$0xff] }
 0x706   :  { %v2902_v54 = vadd.f32 %v2886_v17, %v6987_v42  ;;  %v2867_v6 = vmul.f32 %v7398_v2, %v2831_v38  ;;  %v5814_v34 = vpack.i.bf16 %v3067_v15, %v3026_v30  ;;  %vm8690_vm15 = vnez %v8365_v55  ;;  %v3498_v55 = vld [vmem:[%s8281_s1 + $0x80] sm:$0xff] }
 0x707   :  { %v2919_v19 = vmax.f32 %v2903_v21, 0.0  ;;  %v2889_v57 = vadd.f32 %v7403_v50, %v2868_v27 }
 0x708   :  { %v2918_v41 = vmax.f32 %v2902_v54, 0.0  ;;  %v2888_v22 = vadd.f32 %v7403_v50, %v2867_v6  ;;  %5815 = vrot.lane.b32.xlu1 %v5814_v34, %s5895_s20  ;;  %v5426_v48 = vpop.f32.mrb[46].mxu0 }
 0x709   :  { %v3033_v26 = vrot.slane %v2919_v19, 1  ;;  %v2905_v58 = vadd.f32 %v2889_v57, %v7004_v37  ;;  %v2870_v7 = vmul.f32 %v5426_v48, %v7398_v2  ;;  %v2841_v44 = vpop.f32.mrb[47].mxu0  ;;  %v2969_v9 = vrot.slane %v2919_v19, 7 }
 0x70a   :  { %v3031_v42 = vrot.slane %v2918_v41, 1  ;;  %v2904_v43 = vadd.f32 %v2888_v22, %v7006_v33  ;;  %v2869_v30 = vmul.f32 %v7398_v2, %v2841_v44  ;;  %v2967_v3 = vrot.slane %v2918_v41, 7 }
 0x70b   :  { %v2921_v13 = vmax.f32 %v2905_v58, 0.0  ;;  %v2891_v51 = vadd.f32 %v7403_v50, %v2870_v7  ;;  %v5819_v18 = vpack.i.bf16 %v2919_v19, %v2918_v41 }
 0x70c   :  { %v2920_v35 = vmax.f32 %v2904_v43, 0.0  ;;  %v2890_v5 = vadd.f32 %v7403_v50, %v2869_v30  ;;  %v3032_v61 = vsel %vm8677_vm5, %v3029_v24, %v3031_v42  ;;  %v3034_v37 = vsel %vm8678_vm13, %v3031_v42, %v3033_v26 }
 0x70d   :  { %v2973_v53 = vrot.slane %v2921_v13, 7  ;;  %v3037_v36 = vrot.slane %v2921_v13, 1  ;;  %v2907_v12 = vadd.f32 %v2891_v51, %v8679_v0  ;;  %5820 = vrot.lane.b32.xlu0 %v5819_v18, %s5894_s15  ;;  %v3069_v33 = vsel %vm6129_vm6, %v3032_v61, 0.0  ;;  %vm8684_vm6 = vmmov %vm8671_vm0  ;;  %v3499_v51 = vld [vmem:[%s8281_s1 + $0x88] sm:$0xff] }
 0x70e   :  { %v2971_v2 = vrot.slane %v2920_v35, 7  ;;  %v3035_v17 = vrot.slane %v2920_v35, 1  ;;  %v2906_v31 = vadd.f32 %v2890_v5, %v8680_v60  ;;  %v5824_v21 = vpack.i.bf16 %v3069_v33, %v3030_v1  ;;  %vm8685_vm0 = vmmov %vm8669_vm2 }
 0x70f   :  { %v2923_v27 = vmax.f32 %v2907_v12, 0.0  ;;  %v5829_v50 = vpack.i.bf16 %v2921_v13, %v2920_v35  ;;  %v7519_v24 = vsel %vm8681_vm9, %v2965_v56, %v2967_v3  ;;  %v7522_v38 = vsel %vm8682_vm4, %v2967_v3, %v2969_v9  ;;  %vm8687_vm3 = vmmov %vm8685_vm0  ;;  %v2924_v3 = vld [vmem:[%s8284_s4] sm:$0xff] }
 0x710   :  { %v2922_v15 = vmax.f32 %v2906_v31, 0.0  ;;  %5825 = vrot.lane.b32.xlu1 %v5824_v21, %s5895_s20  ;;  %v3036_v54 = vsel %vm8669_vm2, %v3033_v26, %v3035_v17  ;;  %v3038_v23 = vsel %vm8683_vm14, %v3035_v17, %v3037_v36  ;;  %v7531_v56 = vsel %vm8684_vm6, %v2969_v9, %v2971_v2  ;;  %vm8688_vm10 = vmmov %vm8685_vm0  ;;  %5459 = vmatprep.mubr.f32.mxu1 %v2924_v3 }
 0x711   :  { %v2977_v6 = vrot.slane %v2923_v27, 7  ;;  %v3041_v34 = vrot.slane %v2923_v27, 1  ;;  %5830 = vrot.lane.b32.xlu0 %v5829_v50, %s5894_s15  ;;  %v3071_v1 = vsel %vm8475_vm12, %v3036_v54, 0.0  ;;  %v7535_v26 = vsel %vm8686_vm11, %v2971_v2, %v2973_v53  ;;  %vm8689_vm12 = vmmov %vm8676_vm1 }
 0x712   :  { %v2975_v19 = vrot.slane %v2922_v15, 7  ;;  %v3039_v57 = vrot.slane %v2922_v15, 1  ;;  %v5834_v41 = vpack.i.bf16 %v3071_v1, %v3034_v37  ;;  %v5839_v22 = vpack.i.bf16 %v2923_v27, %v2922_v15 }
 0x713   :  { %v3059_v48 = vsel %vm8685_vm0, %v3041_v34, 0.0  ;;  %v5681_v13 = vpack.c.bf16 %v3498_v55, %v3497_v4  ;;  %vm8692_vm5 = vnez %v8369_v14  ;;  %vm8693_vm13 = vcmask 64512  }
 0x714   :  { %5835 = vrot.lane.b32.xlu1 %v5834_v41, %s5895_s20  ;;  %v3040_v58 = vsel %vm8687_vm3, %v3037_v36, %v3039_v57  ;;  %v3042_v7 = vsel %vm8688_vm10, %v3039_v57, %v3041_v34  ;;  %v3075_v39 = vsel %vm8617_vm8, %v3059_v48, 0.0  ;;  %v7543_v44 = vsel %vm8689_vm12, %v2973_v53, %v2975_v19  ;;  %vm8691_vm8 = vmmov %vm8676_vm1 }
 0x715   :  { %5840 = vrot.lane.b32.xlu0 %v5839_v22, %s5894_s15  ;;  %v3073_v9 = vsel %vm8690_vm15, %v3040_v58, 0.0  ;;  %v5849_v42 = vpack.i.bf16 %v3075_v39, %v3042_v7  ;;  %v7549_v43 = vsel %vm8676_vm1, %v2975_v19, %v2977_v6  ;;  %5682 = vmatprep.subr.bf16.mxu0 %v5681_v13  ;;  %v2995_v35 = vsel %vm8691_vm8, 0.0, %v2948_v52  ;;  %vm8694_vm9 = vmmov %vm8693_vm13 }
 0x716   :  { %v5844_v30 = vpack.i.bf16 %v3073_v9, %v3038_v23  ;;  %5684 = vmatpush3.bf16.msra.mxu0 %v5681_v13  ;;  %v2996_v53 = vsel %vm8692_vm5, %v2995_v35, 0.0  ;;  %vm8695_vm4 = vcmask 130048   ;;  %vm8697_vm14 = vnez %v8372_v40  ;;  %vm8698_vm6 = vmmov %vm8694_vm9 }
 0x717   :  { %5489 = vmatprep.subr.mxu0 %v3499_v51  ;;  %vm8696_vm2 = vmmov %vm8695_vm4  ;;  %v2998_v14 = vsel %vm8697_vm14, %v7437_v16, 0.0  ;;  %vm8702_vm10 = vnez %v8375_v49  ;;  %vm8707_vm5 = vnez %v8378_v8  ;;  %vm8712_vm14 = vnez %v8380_v29 }
 0x718   :  { %5845 = vrot.lane.b32.xlu1 %v5844_v30, %s5895_s20  ;;  %vm8699_vm0 = vmmov %vm8698_vm6  ;;  %v3000_v40 = vsel %vm8702_vm10, %v7455_v59, 0.0  ;;  %v3002_v49 = vsel %vm8707_vm5, %v7473_v47, 0.0  ;;  %v3004_v47 = vsel %vm8712_vm14, %v7491_v20, 0.0  ;;  %vm8716_vm10 = vnez %v8382_v46 }
 0x719   :  { %vm8700_vm11 = vmmov %vm8696_vm2  ;;  %v3006_v29 = vsel %vm8716_vm10, %v7519_v24, 0.0  ;;  %vm8720_vm5 = vnez %v8384_v63  ;;  %v3010_v63 = vsel %vm8510_vm7, %v7543_v44, 0.0  ;;  %v2926_v44 = vld [vmem:[%s8284_s4 + $0x10] sm:$0xff]  ;;  %vm8729_vm7 = vcmask 195584  }
 0x71a   :  { %5490 = vmatpush3.msra.mxu0 %v3499_v51  ;;  %vm8701_vm3 = vmmov %vm8696_vm2  ;;  %v3008_v46 = vsel %vm8720_vm5, %v7531_v56, 0.0 }
 0x71b   :  { %vm8703_vm12 = vmmov %vm8699_vm0 }
 0x71c   :  { %5850 = vrot.lane.b32.xlu1 %v5849_v42, %s5895_s20  ;;  %vm8704_vm15 = vmmov %vm8699_vm0 }
 0x71d   :  { %vm8705_vm1 = vmmov %vm8696_vm2 }
 0x71e   :  { %vm8706_vm8 = vmmov %vm8705_vm1 }
 0x71f   :  { %vm8725_vm14 = vmmov %vm8699_vm0 }
 0x756   :  { %v5776_v18 = vpop.permute.xlu0 %5775 }
 0x757   :  { %v5778_v5 = vunpack.i.h.bf16 %v5776_v18  ;;  %v5777_v61 = vunpack.i.l.bf16 %v5776_v18 }
 0x759   :  { %v3189_v12 = vsel %vm8693_vm13, %v7425_v28, %v5778_v5  ;;  %v3188_v33 = vsel %vm8694_vm9, %v2996_v53, %v5777_v61  ;;  %vm8708_vm13 = vmmov %vm8699_vm0 }
 0x75a   :  { %vm8709_vm9 = vmmov %vm8699_vm0 }
 0x75e   :  { %v5781_v2 = vpop.permute.xlu0 %5780 }
 0x75f   :  { %v5783_v52 = vunpack.i.h.bf16 %v5781_v2  ;;  %v5782_v31 = vunpack.i.l.bf16 %v5781_v2 }
 0x761   :  { %v3191_v28 = vsel %vm8698_vm6, %v7443_v32, %v5783_v52  ;;  %v3190_v15 = vsel %vm8699_vm0, %v2998_v14, %v5782_v31  ;;  %vm8713_vm6 = vmmov %vm8699_vm0 }
 0x762   :  { %v5786_v37 = vpop.permute.xlu1 %5785 }
 0x763   :  { %v5788_v36 = vunpack.i.h.bf16 %v5786_v37  ;;  %v5787_v0 = vunpack.i.l.bf16 %v5786_v37 }
 0x765   :  { %v3204_v17 = vsel %vm8695_vm4, %v3188_v33, %v5787_v0  ;;  %v3205_v45 = vsel %vm8696_vm2, %v3189_v12, %v5788_v36  ;;  %vm8710_vm4 = vmmov %vm8705_vm1 }
 0x766   :  { %v5649_v60 = vpack.c.bf16 %v3205_v45, %v3204_v17  ;;  %v5791_v54 = vpop.permute.xlu0 %5790  ;;  %vm8711_vm2 = vmmov %vm8705_vm1 }
 0x767   :  { %v5793_v1 = vunpack.i.h.bf16 %v5791_v54  ;;  %v5792_v19 = vunpack.i.l.bf16 %v5791_v54 }
 0x768   :  { %5650 = vmatprep.subr.bf16.mxu1 %v5649_v60 }
 0x769   :  { %5652 = vmatpush3.bf16.msra.mxu1 %v5649_v60  ;;  %v3193_v32 = vsel %vm8703_vm12, %v7461_v11, %v5793_v1  ;;  %v3192_v22 = vsel %vm8704_vm15, %v3000_v40, %v5792_v19  ;;  %vm8717_vm12 = vmmov %vm8699_vm0 }
 0x76a   :  { %v5796_v21 = vpop.permute.xlu1 %5795  ;;  %vm8718_vm15 = vmmov %vm8699_vm0 }
 0x76b   :  { %v5798_v27 = vunpack.i.h.bf16 %v5796_v21  ;;  %v5797_v50 = vunpack.i.l.bf16 %v5796_v21 }
 0x76d   :  { %v3206_v23 = vsel %vm8700_vm11, %v3190_v15, %v5797_v50  ;;  %v3207_v6 = vsel %vm8701_vm3, %v3191_v28, %v5798_v27  ;;  %vm8714_vm11 = vmmov %vm8705_vm1 }
 0x76e   :  { %v5653_v34 = vpack.c.bf16 %v3207_v6, %v3206_v23  ;;  %v5801_v48 = vpop.permute.xlu0 %5800  ;;  %vm8715_vm3 = vmmov %vm8705_vm1 }
 0x76f   :  { %v5803_v9 = vunpack.i.h.bf16 %v5801_v48  ;;  %v5802_v42 = vunpack.i.l.bf16 %v5801_v48 }
 0x770   :  { %5654 = vmatprep.subr.bf16.mxu1 %v5653_v34 }
 0x771   :  { %5656 = vmatpush3.bf16.msra.mxu1 %v5653_v34  ;;  %v3195_v4 = vsel %vm8708_vm13, %v7479_v10, %v5803_v9  ;;  %v3194_v55 = vsel %vm8709_vm9, %v3002_v49, %v5802_v42  ;;  %vm8721_vm13 = vmmov %vm8699_vm0  ;;  %v2930_v9 = vld [vmem:[%s8284_s4 + $0x30] sm:$0xff]  ;;  %v2931_v42 = vld [vmem:[%s8284_s4 + $0x38] sm:$0xff] }
 0x772   :  { %v5806_v57 = vpop.permute.xlu1 %5805  ;;  %vm8722_vm9 = vmmov %vm8699_vm0 }
 0x773   :  { %v5808_v16 = vunpack.i.h.bf16 %v5806_v57  ;;  %v5807_v41 = vunpack.i.l.bf16 %v5806_v57 }
 0x775   :  { %v3208_v58 = vsel %vm8705_vm1, %v3192_v22, %v5807_v41  ;;  %v3209_v7 = vsel %vm8706_vm8, %v3193_v32, %v5808_v16  ;;  %vm8719_vm8 = vmmov %vm8705_vm1 }
 0x776   :  { %v5657_v39 = vpack.c.bf16 %v3209_v7, %v3208_v58  ;;  %v5811_v59 = vpop.permute.xlu0 %5810  ;;  %v2928_v7 = vld [vmem:[%s8284_s4 + $0x20] sm:$0xff] }
 0x777   :  { %v5813_v5 = vunpack.i.h.bf16 %v5811_v59  ;;  %v5812_v61 = vunpack.i.l.bf16 %v5811_v59 }
 0x778   :  { %5658 = vmatprep.subr.bf16.mxu1 %v5657_v39 }
 0x779   :  { %5660 = vmatpush3.bf16.msra.mxu1 %v5657_v39  ;;  %v3197_v36 = vsel %vm8713_vm6, %v7498_v62, %v5813_v5  ;;  %v3196_v0 = vsel %vm8699_vm0, %v3004_v47, %v5812_v61  ;;  %vm8726_vm6 = vmmov %vm8699_vm0  ;;  %v2929_v39 = vld [vmem:[%s8284_s4 + $0x28] sm:$0xff] }
 0x77a   :  { %v5816_v30 = vpop.permute.xlu1 %5815  ;;  %vm8727_vm0 = vmmov %vm8705_vm1 }
 0x77b   :  { %v5818_v3 = vunpack.i.h.bf16 %v5816_v30  ;;  %v5817_v11 = vunpack.i.l.bf16 %v5816_v30  ;;  %v3325_v30 = vld [vmem:[%s8281_s1 + $0xc0] sm:$0xff] }
 0x77d   :  { %v3210_v13 = vsel %vm8710_vm4, %v3194_v55, %v5817_v11  ;;  %v3211_v51 = vsel %vm8711_vm2, %v3195_v4, %v5818_v3  ;;  %vm8723_vm4 = vmmov %vm8705_vm1 }
 0x77e   :  { %v5661_v18 = vpack.c.bf16 %v3211_v51, %v3210_v13  ;;  %vm8724_vm2 = vmmov %vm8705_vm1 }
 0x77f   :  { %v5821_v35 = vpop.permute.xlu0 %5820 }
 0x780   :  { %5662 = vmatprep.subr.bf16.mxu1 %v5661_v18  ;;  %v5823_v12 = vunpack.i.h.bf16 %v5821_v35  ;;  %v5822_v33 = vunpack.i.l.bf16 %v5821_v35 }
 0x781   :  { %5664 = vmatpush3.bf16.msra.mxu1 %v5661_v18 }
 0x782   :  { %v5826_v8 = vpop.permute.xlu1 %5825  ;;  %v3199_v31 = vsel %vm8717_vm12, %v7522_v38, %v5823_v12  ;;  %v3198_v62 = vsel %vm8718_vm15, %v3006_v29, %v5822_v33  ;;  %v3858_v33 = vld [vmem:[%s8281_s1 + $0xa0] sm:$0xff] }
 0x783   :  { %v5831_v37 = vpop.permute.xlu0 %5830  ;;  %v5828_v53 = vunpack.i.h.bf16 %v5826_v8  ;;  %v5827_v10 = vunpack.i.l.bf16 %v5826_v8 }
 0x784   :  { %v5833_v21 = vunpack.i.h.bf16 %v5831_v37  ;;  %v5832_v14 = vunpack.i.l.bf16 %v5831_v37 }
 0x785   :  { %v3212_v2 = vsel %vm8714_vm11, %v3196_v0, %v5827_v10  ;;  %v3213_v17 = vsel %vm8715_vm3, %v3197_v36, %v5828_v53  ;;  %vm8728_vm11 = vmmov %vm8727_vm0  ;;  %v7674_v10 = vld [vmem:[%s8282_s2 + $0x5] ss:$0 sm:$0xff]  ;;  %v3856_v36 = vld [vmem:[%s8281_s1 + $0x90] sm:$0xff] }
 0x786   :  { %v5836_v45 = vpop.permute.xlu1 %5835  ;;  %v5665_v60 = vpack.c.bf16 %v3213_v17, %v3212_v2  ;;  %v3200_v38 = vsel %vm8721_vm13, %v3008_v46, %v5832_v14  ;;  %v3201_v6 = vsel %vm8722_vm9, %v7535_v26, %v5833_v21  ;;  %vm8730_vm3 = vmmov %vm8729_vm7  ;;  %v3857_v0 = vld [vmem:[%s8281_s1 + $0x98] sm:$0xff]  ;;  %v3859_v2 = vld [vmem:[%s8281_s1 + $0xa8] sm:$0xff] }
 0x787   :  { %v5838_v20 = vunpack.i.h.bf16 %v5836_v45  ;;  %v5837_v52 = vunpack.i.l.bf16 %v5836_v45  ;;  %v5841_v27 = vpop.permute.xlu0 %5840  ;;  %vm8731_vm10 = vmmov %vm8730_vm3  ;;  %v5685_v12 = vpack.c.bf16 %v3857_v0, %v3856_v36  ;;  %v7691_v45 = vld [vmem:[%s8283_s3 + $0x5] ss:$0 sm:$0xff]  ;;  %v3861_v21 = vld [vmem:[%s8281_s1 + $0xb8] sm:$0xff] }
 0x788   :  { %5666 = vmatprep.subr.bf16.mxu1 %v5665_v60  ;;  %v5843_v34 = vunpack.i.h.bf16 %v5841_v27  ;;  %v5842_v1 = vunpack.i.l.bf16 %v5841_v27  ;;  %vm8732_vm12 = vmmov %vm8730_vm3 }
 0x789   :  { %5668 = vmatpush3.bf16.msra.mxu1 %v5665_v60  ;;  %v3214_v50 = vsel %vm8705_vm1, %v3198_v62, %v5837_v52  ;;  %v3215_v28 = vsel %vm8719_vm8, %v3199_v31, %v5838_v20  ;;  %vm8733_vm15 = vmmov %vm8730_vm3  ;;  %v5689_v60 = vpack.c.bf16 %v3859_v2, %v3858_v33  ;;  %v3860_v62 = vld [vmem:[%s8281_s1 + $0xb0] sm:$0xff] }
 0x78a   :  { %v5846_v15 = vpop.permute.xlu1 %5845  ;;  %v5669_v54 = vpack.c.bf16 %v3215_v28, %v3214_v50  ;;  %v3202_v32 = vsel %vm8725_vm14, %v3010_v63, %v5842_v1  ;;  %v3203_v26 = vsel %vm8726_vm6, %v7549_v43, %v5843_v34  ;;  %v2927_v43 = vld [vmem:[%s8284_s4 + $0x18] sm:$0xff]  ;;  %vm8734_vm1 = vmmov %vm8730_vm3  ;;  %v8745_v50 = vld [vmem:[#allocation2_spill] sm:$0xff] }
 0x78b   :  { %v5848_v24 = vunpack.i.h.bf16 %v5846_v15  ;;  %v5847_v23 = vunpack.i.l.bf16 %v5846_v15  ;;  %vm8735_vm8 = vmmov %vm8734_vm1  ;;  %v3655_v28 = vand.u32 7, %v8745_v50  ;;  %v5693_v15 = vpack.c.bf16 %v3861_v21, %v3860_v62 }
 0x78c   :  { %5670 = vmatprep.subr.bf16.mxu1 %v5669_v54  ;;  %vm8736_vm5 = vmmov %vm8734_vm1 }
 0x78d   :  { %5672 = vmatpush3.bf16.msra.mxu1 %v5669_v54  ;;  %v3216_v19 = vsel %vm8723_vm4, %v3200_v38, %v5847_v23  ;;  %v3217_v57 = vsel %vm8724_vm2, %v3201_v6, %v5848_v24  ;;  %vm8737_vm13 = vmmov %vm8726_vm6 }
 0x78e   :  { %v5851_v40 = vpop.permute.xlu1 %5850  ;;  %v5673_v16 = vpack.c.bf16 %v3217_v57, %v3216_v19  ;;  %vm8738_vm9 = vmmov %vm8726_vm6 }
 0x78f   :  { %v5853_v56 = vunpack.i.h.bf16 %v5851_v40  ;;  %v5852_v41 = vunpack.i.l.bf16 %v5851_v40  ;;  %vm8739_vm4 = vmmov %vm8726_vm6 }
 0x790   :  { %5674 = vmatprep.subr.bf16.mxu1 %v5673_v16  ;;  %vm8740_vm2 = vmmov %vm8739_vm4 }
 0x791   :  { %5676 = vmatpush3.bf16.msra.mxu1 %v5673_v16  ;;  %v3218_v22 = vsel %vm8727_vm0, %v3202_v32, %v5852_v41  ;;  %v3219_v48 = vsel %vm8728_vm11, %v3203_v26, %v5853_v56  ;;  %vm8741_vm14 = vmmov %vm8740_vm2 }
 0x792   :  { %v5677_v58 = vpack.c.bf16 %v3219_v48, %v3218_v22  ;;  %vm8742_vm6 = vmmov %vm8740_vm2 }
 0x793   :  { %vm8743_vm0 = vmmov %vm8740_vm2 }
 0x794   :  { %5678 = vmatprep.subr.bf16.mxu1 %v5677_v58  ;;  %vm8744_vm11 = vmmov %vm8743_vm0 }
 0x795   :  { %5680 = vmatpush3.bf16.msra.mxu1 %v5677_v58 }
 0x796   :  { %5471 = vmatprep.subr.mxu1 %v3325_v30 }
 0x798   :  { %5460 = vmatmul.mubr.f32.vlgmr.msra.gmra.mrb[32].mxu1 %v2925_v25 }
 0x799   :  { %5462 = vmatprep.mubr.f32.mxu1 %v2926_v44  ;;  %5472 = vmatpush3.msra.mxu1 %v3325_v30 }
 0x79a   :  { %5686 = vmatprep.subr.bf16.mxu1 %v5685_v12 }
 0x79c   :  { %5463 = vmatmul.mubr.f32.gmra.mrb[34].mxu1 %v2927_v43 }
 0x79d   :  { %5465 = vmatprep.mubr.f32.mxu1 %v2928_v7  ;;  %v8750_v7 = vld [vmem:[#allocation7_spill] sm:$0xff] }
 0x7a0   :  { %5466 = vmatmul.mubr.f32.gmra.mrb[36].mxu1 %v2929_v39  ;;  %v3657_v39 = vand.u32 7, %v8750_v7 }
 0x7a1   :  { %5468 = vmatprep.mubr.f32.mxu1 %v2930_v9 }
 0x7a4   :  { %5469 = vmatmul.mubr.f32.gmra.mrb[38].mxu1 %v2931_v42 }
 0x86b   :  { %v5461_v49 = vpop.f32.mrb[32].mxu1 }
 0x86c   :  { %3336 = vrot.lane.b32.xlu1 %v5461_v49, %s5896_s16  ;;  %v3286_v59 = vpop.f32.mrb[33].mxu1 }
 0x86d   :  { %3334 = vrot.lane.b32.xlu0 %v3286_v59, %s5896_s16  ;;  %5491 = vmatprep.mubr.msk.f32.mxu0 %vm8729_vm7, %v3286_v59  ;;  %vm7717_vm7 = vcmp.ne.s32.totalorder %v3655_v28, 7 }
 0x86e   :  { %5492 = vmatmul.mubr.msk.f32.vlgmr.msra.gmra.mrb[48].mxu0 %vm8730_vm3, %v5461_v49  ;;  %vm8748_vm3 = vcmask 1046528   ;;  %v8751_v49 = vld [vmem:[#allocation3_spill] sm:$0xff] }
 0x86f   :  { %v5464_v3 = vpop.f32.mrb[34].mxu1  ;;  %v3656_v59 = vand.u32 7, %v8751_v49 }
 0x870   :  { %v3296_v11 = vpop.f32.mrb[35].mxu1  ;;  %3340 = vrot.lane.b32.xlu1 %v5464_v3, %s5896_s16 }
 0x871   :  { %3338 = vrot.lane.b32.xlu0 %v3296_v11, %s5896_s16  ;;  %5494 = vmatprep.mubr.msk.f32.mxu0 %vm8731_vm10, %v3296_v11  ;;  %vm8749_vm10 = vcmask 1040384  }
 0x872   :  { %5495 = vmatmul.mubr.msk.f32.gmra.mrb[50].mxu0 %vm8732_vm12, %v5464_v3  ;;  %vm8752_vm12 = vmmov %vm8748_vm3 }
 0x873   :  { %v5467_v4 = vpop.f32.mrb[36].mxu1 }
 0x874   :  { %v3306_v55 = vpop.f32.mrb[37].mxu1  ;;  %3344 = vrot.lane.b32.xlu1 %v5467_v4, %s5896_s16 }
 0x875   :  { %3342 = vrot.lane.b32.xlu0 %v3306_v55, %s5896_s16  ;;  %5497 = vmatprep.mubr.msk.f32.mxu0 %vm8733_vm15, %v3306_v55  ;;  %vm8753_vm15 = vmmov %vm8748_vm3 }
 0x876   :  { %5498 = vmatmul.mubr.msk.f32.gmra.mrb[52].mxu0 %vm8734_vm1, %v5467_v4  ;;  %vm7745_vm1 = vcmp.ne.s32.totalorder %v3656_v59, 7 }
 0x877   :  { %v5470_v13 = vpop.f32.mrb[38].mxu1 }
 0x878   :  { %v3316_v51 = vpop.f32.mrb[39].mxu1  ;;  %3348 = vrot.lane.b32.xlu1 %v5470_v13, %s5896_s16 }
 0x879   :  { %5500 = vmatprep.mubr.msk.f32.mxu0 %vm8735_vm8, %v3316_v51  ;;  %3346 = vrot.lane.b32.xlu0 %v3316_v51, %s5896_s16  ;;  %vm7751_vm8 = vcmp.ne.s32.totalorder %v3657_v39, 7 }
 0x87a   :  { %5501 = vmatmul.mubr.msk.f32.gmra.mrb[54].mxu0 %vm8736_vm5, %v5470_v13  ;;  %vm8758_vm5 = vmmov %vm8749_vm10 }
 0x8de   :  { %v3337_v18 = vpop.permute.xlu1 %3336 }
 0x8df   :  { %v3335_v35 = vpop.permute.xlu0 %3334 }
 0x8e0   :  { %5473 = vmatprep.mubr.msk.f32.mxu1 %vm8737_vm13, %v3335_v35  ;;  %vm8759_vm13 = vmmov %vm8758_vm5 }
 0x8e1   :  { %5474 = vmatmul.mubr.msk.f32.vlgmr.msra.gmra.mrb[40].mxu1 %vm8738_vm9, %v3337_v18  ;;  %vm8760_vm9 = vmmov %vm8748_vm3 }
 0x8e2   :  { %v3341_v5 = vpop.permute.xlu1 %3340  ;;  %5688 = vmatpush3.bf16.msra.mxu1 %v5685_v12 }
 0x8e3   :  { %v3339_v61 = vpop.permute.xlu0 %3338  ;;  %5690 = vmatprep.subr.bf16.mxu1 %v5689_v60 }
 0x8e4   :  { %5476 = vmatprep.mubr.msk.f32.mxu1 %vm8739_vm4, %v3339_v61  ;;  %vm8761_vm4 = vmmov %vm8748_vm3 }
 0x8e5   :  { %5477 = vmatmul.mubr.msk.f32.gmra.mrb[42].mxu1 %vm8740_vm2, %v3341_v5  ;;  %vm8763_vm2 = vmmov %vm8758_vm5 }
 0x8e6   :  { %v3345_v8 = vpop.permute.xlu1 %3344  ;;  %5692 = vmatpush3.bf16.msra.mxu1 %v5689_v60 }
 0x8e7   :  { %v3343_v47 = vpop.permute.xlu0 %3342  ;;  %5694 = vmatprep.subr.bf16.mxu1 %v5693_v15 }
 0x8e8   :  { %5479 = vmatprep.mubr.msk.f32.mxu1 %vm8741_vm14, %v3343_v47  ;;  %vm8765_vm14 = vmmov %vm8763_vm2 }
 0x8e9   :  { %5480 = vmatmul.mubr.msk.f32.gmra.mrb[44].mxu1 %vm8742_vm6, %v3345_v8  ;;  %vm8766_vm6 = vmmov %vm8748_vm3 }
 0x8ea   :  { %v3349_v37 = vpop.permute.xlu1 %3348  ;;  %5696 = vmatpush3.bf16.msra.mxu1 %v5693_v15 }
 0x8eb   :  { %v3347_v53 = vpop.permute.xlu0 %3346 }
 0x8ec   :  { %5482 = vmatprep.mubr.msk.f32.mxu1 %vm8743_vm0, %v3347_v53  ;;  %vm8767_vm0 = vmmov %vm8748_vm3 }
 0x8ed   :  { %5483 = vmatmul.mubr.msk.f32.gmra.mrb[46].mxu1 %vm8744_vm11, %v3349_v37  ;;  %vm8768_vm11 = vmmov %vm8763_vm2 }
 0x941   :  { %v5493_v17 = vpop.f32.mrb[48].mxu0 }
 0x942   :  { %v3627_v29 = vmul.f32 %v5493_v17, %v7674_v10  ;;  %v3582_v20 = vpop.f32.mrb[49].mxu0 }
 0x943   :  { %v3626_v52 = vmul.f32 %v7674_v10, %v3582_v20 }
 0x944   :  { %v3640_v31 = vadd.f32 %v7691_v45, %v3627_v29 }
 0x945   :  { %v3639_v14 = vadd.f32 %v7691_v45, %v3626_v52  ;;  %v5496_v27 = vpop.f32.mrb[50].mxu0 }
 0x946   :  { %v3648_v54 = vmax.f32 %v3640_v31, 0.0  ;;  %v3629_v46 = vmul.f32 %v5496_v27, %v7674_v10  ;;  %v3592_v24 = vpop.f32.mrb[51].mxu0 }
 0x947   :  { %v7705_v23 = vmax.f32 %v3639_v14, 0.0  ;;  %v3628_v38 = vmul.f32 %v7674_v10, %v3592_v24  ;;  %v8762_v14 = vld [vmem:[#allocation8_spill] sm:$0xff] }
 0x948   :  { %v3688_v6 = vrot.slane %v3648_v54, 7  ;;  %v3736_v34 = vrot.slane %v3648_v54, 1  ;;  %v3642_v1 = vadd.f32 %v7691_v45, %v3629_v46  ;;  %3785 = vrot.lane.b32.xlu1 %v3648_v54, %s5895_s20  ;;  %v3659_v27 = vand.u32 7, %v8762_v14  ;;  %v8764_v54 = vld [vmem:[#allocation4_spill] sm:$0xff] }
 0x949   :  { %v3687_v19 = vrot.slane %v7705_v23, 7  ;;  %v3735_v57 = vrot.slane %v7705_v23, 1  ;;  %v3641_v40 = vadd.f32 %v7691_v45, %v3628_v38  ;;  %v5499_v16 = vpop.f32.mrb[52].mxu0  ;;  %3783 = vrot.lane.b32.xlu0 %v7705_v23, %s5895_s20  ;;  %v3658_v46 = vand.u32 7, %v8764_v54 }
 0x94a   :  { %v3650_v56 = vmax.f32 %v3642_v1, 0.0  ;;  %v3631_v41 = vmul.f32 %v5499_v16, %v7674_v10  ;;  %v3602_v32 = vpop.f32.mrb[53].mxu0  ;;  %v8774_v16 = vld [vmem:[#allocation5_spill] sm:$0xff] }
 0x94b   :  { %v3649_v26 = vmax.f32 %v3641_v40, 0.0  ;;  %v3630_v22 = vmul.f32 %v7674_v10, %v3602_v32  ;;  %v3737_v48 = vsel %vm8748_vm3, %v3735_v57, %v3736_v34  ;;  %v7727_v58 = vsel %vm8749_vm10, %v3687_v19, %v3688_v6 }
 0x94c   :  { %v3740_v25 = vrot.slane %v3650_v56, 1  ;;  %v3644_v44 = vadd.f32 %v7691_v45, %v3631_v41  ;;  %3789 = vrot.lane.b32.xlu1 %v3650_v56, %s5895_s20  ;;  %v3775_v43 = vsel %vm7717_vm7, %v3737_v48, 0.0  ;;  %v3692_v3 = vrot.slane %v3650_v56, 7 }
 0x94d   :  { %v3738_v9 = vrot.slane %v3649_v26, 1  ;;  %v3643_v42 = vadd.f32 %v7691_v45, %v3630_v22  ;;  %3815 = vrot.lane.b32.xlu0 %v3775_v43, %s5897_s10  ;;  %v5502_v30 = vpop.f32.mrb[54].mxu0  ;;  %v3690_v11 = vrot.slane %v3649_v26, 7  ;;  %vm7785_vm3 = vcmp.ne.s32.totalorder %v3658_v46, 7  ;;  %v8777_v22 = vld [vmem:[#allocation6_spill] sm:$0xff] }
 0x94e   :  { %v3652_v4 = vmax.f32 %v3644_v44, 0.0  ;;  %v3633_v55 = vmul.f32 %v5502_v30, %v7674_v10  ;;  %v3612_v13 = vpop.f32.mrb[55].mxu0  ;;  %vm7792_vm10 = vcmp.ne.s32.totalorder %v3659_v27, 7  ;;  %v3660_v56 = vand.u32 7, %v8774_v16  ;;  %v8778_v44 = vld [vmem:[#allocation9_spill] sm:$0xff] }
 0x94f   :  { %v3651_v51 = vmax.f32 %v3643_v42, 0.0  ;;  %v3632_v18 = vmul.f32 %v7674_v10, %v3612_v13  ;;  %v3739_v35 = vsel %vm8752_vm12, %v3736_v34, %v3738_v9  ;;  %v3741_v5 = vsel %vm8753_vm15, %v3738_v9, %v3740_v25  ;;  %vm8773_vm12 = vmmov %vm8763_vm2  ;;  %v4034_v9 = vld [vmem:[%s8285_s5] sm:$0xff] }
 0x950   :  { %v3744_v61 = vrot.slane %v3652_v4, 1  ;;  %v3646_v8 = vadd.f32 %v7691_v45, %v3633_v55  ;;  %3793 = vrot.lane.b32.xlu1 %v3652_v4, %s5895_s20  ;;  %v3696_v53 = vrot.slane %v3652_v4, 7  ;;  %v7758_v33 = vsel %vm8758_vm5, %v3690_v11, %v3692_v3 }
 0x951   :  { %v3694_v10 = vrot.slane %v3651_v51, 7  ;;  %v3742_v36 = vrot.slane %v3651_v51, 1  ;;  %v3645_v0 = vadd.f32 %v7691_v45, %v3632_v18  ;;  %3787 = vrot.lane.b32.xlu0 %v3649_v26, %s5895_s20  ;;  %v7761_v2 = vsel %vm8759_vm13, %v3688_v6, %v3690_v11  ;;  %vm8781_vm13 = vmmov %vm8767_vm0 }
 0x952   :  { %v3654_v12 = vmax.f32 %v3646_v8, 0.0  ;;  %v3776_v60 = vsel %vm7745_vm1, %v3739_v35, 0.0  ;;  %v3777_v45 = vsel %vm7751_vm8, %v3741_v5, 0.0  ;;  %vm7805_vm15 = vcmp.ne.s32.totalorder %v3660_v56, 7 }
 0x953   :  { %v3653_v17 = vmax.f32 %v3645_v0, 0.0  ;;  %v3743_v29 = vsel %vm8760_vm9, %v3740_v25, %v3742_v36  ;;  %v3745_v20 = vsel %vm8761_vm4, %v3742_v36, %v3744_v61  ;;  %v7773_v15 = vsel %vm8763_vm2, %v3694_v10, %v3696_v53 }
 0x954   :  { %v3700_v52 = vrot.slane %v3654_v12, 7  ;;  %3817 = vrot.lane.b32.xlu1 %v3776_v60, %s5897_s10  ;;  %v3748_v31 = vrot.slane %v3654_v12, 1  ;;  %v7777_v24 = vsel %vm8765_vm14, %v3692_v3, %v3694_v10  ;;  %v3778_v41 = vsel %vm7785_vm3, %v3743_v29, 0.0 }
 0x955   :  { %v3698_v62 = vrot.slane %v3653_v17, 7  ;;  %v3746_v21 = vrot.slane %v3653_v17, 1  ;;  %3819 = vrot.lane.b32.xlu0 %v3777_v45, %s5897_s10  ;;  %v3779_v32 = vsel %vm7792_vm10, %v3745_v20, 0.0  ;;  %v3662_v48 = vand.u32 7, %v8777_v22 }
 0x956   :  { %v3661_v43 = vand.u32 7, %v8778_v44  ;;  %v3758_v42 = vsel %vm8781_vm13, %v3748_v31, 0.0  ;;  %vm7845_vm4 = vcmp.ne.s32.totalorder %v3655_v28, 0  ;;  %v8784_v35 = vmov 0 }
 0x957   :  { %v3747_v38 = vsel %vm8766_vm6, %v3744_v61, %v3746_v21  ;;  %v3749_v6 = vsel %vm8767_vm0, %v3746_v21, %v3748_v31  ;;  %v7782_v34 = vsel %vm8768_vm11, %v3698_v62, %v3700_v52  ;;  %v7797_v40 = vsel %vm8773_vm12, %v3696_v53, %v3698_v62 }
 0x958   :  { %3797 = vrot.lane.b32.xlu1 %v3654_v12, %s5895_s20  ;;  %v3780_v25 = vsel %vm7805_vm15, %v3747_v38, 0.0  ;;  %vm7817_vm5 = vcmp.ne.s32.totalorder %v3662_v48, 7  ;;  %vm7825_vm9 = vcmp.ne.s32.totalorder %v3661_v43, 7  ;;  %v8785_v35 = vsel %vm7845_vm4, 4294967295, %v8784_v35 }
 0x959   :  { %3791 = vrot.lane.b32.xlu0 %v3651_v51, %s5895_s20  ;;  %v3782_v3 = vsel %vm7817_vm5, %v3758_v42, 0.0  ;;  %v3781_v11 = vsel %vm7825_vm9, %v3749_v6, 0.0  ;;  %v3710_v5 = vsel %vm8763_vm2, 0.0, %v3687_v19  ;;  %vm8339_vm14 = vcmask 261120  }
 0x95a   :  { %v3727_v10 = vsel %vm7845_vm4, %v3710_v5, 0.0  ;;  %vm8340_vm6 = vcmask 392192   ;;  %vm8786_vm0 = vcmask 130048   ;;  %vm7867_vm11 = vcmp.ne.s32.totalorder %v3656_v59, 0 }
 0x95b   :  { %v8787_v19 = vmov 0  ;;  %vm7873_vm12 = vcmp.ne.s32.totalorder %v3657_v39, 0  ;;  %v8789_v29 = vmov 0  ;;  %v3728_v52 = vsel %vm7867_vm11, %v7727_v58, 0.0  ;;  %vm8791_vm13 = vmmov %vm8786_vm0 }
 0x95c   :  { %3821 = vrot.lane.b32.xlu1 %v3778_v41, %s5897_s10  ;;  %v8788_v19 = vsel %vm7867_vm11, 4294967295, %v8787_v19  ;;  %v8790_v29 = vsel %vm7873_vm12, 4294967295, %v8789_v29  ;;  %v3729_v59 = vsel %vm7873_vm12, %v7761_v2, 0.0  ;;  %vm8792_vm2 = vmmov %vm8786_vm0  ;;  %v8793_v58 = vmov 0 }
 0x95d   :  { %3823 = vrot.lane.b32.xlu0 %v3779_v32, %s5897_s10  ;;  %v8795_v2 = vmov 0  ;;  %vm8800_vm12 = vcmask 261120   ;;  %vm8802_vm4 = vcmask 392192  }
 0x95e   :  { %vm8801_vm11 = vmmov %vm8800_vm12 }
 0x960   :  { %3825 = vrot.lane.b32.xlu1 %v3780_v25, %s5897_s10  ;;  %v8797_v25 = vmov 0 }
 0x961   :  { %3795 = vrot.lane.b32.xlu0 %v3653_v17, %s5895_s20 }
 0x964   :  { %3829 = vrot.lane.b32.xlu1 %v3782_v3, %s5897_s10 }
 0x965   :  { %3827 = vrot.lane.b32.xlu0 %v3781_v11, %s5897_s10 }
 0x9b4   :  { %v7835_v4 = vpop.f32.mrb[40].mxu1 }
 0x9b5   :  { %v7837_v55 = vpop.f32.mrb[41].mxu1 }
 0x9b8   :  { %v7839_v13 = vpop.f32.mrb[42].mxu1 }
 0x9b9   :  { %v7841_v51 = vpop.f32.mrb[43].mxu1 }
 0x9ba   :  { %v3786_v18 = vpop.permute.xlu1 %3785 }
 0x9bb   :  { %v3784_v61 = vpop.permute.xlu0 %3783  ;;  %v3840_v45 = vsel %vm8791_vm13, %v3728_v52, %v3786_v18  ;;  %vm7895_vm13 = vcmp.ne.s32.totalorder %v3659_v27, 0 }
 0x9bc   :  { %v7852_v8 = vpop.f32.mrb[44].mxu1  ;;  %v3839_v28 = vsel %vm8786_vm0, %v3727_v10, %v3784_v61  ;;  %vm7889_vm0 = vcmp.ne.s32.totalorder %v3658_v46, 0  ;;  %v8796_v2 = vsel %vm7895_vm13, 4294967295, %v8795_v2  ;;  %v3731_v46 = vsel %vm7895_vm13, %v7777_v24, 0.0  ;;  %vm8805_vm13 = vmmov %vm8801_vm11 }
 0x9bd   :  { %v7854_v53 = vpop.f32.mrb[45].mxu1  ;;  %v8794_v58 = vsel %vm7889_vm0, 4294967295, %v8793_v58  ;;  %v3730_v41 = vsel %vm7889_vm0, %v7758_v33, 0.0 }
 0x9be   :  { %v3790_v36 = vpop.permute.xlu1 %3789 }
 0x9bf   :  { %v3816_v0 = vpop.permute.xlu0 %3815  ;;  %v3842_v32 = vsel %vm8792_vm2, %v3730_v41, %v3790_v36 }
 0x9c0   :  { %v3848_v12 = vsel %vm8339_vm14, %v3839_v28, %v3816_v0  ;;  %v7860_v17 = vpop.f32.mrb[46].mxu1 }
 0x9c1   :  { %5515 = vmatprep.mubr.msk.f32.mxu1 %vm8340_vm6, %v3848_v12  ;;  %v7863_v23 = vpop.f32.mrb[47].mxu1 }
 0x9c2   :  { %v3794_v60 = vpop.permute.xlu1 %3793 }
 0x9c3   :  { %v3788_v20 = vpop.permute.xlu0 %3787 }
 0x9c4   :  { %v3841_v62 = vsel %vm8792_vm2, %v3729_v59, %v3788_v20 }
 0x9c6   :  { %v3818_v31 = vpop.permute.xlu1 %3817 }
 0x9c7   :  { %v3849_v21 = vsel %vm8339_vm14, %v3840_v45, %v3818_v31  ;;  %v3820_v39 = vpop.permute.xlu0 %3819  ;;  %v7961_v45 = vld [vmem:[%s8283_s3 + $0x6] ss:$0 sm:$0xff] }
 0x9c8   :  { %v3850_v38 = vsel %vm8339_vm14, %v3841_v62, %v3820_v39  ;;  %5516 = vmatmul.mubr.msk.f32.vlgmr.msra.gmra.mrb[48].mxu1 %vm8340_vm6, %v3849_v21  ;;  %vm7903_vm14 = vcmp.ne.s32.totalorder %v3660_v56, 0 }
 0x9c9   :  { %5518 = vmatprep.mubr.msk.f32.mxu1 %vm8340_vm6, %v3850_v38  ;;  %v8798_v25 = vsel %vm7903_vm14, 4294967295, %v8797_v25  ;;  %vm8799_vm6 = vmmov %vm8792_vm2  ;;  %v3732_v33 = vsel %vm7903_vm14, %v7773_v15, 0.0 }
 0x9ca   :  { %v3798_v6 = vpop.permute.xlu1 %3797  ;;  %vm8803_vm2 = vmmov %vm8802_vm4 }
 0x9cb   :  { %v3792_v16 = vpop.permute.xlu0 %3791  ;;  %vm8804_vm0 = vmmov %vm8799_vm6 }
 0x9cc   :  { %v3843_v27 = vsel %vm8799_vm6, %v3731_v46, %v3792_v16  ;;  %v3844_v56 = vsel %vm8804_vm0, %v3732_v33, %v3794_v60  ;;  %vm7922_vm6 = vcmp.ne.s32.totalorder %v3661_v43, 0  ;;  %v5024_v60 = vld [vmem:[%s8283_s3 + $0x7] ss:$0 sm:$0xff] }
 0x9cd   :  { %v3733_v15 = vsel %vm7922_vm6, %v7797_v40, 0.0  ;;  %v5023_v40 = vld [vmem:[%s8282_s2 + $0x7] ss:$0 sm:$0xff] }
 0x9ce   :  { %v3822_v14 = vpop.permute.xlu1 %3821  ;;  %v3477_v12 = vmul.f32 %v7835_v4, %v5023_v40  ;;  %v3476_v20 = vmul.f32 %v5023_v40, %v7837_v55  ;;  %v3479_v55 = vmul.f32 %v7839_v13, %v5023_v40  ;;  %v3478_v41 = vmul.f32 %v5023_v40, %v7841_v51 }
 0x9cf   :  { %v3851_v42 = vsel %vm8800_vm12, %v3842_v32, %v3822_v14  ;;  %v3824_v3 = vpop.permute.xlu0 %3823  ;;  %vm8811_vm12 = vmmov %vm8804_vm0 }
 0x9d0   :  { %v3852_v11 = vsel %vm8801_vm11, %v3843_v27, %v3824_v3  ;;  %5519 = vmatmul.mubr.msk.f32.gmra.mrb[50].mxu1 %vm8802_vm4, %v3851_v42  ;;  %vm7928_vm4 = vcmp.ne.s32.totalorder %v3662_v48, 0  ;;  %vm8810_vm11 = vmmov %vm8803_vm2  ;;  %v3490_v21 = vadd.f32 %v5024_v60, %v3477_v12  ;;  %v3489_v39 = vadd.f32 %v5024_v60, %v3476_v20 }
 0x9d1   :  { %5521 = vmatprep.mubr.msk.f32.mxu1 %vm8803_vm2, %v3852_v11  ;;  %v3734_v44 = vsel %vm7928_vm4, %v7782_v34, 0.0  ;;  %vm8812_vm2 = vmmov %vm8805_vm13  ;;  %v7951_v34 = vld [vmem:[%s8282_s2 + $0x6] ss:$0 sm:$0xff] }
 0x9d2   :  { %v3826_v18 = vpop.permute.xlu1 %3825  ;;  %v3846_v22 = vsel %vm8804_vm0, %v3734_v44, %v3798_v6  ;;  %vm8813_vm14 = vmmov %vm8810_vm11 }
 0x9d3   :  { %v3853_v24 = vsel %vm8805_vm13, %v3844_v56, %v3826_v18  ;;  %v3796_v61 = vpop.permute.xlu0 %3795  ;;  %v3492_v18 = vadd.f32 %v5024_v60, %v3479_v55 }
 0x9d4   :  { %5522 = vmatmul.mubr.msk.f32.gmra.mrb[52].mxu1 %vm8810_vm11, %v3853_v24  ;;  %v3845_v43 = vsel %vm8811_vm12, %v3733_v15, %v3796_v61  ;;  %v3491_v24 = vadd.f32 %v5024_v60, %v3478_v41  ;;  %v3481_v61 = vmul.f32 %v7852_v8, %v5023_v40  ;;  %vm8815_vm12 = vcmask 1040384  }
 0x9d6   :  { %v3830_v36 = vpop.permute.xlu1 %3829 }
 0x9d7   :  { %v3828_v28 = vpop.permute.xlu0 %3827  ;;  %v3855_v0 = vsel %vm8812_vm2, %v3846_v22, %v3830_v36  ;;  %v3480_v36 = vmul.f32 %v5023_v40, %v7854_v53  ;;  %v3482_v53 = vmul.f32 %v5023_v40, %v7863_v23  ;;  %vm8818_vm2 = vmmov %vm8815_vm12 }
 0x9d8   :  { %v3854_v48 = vsel %vm8805_vm13, %v3845_v43, %v3828_v28 }
 0x9d9   :  { %5524 = vmatprep.mubr.msk.f32.mxu1 %vm8813_vm14, %v3854_v48  ;;  %vm8814_vm14 = vcmask 1046528   ;;  %v3483_v48 = vmul.f32 %v7860_v17, %v5023_v40 }
 0x9da   :  { %5525 = vmatmul.mubr.msk.f32.gmra.mrb[54].mxu1 %vm8810_vm11, %v3855_v0  ;;  %vm8816_vm0 = vmmov %vm8814_vm14 }
 0x9db   :  { %vm8817_vm13 = vmmov %vm8816_vm0 }
 0x9dc   :  { %vm8819_vm11 = vmmov %vm8816_vm0 }
 0xa9b   :  { %v5517_v52 = vpop.f32.mrb[48].mxu1 }
 0xa9c   :  { %v3998_v59 = vmul.f32 %v5517_v52, %v7951_v34  ;;  %v3953_v31 = vpop.f32.mrb[49].mxu1 }
 0xa9d   :  { %v3997_v62 = vmul.f32 %v7951_v34, %v3953_v31 }
 0xa9e   :  { %v4011_v4 = vadd.f32 %v7961_v45, %v3998_v59  ;;  %v3494_v59 = vadd.f32 %v5024_v60, %v3481_v61 }
 0xa9f   :  { %v4010_v38 = vadd.f32 %v7961_v45, %v3997_v62 }
 0xaa0   :  { %v4019_v6 = vadd.f32 %v4011_v4, %v3490_v21  ;;  %v3493_v21 = vadd.f32 %v5024_v60, %v3480_v36 }
 0xaa1   :  { %v4018_v16 = vadd.f32 %v4010_v38, %v3489_v39  ;;  %v3496_v38 = vadd.f32 %v5024_v60, %v3483_v48 }
 0xaa2   :  { %v7969_v32 = vmax.f32 %v4019_v6, 0.0 }
 0xaa3   :  { %v7971_v46 = vmax.f32 %v4018_v16, 0.0  ;;  %v5520_v14 = vpop.f32.mrb[50].mxu1  ;;  %v3495_v16 = vadd.f32 %v5024_v60, %v3482_v53 }
 0xaa4   :  { %v4047_v27 = vrot.slane %v7969_v32, 7  ;;  %v4079_v42 = vrot.slane %v7969_v32, 1  ;;  %v4000_v3 = vmul.f32 %v5520_v14, %v7951_v34  ;;  %v3963_v11 = vpop.f32.mrb[51].mxu1 }
 0xaa5   :  { %v4046_v33 = vrot.slane %v7971_v46, 7  ;;  %v4078_v56 = vrot.slane %v7971_v46, 1  ;;  %v3999_v13 = vmul.f32 %v7951_v34, %v3963_v11  ;;  %v5854_v51 = vpack.i.bf16 %v7969_v32, %v7971_v46 }
 0xaa6   :  { %v4013_v15 = vadd.f32 %v7961_v45, %v4000_v3 }
 0xaa7   :  { %v4012_v44 = vadd.f32 %v7961_v45, %v3999_v13  ;;  %5855 = vrot.lane.b32.xlu0 %v5854_v51, %s5895_s20  ;;  %v5523_v43 = vpop.f32.mrb[52].mxu1  ;;  %v4080_v28 = vsel %vm8814_vm14, %v4078_v56, %v4079_v42  ;;  %v7990_v22 = vsel %vm8815_vm12, %v4046_v33, %v4047_v27  ;;  %vm8821_vm14 = vmmov %vm8818_vm2 }
 0xaa8   :  { %v4021_v0 = vadd.f32 %v4013_v15, %v3492_v18  ;;  %v4002_v8 = vmul.f32 %v5523_v43, %v7951_v34  ;;  %v3973_v12 = vpop.f32.mrb[53].mxu1  ;;  %v4102_v15 = vsel %vm7717_vm7, %v4080_v28, 0.0  ;;  %vm8820_vm7 = vmmov %vm8816_vm0 }
 0xaa9   :  { %v4020_v20 = vadd.f32 %v4012_v44, %v3491_v24  ;;  %v4001_v52 = vmul.f32 %v7951_v34, %v3973_v12 }
 0xaaa   :  { %v4029_v31 = vmax.f32 %v4021_v0, 0.0  ;;  %v4015_v62 = vadd.f32 %v7961_v45, %v4002_v8 }
 0xaab   :  { %v4028_v4 = vmax.f32 %v4020_v20, 0.0  ;;  %v4014_v39 = vadd.f32 %v7961_v45, %v4001_v52 }
 0xaac   :  { %v4083_v6 = vrot.slane %v4029_v31, 1  ;;  %v4023_v17 = vadd.f32 %v4015_v62, %v3494_v59  ;;  %v4051_v23 = vrot.slane %v4029_v31, 7 }
 0xaad   :  { %v4081_v55 = vrot.slane %v4028_v4, 1  ;;  %v4022_v41 = vadd.f32 %v4014_v39, %v3493_v21  ;;  %v5526_v32 = vpop.f32.mrb[54].mxu1  ;;  %v5859_v14 = vpack.i.bf16 %v4029_v31, %v4028_v4  ;;  %v4049_v40 = vrot.slane %v4028_v4, 7 }
 0xaae   :  { %v4031_v3 = vmax.f32 %v4023_v17, 0.0  ;;  %v4004_v11 = vmul.f32 %v5526_v32, %v7951_v34  ;;  %v3983_v56 = vpop.f32.mrb[55].mxu1 }
 0xaaf   :  { %v4030_v13 = vmax.f32 %v4022_v41, 0.0  ;;  %v4003_v51 = vmul.f32 %v7951_v34, %v3983_v56  ;;  %5860 = vrot.lane.b32.xlu0 %v5859_v14, %s5895_s20  ;;  %v4082_v18 = vsel %vm8816_vm0, %v4079_v42, %v4081_v55  ;;  %v4084_v24 = vsel %vm8817_vm13, %v4081_v55, %v4083_v6 }
 0xab0   :  { %v4087_v60 = vrot.slane %v4031_v3, 1  ;;  %v4017_v61 = vadd.f32 %v7961_v45, %v4004_v11  ;;  %v4103_v36 = vsel %vm7745_vm1, %v4082_v18, 0.0  ;;  %v4055_v0 = vrot.slane %v4031_v3, 7  ;;  %vm8822_vm1 = vmmov %vm8818_vm2 }
 0xab1   :  { %v4053_v44 = vrot.slane %v4030_v13, 7  ;;  %v4085_v43 = vrot.slane %v4030_v13, 1  ;;  %v4016_v48 = vadd.f32 %v7961_v45, %v4003_v51  ;;  %v5864_v34 = vpack.i.bf16 %v4103_v36, %v4102_v15  ;;  %vm8823_vm12 = vmmov %vm8822_vm1 }
 0xab2   :  { %v4025_v8 = vadd.f32 %v4017_v61, %v3496_v38  ;;  %v5869_v12 = vpack.i.bf16 %v4031_v3, %v4030_v13  ;;  %v8010_v42 = vsel %vm8818_vm2, %v4047_v27, %v4049_v40  ;;  %v4052_v47 = vsel %vm8821_vm14, %v4049_v40, %v4051_v23  ;;  %vm8826_vm13 = vmmov %vm8822_vm1 }
 0xab3   :  { %v4024_v53 = vadd.f32 %v4016_v48, %v3495_v16  ;;  %5865 = vrot.lane.b32.xlu1 %v5864_v34, %s5897_s10  ;;  %v4086_v63 = vsel %vm8819_vm11, %v4083_v6, %v4085_v43  ;;  %v4088_v28 = vsel %vm8820_vm7, %v4085_v43, %v4087_v60  ;;  %v4104_v45 = vsel %vm7751_vm8, %v4084_v24, 0.0  ;;  %vm8824_vm8 = vmmov %vm8816_vm0 }
 0xab4   :  { %v4033_v20 = vmax.f32 %v4025_v8, 0.0  ;;  %5870 = vrot.lane.b32.xlu0 %v5869_v12, %s5895_s20  ;;  %v4105_v52 = vsel %vm7785_vm3, %v4086_v63, 0.0  ;;  %v8022_v31 = vsel %vm8822_vm1, %v4051_v23, %v4053_v44  ;;  %v8025_v4 = vsel %vm8823_vm12, %v4053_v44, %v4055_v0  ;;  %vm8825_vm3 = vmmov %vm8816_vm0 }
 0xab5   :  { %v4032_v27 = vmax.f32 %v4024_v53, 0.0  ;;  %v5874_v59 = vpack.i.bf16 %v4105_v52, %v4104_v45  ;;  %v4106_v41 = vsel %vm7792_vm10, %v4088_v28, 0.0  ;;  %vm8827_vm2 = vmmov %vm8822_vm1  ;;  %vm8831_vm11 = vcmask 130048  }
 0xab6   :  { %v4059_v62 = vrot.slane %v4033_v20, 7  ;;  %v4091_v21 = vrot.slane %v4033_v20, 1  ;;  %vm8828_vm10 = vmmov %vm8822_vm1  ;;  %vm8833_vm14 = vcmask 261120   ;;  %vm8835_vm12 = vnez %v8790_v29 }
 0xab7   :  { %v4057_v39 = vrot.slane %v4032_v27, 7  ;;  %v4089_v38 = vrot.slane %v4032_v27, 1  ;;  %5875 = vrot.lane.b32.xlu1 %v5874_v59, %s5897_s10  ;;  %v5879_v6 = vpack.i.bf16 %v4033_v20, %v4032_v27  ;;  %v4069_v11 = vsel %vm8828_vm10, 0.0, %v4046_v33  ;;  %vm8832_vm7 = vmmov %vm8831_vm11 }
 0xab8   :  { %v4101_v37 = vsel %vm8816_vm0, %v4091_v21, 0.0  ;;  %vm8834_vm1 = vmmov %vm8833_vm14  ;;  %vm8836_vm0 = vnez %v8794_v58  ;;  %vm8841_vm10 = vnez %v8796_v2 }
 0xab9   :  { %5880 = vrot.lane.b32.xlu0 %v5879_v6, %s5895_s20  ;;  %v4090_v1 = vsel %vm8824_vm8, %v4087_v60, %v4089_v38  ;;  %v4092_v17 = vsel %vm8825_vm3, %v4089_v38, %v4091_v21  ;;  %v4109_v16 = vsel %vm7817_vm5, %v4101_v37, 0.0  ;;  %v8035_v55 = vsel %vm8826_vm13, %v4055_v0, %v4057_v39  ;;  %vm8837_vm8 = vmmov %vm8832_vm7 }
 0xaba   :  { %v4107_v32 = vsel %vm7805_vm15, %v4090_v1, 0.0  ;;  %v4108_v14 = vsel %vm7825_vm9, %v4092_v17, 0.0  ;;  %v8044_v23 = vsel %vm8827_vm2, %v4057_v39, %v4059_v62  ;;  %vm4182_vm5 = vcmask 523264   ;;  %vm8838_vm3 = vmmov %vm8832_vm7  ;;  %v4405_v17 = vld [vmem:[%s8281_s1 + $0xc8] sm:$0xff] }
 0xabb   :  { %v5884_v40 = vpack.i.bf16 %v4107_v32, %v4106_v41  ;;  %v5889_v3 = vpack.i.bf16 %v4109_v16, %v4108_v14  ;;  %5543 = vmatprep.mubr.msk.f32.mxu0 %vm4182_vm5, %v4034_v9  ;;  %vm8829_vm15 = vnez %v8785_v35  ;;  %vm8830_vm9 = vnez %v8788_v19  ;;  %vm8839_vm13 = vmmov %vm8834_vm1  ;;  %v4406_v16 = vld [vmem:[%s8281_s1 + $0xd0] sm:$0xff] }
 0xabc   :  { %v4070_v51 = vsel %vm8829_vm15, %v4069_v11, 0.0  ;;  %v4071_v18 = vsel %vm8830_vm9, %v7990_v22, 0.0  ;;  %v4072_v35 = vsel %vm8835_vm12, %v8010_v42, 0.0  ;;  %v4073_v19 = vsel %vm8836_vm0, %v4052_v47, 0.0  ;;  %vm8840_vm2 = vmmov %vm8834_vm1  ;;  %v4036_v9 = vld [vmem:[%s8285_s5 + $0x10] sm:$0xff]  ;;  %v4037_v11 = vld [vmem:[%s8285_s5 + $0x18] sm:$0xff] }
 0xabd   :  { %5885 = vrot.lane.b32.xlu1 %v5884_v40, %s5897_s10  ;;  %v4074_v47 = vsel %vm8841_vm10, %v8022_v31, 0.0  ;;  %vm8842_vm15 = vnez %v8798_v25  ;;  %vm8843_vm9 = vmmov %vm8838_vm3  ;;  %v4076_v25 = vsel %vm7922_vm6, %v8035_v55, 0.0  ;;  %v4077_v31 = vsel %vm7928_vm4, %v8044_v23, 0.0  ;;  %v4407_v23 = vld [vmem:[%s8281_s1 + $0xd8] sm:$0xff]  ;;  %v4408_v40 = vld [vmem:[%s8281_s1 + $0xe0] sm:$0xff] }
 0xabe   :  { %v4075_v45 = vsel %vm8842_vm15, %v8025_v4, 0.0  ;;  %vm8849_vm6 = vmmov %vm8840_vm2  ;;  %v5717_v14 = vpack.c.bf16 %v4406_v16, %v4405_v17  ;;  %vm8851_vm4 = vcmask 392192  }
 0xabf   :  { %vm8850_vm0 = vmmov %vm8840_vm2 }
 0xac1   :  { %5890 = vrot.lane.b32.xlu1 %v5889_v3, %s5897_s10  ;;  %v4035_v3 = vld [vmem:[%s8285_s5 + $0x8] sm:$0xff]  ;;  %s5898_s5 = smov 112  }
 0xb19   :  { %v5856_v57 = vpop.permute.xlu0 %5855 }
 0xb1a   :  { %v5858_v26 = vunpack.i.h.bf16 %v5856_v57  ;;  %v5857_v30 = vunpack.i.l.bf16 %v5856_v57  ;;  %v5721_v57 = vpack.c.bf16 %v4408_v40, %v4407_v23  ;;  %v4529_v23 = vand.u32 3, %v8764_v54 }
 0xb1c   :  { %v4166_v61 = vsel %vm8831_vm11, %v4070_v51, %v5857_v30  ;;  %v4167_v15 = vsel %vm8832_vm7, %v4071_v18, %v5858_v26  ;;  %vm8844_vm11 = vmmov %vm8838_vm3  ;;  %v4409_v26 = vld [vmem:[%s8281_s1 + $0xe8] sm:$0xff]  ;;  %v4410_v30 = vld [vmem:[%s8281_s1 + $0xf0] sm:$0xff] }
 0xb1d   :  { %vm8845_vm7 = vmmov %vm8834_vm1  ;;  %v4281_v51 = vld [vmem:[%s8281_s1 + $0x160] sm:$0xff] }
 0xb21   :  { %v5861_v56 = vpop.permute.xlu0 %5860 }
 0xb22   :  { %v5863_v36 = vunpack.i.h.bf16 %v5861_v56  ;;  %v5862_v44 = vunpack.i.l.bf16 %v5861_v56  ;;  %v5725_v56 = vpack.c.bf16 %v4410_v30, %v4409_v26 }
 0xb24   :  { %v4168_v8 = vsel %vm8837_vm8, %v4072_v35, %v5862_v44  ;;  %v4169_v12 = vsel %vm8838_vm3, %v4073_v19, %v5863_v36  ;;  %vm8852_vm8 = vmmov %vm8851_vm4  ;;  %v4626_v36 = vld [vmem:[%s8281_s1 + $0xf8] sm:$0xff]  ;;  %v4627_v44 = vld [vmem:[%s8281_s1 + $0x100] sm:$0xff] }
 0xb25   :  { %v5866_v13 = vpop.permute.xlu1 %5865 }
 0xb26   :  { %v5868_v24 = vunpack.i.h.bf16 %v5866_v13  ;;  %v5867_v60 = vunpack.i.l.bf16 %v5866_v13  ;;  %v5871_v22 = vpop.permute.xlu0 %5870  ;;  %v4280_v13 = vld [vmem:[%s8281_s1 + $0x158] sm:$0xff] }
 0xb27   :  { %v5873_v28 = vunpack.i.h.bf16 %v5871_v22  ;;  %v5872_v20 = vunpack.i.l.bf16 %v5871_v22  ;;  %v5713_v18 = vpack.c.bf16 %v4281_v51, %v4280_v13 }
 0xb28   :  { %v4174_v46 = vsel %vm8833_vm14, %v4166_v61, %v5867_v60  ;;  %v4175_v33 = vsel %vm8834_vm1, %v4167_v15, %v5868_v24  ;;  %vm8846_vm14 = vmmov %vm8834_vm1 }
 0xb29   :  { %v5876_v43 = vpop.permute.xlu1 %5875  ;;  %v5697_v48 = vpack.c.bf16 %v4175_v33, %v4174_v46  ;;  %v4170_v59 = vsel %vm8843_vm9, %v4074_v47, %v5872_v20  ;;  %v4171_v62 = vsel %vm8844_vm11, %v4075_v45, %v5873_v28  ;;  %vm8847_vm1 = vmmov %vm8838_vm3  ;;  %5714 = vmatprep.subr.bf16.mxu1 %v5713_v18  ;;  %v5729_v46 = vpack.c.bf16 %v4627_v44, %v4626_v36  ;;  %v4628_v33 = vld [vmem:[%s8281_s1 + $0x108] sm:$0xff]  ;;  %v4634_v28 = vld [vmem:[%s8281_s1 + $0x138] sm:$0xff] }
 0xb2a   :  { %v5878_v34 = vunpack.i.h.bf16 %v5876_v43  ;;  %v5877_v0 = vunpack.i.l.bf16 %v5876_v43  ;;  %vm8848_vm12 = vmmov %vm8847_vm1  ;;  %5716 = vmatpush3.bf16.msra.mxu1 %v5713_v18  ;;  %v4629_v43 = vld [vmem:[%s8281_s1 + $0x110] sm:$0xff]  ;;  %v4636_v47 = vld [vmem:[%s8281_s1 + $0x148] sm:$0xff] }
 0xb2b   :  { %5698 = vmatprep.subr.bf16.mxu0 %v5697_v48  ;;  %v5881_v42 = vpop.permute.xlu0 %5880  ;;  %vm8853_vm3 = vmmov %vm8851_vm4  ;;  %5730 = vmatprep.subr.bf16.mxu1 %v5729_v46  ;;  %v5733_v19 = vpack.c.bf16 %v4629_v43, %v4628_v33  ;;  %v4637_v45 = vld [vmem:[%s8281_s1 + $0x150] sm:$0xff] }
 0xb2c   :  { %5700 = vmatpush3.bf16.msra.mxu0 %v5697_v48  ;;  %v4176_v53 = vsel %vm8839_vm13, %v4168_v8, %v5877_v0  ;;  %v4177_v63 = vsel %vm8840_vm2, %v4169_v12, %v5878_v34  ;;  %v5883_v21 = vunpack.i.h.bf16 %v5881_v42  ;;  %v5882_v39 = vunpack.i.l.bf16 %v5881_v42  ;;  %vm8854_vm13 = vmmov %vm8853_vm3  ;;  %v4630_v0 = vld [vmem:[%s8281_s1 + $0x118] sm:$0xff]  ;;  %v4631_v8 = vld [vmem:[%s8281_s1 + $0x120] sm:$0xff] }
 0xb2d   :  { %v5701_v29 = vpack.c.bf16 %v4177_v63, %v4176_v53  ;;  %vm8855_vm2 = vmmov %vm8847_vm1  ;;  %v5737_v12 = vpack.c.bf16 %v4631_v8, %v4630_v0  ;;  %v4632_v53 = vld [vmem:[%s8281_s1 + $0x128] sm:$0xff]  ;;  %v4633_v63 = vld [vmem:[%s8281_s1 + $0x130] sm:$0xff] }
 0xb2e   :  { %v4172_v41 = vsel %vm8847_vm1, %v4076_v25, %v5882_v39  ;;  %v4173_v32 = vsel %vm8848_vm12, %v4077_v31, %v5883_v21  ;;  %vm8856_vm10 = vmmov %vm8847_vm1  ;;  %v5741_v20 = vpack.c.bf16 %v4633_v63, %v4632_v53  ;;  %vm8867_vm12 = vcmask 1046528  }
 0xb2f   :  { %5702 = vmatprep.subr.bf16.mxu0 %v5701_v29  ;;  %v5886_v58 = vpop.permute.xlu1 %5885  ;;  %vm8857_vm15 = vmmov %vm8847_vm1 }
 0xb30   :  { %v5888_v52 = vunpack.i.h.bf16 %v5886_v58  ;;  %v5887_v27 = vunpack.i.l.bf16 %v5886_v58  ;;  %5704 = vmatpush3.bf16.msra.mxu0 %v5701_v29  ;;  %vm8858_vm9 = vmmov %vm8847_vm1  ;;  %v4635_v29 = vld [vmem:[%s8281_s1 + $0x140] sm:$0xff]  ;;  %v5059_v58 = vld [vmem:[%s8282_s2 + $0x8] ss:$0 sm:$0xff]  ;;  %s5899_s1 = smov 64  }
 0xb31   :  { %v5745_v42 = vpack.c.bf16 %v4635_v29, %v4634_v28 }
 0xb32   :  { %v4178_v38 = vsel %vm8845_vm7, %v4170_v59, %v5887_v27  ;;  %v4179_v6 = vsel %vm8846_vm14, %v4171_v62, %v5888_v52  ;;  %v5060_v27 = vld [vmem:[%s8283_s3 + $0x8] ss:$0 sm:$0xff]  ;;  %v5749_v59 = vpack.c.bf16 %v4637_v45, %v4636_v47 }
 0xb33   :  { %v5891_v37 = vpop.permute.xlu1 %5890  ;;  %v5705_v2 = vpack.c.bf16 %v4179_v6, %v4178_v38  ;;  %v4526_v38 = vand.u32 3, %v8745_v50 }
 0xb34   :  { %v5893_v4 = vunpack.i.h.bf16 %v5891_v37  ;;  %v5892_v1 = vunpack.i.l.bf16 %v5891_v37  ;;  %v4527_v37 = vand.u32 3, %v8751_v49 }
 0xb35   :  { %5706 = vmatprep.subr.bf16.mxu0 %v5705_v2  ;;  %vm8181_vm11 = vcmp.ne.s32.totalorder %v4526_v38, 3  ;;  %vm8197_vm1 = vcmp.ne.s32.totalorder %v4526_v38, 0 }
 0xb36   :  { %5708 = vmatpush3.bf16.msra.mxu0 %v5705_v2  ;;  %v4180_v5 = vsel %vm8849_vm6, %v4172_v41, %v5892_v1  ;;  %v4181_v10 = vsel %vm8850_vm0, %v4173_v32, %v5893_v4  ;;  %vm8186_vm7 = vcmp.ne.s32.totalorder %v4527_v37, 0  ;;  %vm8192_vm14 = vcmp.ne.s32.totalorder %v4527_v37, 3  ;;  %v5066_v41 = vld [vmem:[%s8283_s3 + $0x9] ss:$0 sm:$0xff] }
 0xb37   :  { %v5709_v55 = vpack.c.bf16 %v4181_v10, %v4180_v5  ;;  %vm8868_vm6 = vcmask 1040384   ;;  %v5900_v37 = vmov 0.0|0.0  }
 0xb38   :  { %vm8869_vm0 = vmmov %vm8868_vm6 }
 0xb39   :  { %5710 = vmatprep.subr.bf16.mxu0 %v5709_v55 }
 0xb3a   :  { %5712 = vmatpush3.bf16.msra.mxu0 %v5709_v55 }
 0xb3b   :  { %5718 = vmatprep.subr.bf16.mxu0 %v5717_v14 }
 0xb3d   :  { %5544 = vmatmul.mubr.msk.f32.vlgmr.msra.gmra.mrb[56].mxu0 %vm4182_vm5, %v4035_v3 }
 0xb3e   :  { %5546 = vmatprep.mubr.msk.f32.mxu0 %vm4182_vm5, %v4036_v9  ;;  %5720 = vmatpush3.bf16.msra.mxu0 %v5717_v14  ;;  %v4528_v9 = vand.u32 3, %v8750_v7 }
 0xb3f   :  { %5722 = vmatprep.subr.bf16.mxu0 %v5721_v57 }
 0xb41   :  { %5547 = vmatmul.mubr.msk.f32.gmra.mrb[58].mxu0 %vm4182_vm5, %v4037_v11 }
 0xb42   :  { %5724 = vmatpush3.bf16.msra.mxu0 %v5721_v57 }
 0xb43   :  { %5726 = vmatprep.subr.bf16.mxu0 %v5725_v56 }
 0xb46   :  { %5728 = vmatpush3.bf16.msra.mxu0 %v5725_v56 }
 0xb47   :  { %5753 = vmatprep.subr.bf16.mxu0 %v5900_v37 }
 0xc10   :  { %v5545_v24 = vpop.f32.mrb[56].mxu0 }
 0xc11   :  { %4288 = vrot.lane.b32.xlu1 %v5545_v24, %s5898_s5  ;;  %v4261_v60 = vpop.f32.mrb[57].mxu0 }
 0xc12   :  { %4286 = vrot.lane.b32.xlu0 %v4261_v60, %s5898_s5  ;;  %5571 = vmatprep.mubr.msk.f32.mxu0 %vm8851_vm4, %v4261_v60  ;;  %vm8211_vm4 = vcmp.ne.s32.totalorder %v4529_v23, 0 }
 0xc13   :  { %5572 = vmatmul.mubr.msk.f32.vlgmr.msra.gmra.mrb[60].mxu0 %vm8852_vm8, %v5545_v24  ;;  %vm8215_vm8 = vcmp.ne.s32.totalorder %v4528_v9, 0 }
 0xc14   :  { %v5548_v61 = vpop.f32.mrb[58].mxu0 }
 0xc15   :  { %v4271_v15 = vpop.f32.mrb[59].mxu0  ;;  %4292 = vrot.lane.b32.xlu1 %v5548_v61, %s5898_s5 }
 0xc16   :  { %4290 = vrot.lane.b32.xlu0 %v4271_v15, %s5898_s5  ;;  %5574 = vmatprep.mubr.msk.f32.mxu0 %vm8853_vm3, %v4271_v15  ;;  %vm8874_vm3 = vmmov %vm8867_vm12 }
 0xc17   :  { %5575 = vmatmul.mubr.msk.f32.gmra.mrb[62].mxu0 %vm8854_vm13, %v5548_v61  ;;  %vm8875_vm13 = vmmov %vm8874_vm3 }
 0xc83   :  { %v4289_v48 = vpop.permute.xlu1 %4288 }
 0xc84   :  { %v4287_v35 = vpop.permute.xlu0 %4286 }
 0xc85   :  { %5553 = vmatprep.mubr.msk.f32.mxu1 %vm8855_vm2, %v4287_v35  ;;  %vm8876_vm2 = vmmov %vm8869_vm0 }
 0xc86   :  { %5554 = vmatmul.mubr.msk.f32.vlgmr.msra.gmra.mrb[56].mxu1 %vm8856_vm10, %v4289_v48  ;;  %vm8877_vm10 = vmmov %vm8869_vm0 }
 0xc87   :  { %v4293_v22 = vpop.permute.xlu1 %4292  ;;  %5732 = vmatpush3.bf16.msra.mxu1 %v5729_v46 }
 0xc88   :  { %v4291_v34 = vpop.permute.xlu0 %4290  ;;  %5734 = vmatprep.subr.bf16.mxu1 %v5733_v19 }
 0xc89   :  { %5556 = vmatprep.mubr.msk.f32.mxu1 %vm8857_vm15, %v4291_v34  ;;  %vm4536_vm15 = vcmp.ne.s32.totalorder %v4528_v9, 3 }
 0xc8a   :  { %5557 = vmatmul.mubr.msk.f32.gmra.mrb[58].mxu1 %vm8858_vm9, %v4293_v22  ;;  %vm4537_vm9 = vcmp.ne.s32.totalorder %v4529_v23, 3 }
 0xc8b   :  { %5736 = vmatpush3.bf16.msra.mxu1 %v5733_v19 }
 0xc8c   :  { %5738 = vmatprep.subr.bf16.mxu1 %v5737_v12 }
 0xc8f   :  { %5740 = vmatpush3.bf16.msra.mxu1 %v5737_v12 }
 0xc90   :  { %5742 = vmatprep.subr.bf16.mxu1 %v5741_v20 }
 0xc93   :  { %5744 = vmatpush3.bf16.msra.mxu1 %v5741_v20 }
 0xc94   :  { %5746 = vmatprep.subr.bf16.mxu1 %v5745_v42 }
 0xc97   :  { %5748 = vmatpush3.bf16.msra.mxu1 %v5745_v42 }
 0xc98   :  { %5750 = vmatprep.subr.bf16.mxu1 %v5749_v59 }
 0xc9b   :  { %5752 = vmatpush3.bf16.msra.mxu1 %v5749_v59 }
 0xce6   :  { %v5573_v52 = vpop.f32.mrb[60].mxu0 }
 0xce7   :  { %v4510_v62 = vmul.f32 %v5573_v52, %v5059_v58  ;;  %v4485_v21 = vpop.f32.mrb[61].mxu0 }
 0xce8   :  { %v4509_v39 = vmul.f32 %v5059_v58, %v4485_v21 }
 0xce9   :  { %v4519_v6 = vadd.f32 %v5060_v27, %v4510_v62 }
 0xcea   :  { %v4518_v2 = vadd.f32 %v5060_v27, %v4509_v39  ;;  %v5576_v25 = vpop.f32.mrb[62].mxu0 }
 0xceb   :  { %v4523_v31 = vmax.f32 %v4519_v6, 0.0  ;;  %v4512_v4 = vmul.f32 %v5576_v25, %v5059_v58  ;;  %v4495_v1 = vpop.f32.mrb[63].mxu0  ;;  %v5053_v25 = vld [vmem:[%s8282_s2 + $0xa] ss:$0 sm:$0xff] }
 0xcec   :  { %v4522_v17 = vmax.f32 %v4518_v2, 0.0  ;;  %v4511_v16 = vmul.f32 %v5059_v58, %v4495_v1  ;;  %v5902_v2 = vmov 0.0   ;;  %v5054_v1 = vld [vmem:[%s8283_s3 + $0xa] ss:$0 sm:$0xff] }
 0xced   :  { %v4543_v32 = vrot.slane %v4523_v31, 7  ;;  %v4567_v5 = vrot.slane %v4523_v31, 1  ;;  %v4521_v10 = vadd.f32 %v5060_v27, %v4512_v4  ;;  %4592 = vrot.lane.b32.xlu1 %v4523_v31, %s5897_s10  ;;  %v5065_v31 = vld [vmem:[%s8282_s2 + $0x9] ss:$0 sm:$0xff] }
 0xcee   :  { %v4542_v49 = vrot.slane %v4522_v17, 7  ;;  %v4566_v55 = vrot.slane %v4522_v17, 1  ;;  %v4520_v14 = vadd.f32 %v5060_v27, %v4511_v16  ;;  %4590 = vrot.lane.b32.xlu0 %v4522_v17, %s5897_s10 }
 0xcef   :  { %v4525_v40 = vmax.f32 %v4521_v10, 0.0 }
 0xcf0   :  { %v4524_v26 = vmax.f32 %v4520_v14, 0.0  ;;  %v4568_v30 = vsel %vm8867_vm12, %v4566_v55, %v4567_v5  ;;  %v4544_v11 = vsel %vm8868_vm6, %v4542_v49, %v4543_v32  ;;  %v4553_v56 = vsel %vm8869_vm0, 0.0, %v4542_v49 }
 0xcf1   :  { %v4547_v13 = vrot.slane %v4525_v40, 7  ;;  %v4571_v54 = vrot.slane %v4525_v40, 1  ;;  %4596 = vrot.lane.b32.xlu1 %v4525_v40, %s5897_s10  ;;  %v4586_v51 = vsel %vm8181_vm11, %v4568_v30, 0.0  ;;  %v4563_v7 = vsel %vm8186_vm7, %v4544_v11, 0.0  ;;  %vm8878_vm11 = vmmov %vm8874_vm3 }
 0xcf2   :  { %v4545_v18 = vrot.slane %v4524_v26, 7  ;;  %v4569_v24 = vrot.slane %v4524_v26, 1  ;;  %4606 = vrot.lane.b32.xlu0 %v4586_v51, %s5899_s1  ;;  %v4562_v60 = vsel %vm8197_vm1, %v4553_v56, 0.0  ;;  %vm4638_vm7 = vcmask 785408  }
 0xcf3   :  { %v4577_v35 = vsel %vm8878_vm11, %v4571_v54, 0.0  ;;  %vm5901_vm0 = vmmov 0  }
 0xcf4   :  { %v4570_v36 = vsel %vm8874_vm3, %v4567_v5, %v4569_v24  ;;  %v4572_v44 = vsel %vm8875_vm13, %v4569_v24, %v4571_v54  ;;  %v4548_v46 = vsel %vm8876_vm2, %v4545_v18, %v4547_v13  ;;  %v4546_v48 = vsel %vm8877_vm10, %v4543_v32, %v4545_v18  ;;  %5615 = vmatprep.mubr.msk.f32.mxu0 %vm5901_vm0, %v5902_v2 }
 0xcf5   :  { %v4587_v33 = vsel %vm8192_vm14, %v4570_v36, 0.0  ;;  %v4565_v43 = vsel %vm8211_vm4, %v4548_v46, 0.0  ;;  %v4564_v19 = vsel %vm8215_vm8, %v4546_v48, 0.0  ;;  %v4588_v22 = vsel %vm4536_vm15, %v4572_v44, 0.0  ;;  %v4836_v44 = vld [vmem:[%s8286_s7] sm:$0xff]  ;;  %v4837_v46 = vld [vmem:[%s8286_s7 + $0x8] sm:$0xff] }
 0xcf6   :  { %4594 = vrot.lane.b32.xlu0 %v4524_v26, %s5897_s10  ;;  %4608 = vrot.lane.b32.xlu1 %v4587_v33, %s5899_s1  ;;  %v4589_v34 = vsel %vm4537_vm9, %v4577_v35, 0.0  ;;  %vm8879_vm14 = vcmask 261120   ;;  %v5760_v48 = vpack.c.bf16 %v4837_v46, %v4836_v44  ;;  %v4838_v35 = vld [vmem:[%s8286_s7 + $0x10] sm:$0xff] }
 0xcf7   :  { %vm8880_vm1 = vmmov %vm8879_vm14 }
 0xcf8   :  { %vm8881_vm12 = vmmov %vm8880_vm1 }
 0xcf9   :  { %vm8882_vm6 = vmmov %vm8880_vm1 }
 0xcfa   :  { %4610 = vrot.lane.b32.xlu0 %v4588_v22, %s5899_s1  ;;  %4612 = vrot.lane.b32.xlu1 %v4589_v34, %s5899_s1  ;;  %vm8884_vm4 = vmmov %vm8880_vm1 }
 0xd59   :  { %v5555_v0 = vpop.f32.mrb[56].mxu1 }
 0xd5a   :  { %v4368_v8 = vpop.f32.mrb[57].mxu1  ;;  %v4393_v4 = vmul.f32 %v5555_v0, %v5053_v25 }
 0xd5b   :  { %v4392_v17 = vmul.f32 %v5053_v25, %v4368_v8  ;;  %v5068_v8 = vld [vmem:[%s8288_s8] ss:$0 sm:$0xff] }
 0xd5c   :  { %v4402_v50 = vadd.f32 %v5054_v1, %v4393_v4 }
 0xd5d   :  { %v5558_v12 = vpop.f32.mrb[58].mxu1  ;;  %v4401_v55 = vadd.f32 %v5054_v1, %v4392_v17 }
 0xd5e   :  { %v4378_v53 = vpop.f32.mrb[59].mxu1  ;;  %v4395_v14 = vmul.f32 %v5558_v12, %v5053_v25 }
 0xd5f   :  { %v4593_v63 = vpop.permute.xlu1 %4592  ;;  %v4394_v40 = vmul.f32 %v5053_v25, %v4378_v53 }
 0xd60   :  { %v4591_v28 = vpop.permute.xlu0 %4590  ;;  %v4619_v47 = vsel %vm8880_vm1, %v4563_v7, %v4593_v63  ;;  %v4404_v13 = vadd.f32 %v5054_v1, %v4395_v14 }
 0xd61   :  { %v4618_v29 = vsel %vm8879_vm14, %v4562_v60, %v4591_v28  ;;  %v4403_v7 = vadd.f32 %v5054_v1, %v4394_v40 }
 0xd63   :  { %v4597_v20 = vpop.permute.xlu1 %4596 }
 0xd64   :  { %v4607_v42 = vpop.permute.xlu0 %4606  ;;  %v4621_v59 = vsel %vm8881_vm12, %v4565_v43, %v4597_v20  ;;  %v4762_v43 = vld [vmem:[%s8287_s6] sm:$0xff] }
 0xd65   :  { %v4622_v58 = vsel %vm4182_vm5, %v4618_v29, %v4607_v42 }
 0xd66   :  { %5601 = vmatprep.mubr.msk.f32.mxu1 %vm4638_vm7, %v4622_v58 }
 0xd68   :  { %v4595_v45 = vpop.permute.xlu0 %4594  ;;  %v4609_v52 = vpop.permute.xlu1 %4608 }
 0xd69   :  { %v4623_v27 = vsel %vm4182_vm5, %v4619_v47, %v4609_v52  ;;  %v4620_v62 = vsel %vm8882_vm6, %v4564_v19, %v4595_v45  ;;  %v4839_v19 = vld [vmem:[%s8286_s7 + $0x18] sm:$0xff] }
 0xd6a   :  { %5602 = vmatmul.mubr.msk.f32.vlgmr.msra.gmra.mrb[60].mxu1 %vm4638_vm7, %v4623_v27  ;;  %v5763_v22 = vpack.c.bf16 %v4839_v19, %v4838_v35 }
 0xd6c   :  { %v4611_v21 = vpop.permute.xlu0 %4610  ;;  %v4613_v39 = vpop.permute.xlu1 %4612 }
 0xd6d   :  { %v4624_v38 = vsel %vm4182_vm5, %v4620_v62, %v4611_v21  ;;  %v4625_v6 = vsel %vm4182_vm5, %v4621_v59, %v4613_v39  ;;  %vm8883_vm5 = vmmov %vm8880_vm1 }
 0xd6e   :  { %5604 = vmatprep.mubr.msk.f32.mxu1 %vm4638_vm7, %v4624_v38 }
 0xd6f   :  { %5605 = vmatmul.mubr.msk.f32.gmra.mrb[62].mxu1 %vm4638_vm7, %v4625_v6 }
 0xe3d   :  { %v5603_v16 = vpop.f32.mrb[60].mxu1 }
 0xe3e   :  { %v4742_v32 = vmul.f32 %v5603_v16, %v5065_v31  ;;  %v4717_v5 = vpop.f32.mrb[61].mxu1 }
 0xe3f   :  { %v4741_v10 = vmul.f32 %v5065_v31, %v4717_v5 }
 0xe40   :  { %v4751_v49 = vadd.f32 %v5066_v41, %v4742_v32 }
 0xe41   :  { %v4750_v23 = vadd.f32 %v5066_v41, %v4741_v10 }
 0xe42   :  { %v4755_v3 = vadd.f32 %v4751_v49, %v4402_v50  ;;  %v5606_v9 = vpop.f32.mrb[62].mxu1 }
 0xe43   :  { %v4754_v57 = vadd.f32 %v4750_v23, %v4401_v55  ;;  %v4744_v26 = vmul.f32 %v5606_v9, %v5065_v31  ;;  %v4727_v30 = vpop.f32.mrb[63].mxu1 }
 0xe44   :  { %v4759_v11 = vmax.f32 %v4755_v3, 0.0  ;;  %v4743_v56 = vmul.f32 %v5065_v31, %v4727_v30 }
 0xe45   :  { %v4758_v54 = vmax.f32 %v4754_v57, 0.0  ;;  %v4753_v51 = vadd.f32 %v5066_v41, %v4744_v26 }
 0xe46   :  { %v4752_v18 = vadd.f32 %v5066_v41, %v4743_v56 }
 0xe47   :  { %v5754_v24 = vpack.c.bf16 %v4759_v11, %v4758_v54  ;;  %v4757_v60 = vadd.f32 %v4753_v51, %v4404_v13 }
 0xe48   :  { %v4756_v61 = vadd.f32 %v4752_v18, %v4403_v7 }
 0xe49   :  { %v4761_v15 = vmax.f32 %v4757_v60, 0.0  ;;  %5755 = vmatpush3.bf16.msra.mxu0 %v5754_v24 }
 0xe4a   :  { %v4760_v36 = vmax.f32 %v4756_v61, 0.0  ;;  %5756 = vmatprep.subr.bf16.mxu0 %v5900_v37 }
 0xe4c   :  { %v5757_v33 = vpack.c.bf16 %v4761_v15, %v4760_v36 }
 0xe4e   :  { %5758 = vmatpush3.bf16.msra.mxu0 %v5757_v33 }
 0xe4f   :  { %5759 = vmatprep.subr.bf16.mxu0 %v5900_v37 }
 0xe51   :  { %5616 = vmatmul.mubr.msk.f32.vlgmr.msra.gmra.mrb[64].mxu0 %vm8883_vm5, %v4762_v43 }
 0xe52   :  { %5761 = vmatpush3.bf16.msra.mxu0 %v5760_v48  ;;  %5626 = vmatprep.mubr.msk.f32.mxu0 %vm5901_vm0, %v5902_v2 }
 0xe53   :  { %5762 = vmatprep.subr.bf16.mxu0 %v5900_v37 }
 0xe56   :  { %5764 = vmatpush3.bf16.msra.mxu0 %v5763_v22 }
 0xf24   :  { %v4832_v34 = vpop.f32.mrb[64].mxu0 }
 0xf25   :  { %v5617_v0 = vpop.f32.mrb[65].mxu0  ;;  %5627 = vmatmul.mubr.msk.f32.vlgmr.msra.gmra.mrb[66].mxu0 %vm8884_vm4, %v4832_v34 }
 0xff8   :  { %v4916_v12 = vpop.f32.mrb[66].mxu0 }
 0xff9   :  { %v4917_v53 = vadd.f32 %v5068_v8, %v4916_v12  ;;  %v5628_v63 = vpop.f32.mrb[67].mxu0 }
 0xffb   :  { %4920 = vst [vmem:[%s8289_s9] sm:$0xff] %v4917_v53 }

</bundles_post_ra>
